<compile_context>
chip_gen: v6e
topology: v6e:2x2x1
jax: 0.10.0
libtpu: 0.0.40
codegen_flags: <defaults>
</compile_context>

<pallas_src>
import functools

import jax
import jax.numpy as jnp
from jax.experimental import pallas as pl
from jax.experimental.pallas import tpu as pltpu


_ALIGN = 128  # lane alignment for padded feature / class dims


def _round_up(x, m):
    return (x + m - 1) // m * m


def _cdiv(a, b):
    return (a + b - 1) // b


def _pad2(a, rows, cols):
    out = jnp.zeros((rows, cols), a.dtype)
    return out.at[: a.shape[0], : a.shape[1]].set(a)


# ----------------------------------------------------------------------------
# Kernel: one batch tile (TB rows) of the whole M3PA forward hot path.
# All matmul operands are bf16 (f32 accumulation); elementwise math is f32.
# ----------------------------------------------------------------------------
def m3pa_kernel(
    # batch-sliced data (TB rows each)
    bert_ref,       # (TB, Dbp)        bf16  (zero-padded to 128 lanes)
    ndist_ref,      # (TB, K)          f32
    nearflat_ref,   # (TB, K*P)        bf16  (row-major flatten of (K, P))
    street_ref,     # (TB, Dsp)        bf16  (zero-padded)
    # resident weights (constant index maps)
    geo_k_ref,      # (K, K)           bf16
    geo_b_ref,      # (1, K)           f32
    rep_ref,        # (K, K*P)         bf16  repeat-interleave 0/1 matrix
    cs_wexp_ref,    # (K*P, Dsp)       bf16  change_shape weight tiled K times
    cs_b_ref,       # (1, Dsp)         f32
    proj_w1_ref,    # (Dbp+Dsp, Dbp+Dsp) bf16  block-diag(p1_w1, p2_w1), 128-aligned
    proj_b1_ref,    # (1, Dbp+Dsp)     f32
    proj_w2_ref,    # (Dbp+Dsp, 2*Hp)  bf16  block-diag(p1_w2, p2_w2), 128-aligned
    proj_b2_ref,    # (1, 2*Hp)        f32
    att_w1_ref,     # (2*Hp, 2*Ap)     bf16  block-diag(att_l1_w, att_l1_w)
    att_b1_ref,     # (1, 2*Ap)        f32
    att_w2d_ref,    # (2*Ap, 1)        bf16  [att_l2_w; -att_l2_w]  (score difference)
    fus_w1_ref,     # (Hp, Hp)         bf16
    fus_b1_ref,     # (1, Hp)          f32
    fus_w2_ref,     # (Hp, Hp)         bf16
    fus_b2_ref,     # (1, Hp)          f32
    cls_w_ref,      # (Hp, Cp)         bf16  zero-padded to lane width
    cls_b_ref,      # (1, Cp)          f32
    # output
    logits_ref,     # (TB, Cp)         bf16  lane-dense logits slab
):
    f32 = jnp.float32
    bf16 = jnp.bfloat16
    Hp = fus_w1_ref.shape[0]

    # ---------------- GeoAttention (lane-dense formulation) ----------------
    dist = ndist_ref[...]                                  # (TB, K) f32
    simi = jnp.exp(dist * (-50.0))                         # exp(-x * 10^2/2)
    scores = jnp.dot(simi.astype(bf16), geo_k_ref[...],
                     preferred_element_type=f32) + geo_b_ref[...]
    scores = scores - jnp.max(scores, axis=1, keepdims=True)
    e = jnp.exp(scores)
    w = e / jnp.sum(e, axis=1, keepdims=True)              # exact softmax over K

    # repeat_interleave(w, P) via a 0/1 matmul -> stays lane-dense (TB, K*P)
    w_rep = jnp.dot(w.astype(bf16), rep_ref[...], preferred_element_type=f32)
    rel = w_rep * nearflat_ref[...].astype(f32)            # (TB, K*P)
    # sum over K (and change_shape P -> Dstreet) folded into one matmul
    neiber = jnp.dot(rel.astype(bf16), cs_wexp_ref[...],
                     preferred_element_type=f32) + cs_b_ref[...]      # (TB, Dsp)
    batch_vec = neiber + street_ref[...].astype(f32)                   # (TB, Dsp)

    # ---------------- projector1 + projector2 (block-diagonal fusion) --------
    # xcat = [bert | batch_vec]; both halves are 128-lane aligned, so the concat
    # and the later h1/h2 slices need no cross-lane relayout.
    xcat = jnp.concatenate([bert_ref[...], batch_vec.astype(bf16)], axis=1)
    h = jnp.dot(xcat, proj_w1_ref[...],
                preferred_element_type=f32) + proj_b1_ref[...]
    h = jnp.maximum(h, 0.0)
    h = jnp.dot(h.astype(bf16), proj_w2_ref[...],
                preferred_element_type=f32) + proj_b2_ref[...]         # (TB, 2*Hp)
    h1 = h[:, :Hp]                                                     # projector1 out
    h2 = h[:, Hp:]                                                     # projector2 out

    # ---------------- fusion attention: exact sigmoid form of 2-way softmax --
    a = jnp.tanh(jnp.dot(h.astype(bf16), att_w1_ref[...],
                         preferred_element_type=f32) + att_b1_ref[...])  # (TB, 2*Ap)
    sdiff = jnp.dot(a.astype(bf16), att_w2d_ref[...],
                    preferred_element_type=f32)                          # (TB, 1) = s1-s2
    beta1 = 1.0 / (1.0 + jnp.exp(-sdiff))                 # softmax([s1,s2])[0], exact
    fused = beta1 * h1 + (1.0 - beta1) * h2               # (TB, Hp)

    # ---------------- fusion linear layers ----------------
    out = jnp.dot(fused.astype(bf16), fus_w1_ref[...],
                  preferred_element_type=f32) + fus_b1_ref[...]
    out = jnp.maximum(out, 0.0)
    out = jnp.dot(out.astype(bf16), fus_w2_ref[...],
                  preferred_element_type=f32) + fus_b2_ref[...]

    # ---------------- classifier: Dropout(id) -> ReLU -> Linear --------------
    out = jnp.maximum(out, 0.0)
    logits = jnp.dot(out.astype(bf16), cls_w_ref[...],
                     preferred_element_type=f32) + cls_b_ref[...]
    logits_ref[...] = logits.astype(logits_ref.dtype)


# ----------------------------------------------------------------------------
# Parameter construction (deterministic, matches the PyTorch __init__ shapes).
# Linear weights are stored as (in_features, out_features) so y = x @ W + b.
# ----------------------------------------------------------------------------
def init_params(key, *, bert_input_dim, street_input_dim, hidden_dim,
                num_nearest, shape_input_phenomenon, num_semantic_types,
                att_hidden=32):
    def nxt():
        nonlocal key
        key, sub = jax.random.split(key)
        return sub

    def lin(din, dout, scale=0.05):
        w = jax.random.normal(nxt(), (din, dout), jnp.float32) * scale
        b = jax.random.normal(nxt(), (1, dout), jnp.float32) * scale
        return w, b

    p = {}
    p["geo_k"] = jax.random.normal(nxt(), (num_nearest, num_nearest), jnp.float32)
    p["geo_b"] = jax.random.normal(nxt(), (1, num_nearest), jnp.float32)
    p["cs_w"], p["cs_b"] = lin(shape_input_phenomenon, street_input_dim)
    p["p1_w1"], p["p1_b1"] = lin(bert_input_dim, bert_input_dim)
    p["p1_w2"], p["p1_b2"] = lin(bert_input_dim, hidden_dim)
    p["p2_w1"], p["p2_b1"] = lin(street_input_dim, street_input_dim)
    p["p2_w2"], p["p2_b2"] = lin(street_input_dim, hidden_dim)
    p["att_l1_w"], p["att_l1_b"] = lin(hidden_dim, att_hidden)
    p["att_l2_w"] = jax.random.normal(nxt(), (att_hidden, 1), jnp.float32) * 0.05
    p["fus_w1"], p["fus_b1"] = lin(hidden_dim, hidden_dim)
    p["fus_w2"], p["fus_b2"] = lin(hidden_dim, hidden_dim)
    p["cls_w"], p["cls_b"] = lin(hidden_dim, num_semantic_types)
    return p


def prepare_kernel_params(p, *, street_input_dim, shape_input_phenomenon):
    """Build the fused / block-diagonal / 128-lane-padded weights the kernel uses.

    Every per-branch column (and matching row) block is padded to a multiple of 128
    so in-kernel branch slices are vreg-aligned.  Padding rows/cols and pad biases
    are zero, so padded lanes carry exact zeros through every layer (ReLU/tanh(0)=0).
    Matmul weights are bf16 (MXU-native); biases stay f32.
    """
    bf16, f32 = jnp.bfloat16, jnp.float32
    Kn = p["geo_k"].shape[0]
    P = shape_input_phenomenon
    Ds = street_input_dim
    Db = p["p1_w1"].shape[0]
    H = p["p1_w2"].shape[1]
    A = p["att_l1_w"].shape[1]
    C = p["cls_w"].shape[1]
    Dbp, Dsp, Hp, Ap, Cp = [_round_up(d, _ALIGN) for d in (Db, Ds, H, A, C)]

    kp = {}
    kp["geo_k"] = p["geo_k"].astype(bf16)
    kp["geo_b"] = p["geo_b"].astype(f32)

    # repeat_interleave(., P) as a 0/1 matrix: rep[k, k*P + q] = 1
    kp["rep"] = jnp.kron(jnp.eye(Kn, dtype=f32), jnp.ones((1, P), f32)).astype(bf16)

    # change_shape weight (identity when the module would skip it), tiled K times
    # vertically so the sum over K and the P->Dstreet projection fuse into one dot.
    if Ds == P:
        cs_w_eff = jnp.eye(P, dtype=f32)
        cs_b_eff = jnp.zeros((1, Ds), f32)
    else:
        cs_w_eff = p["cs_w"]
        cs_b_eff = p["cs_b"]
    kp["cs_wexp"] = _pad2(jnp.tile(cs_w_eff, (Kn, 1)), Kn * P, Dsp).astype(bf16)
    kp["cs_b"] = _pad2(cs_b_eff, 1, Dsp).astype(f32)

    # projector1 + projector2 fused via 128-aligned block-diagonal weights.
    w1 = jnp.zeros((Dbp + Dsp, Dbp + Dsp), f32)
    w1 = w1.at[:Db, :Db].set(p["p1_w1"]).at[Dbp:Dbp + Ds, Dbp:Dbp + Ds].set(p["p2_w1"])
    kp["proj_w1"] = w1.astype(bf16)
    b1 = jnp.zeros((1, Dbp + Dsp), f32)
    kp["proj_b1"] = b1.at[:, :Db].set(p["p1_b1"]).at[:, Dbp:Dbp + Ds].set(p["p2_b1"])

    w2 = jnp.zeros((Dbp + Dsp, 2 * Hp), f32)
    w2 = w2.at[:Db, :H].set(p["p1_w2"]).at[Dbp:Dbp + Ds, Hp:Hp + H].set(p["p2_w2"])
    kp["proj_w2"] = w2.astype(bf16)
    b2 = jnp.zeros((1, 2 * Hp), f32)
    kp["proj_b2"] = b2.at[:, :H].set(p["p1_b2"]).at[:, Hp:Hp + H].set(p["p2_b2"])

    # fusion attention: both branches share l1 weights -> duplicate on the block diag.
    aw1 = jnp.zeros((2 * Hp, 2 * Ap), f32)
    aw1 = aw1.at[:H, :A].set(p["att_l1_w"]).at[Hp:Hp + H, Ap:Ap + A].set(p["att_l1_w"])
    kp["att_w1"] = aw1.astype(bf16)
    ab1 = jnp.zeros((1, 2 * Ap), f32)
    kp["att_b1"] = ab1.at[:, :A].set(p["att_l1_b"]).at[:, Ap:Ap + A].set(p["att_l1_b"])

    # l2 has no bias; only s1 - s2 is needed (sigmoid form), so store the difference
    # projection directly: [w2; -w2].
    aw2 = jnp.zeros((2 * Ap, 1), f32)
    aw2 = aw2.at[:A, :].set(p["att_l2_w"]).at[Ap:Ap + A, :].set(-p["att_l2_w"])
    kp["att_w2d"] = aw2.astype(bf16)

    kp["fus_w1"] = _pad2(p["fus_w1"], Hp, Hp).astype(bf16)
    kp["fus_b1"] = _pad2(p["fus_b1"], 1, Hp).astype(f32)
    kp["fus_w2"] = _pad2(p["fus_w2"], Hp, Hp).astype(bf16)
    kp["fus_b2"] = _pad2(p["fus_b2"], 1, Hp).astype(f32)

    kp["cls_w"] = _pad2(p["cls_w"], Hp, Cp).astype(bf16)
    kp["cls_b"] = _pad2(p["cls_b"], 1, Cp).astype(f32)
    return kp


KPARAM_ORDER = [
    "geo_k", "geo_b", "rep", "cs_wexp", "cs_b",
    "proj_w1", "proj_b1", "proj_w2", "proj_b2",
    "att_w1", "att_b1", "att_w2d",
    "fus_w1", "fus_b1", "fus_w2", "fus_b2",
    "cls_w", "cls_b",
]


@functools.partial(
    jax.jit,
    static_argnames=("num_semantic_types", "block_b", "single_buffer_weights"))
def m3pa_forward(bert_embedding, n_dist, near_feature, poi_street_embedding,
                 labels, kparams, *, num_semantic_types, block_b=512,
                 single_buffer_weights=True):
    bf16 = jnp.bfloat16
    B, Db = bert_embedding.shape
    _, Kn, P = near_feature.shape
    Ds = poi_street_embedding.shape[1]
    Dbp = _round_up(Db, _ALIGN)
    Dsp = _round_up(Ds, _ALIGN)
    Cp = kparams["cls_w"].shape[1]

    # Batch tile: multiple of 16 rows (bf16 sublane packing), at most block_b,
    # and aimed at >= 2 grid blocks so v7x's two TensorCores both get work.
    TB = _round_up(max(16, min(block_b, _cdiv(B, 2))), 16)
    n_blocks = _cdiv(B, TB)
    B_pad = n_blocks * TB
    padB = B_pad - B

    # Activations streamed in bf16 (kernel is HBM-bound); n_dist stays f32 (tiny).
    bert = jnp.pad(bert_embedding.astype(bf16), ((0, padB), (0, Dbp - Db)))
    ndist = jnp.pad(n_dist.astype(jnp.float32), ((0, padB), (0, 0)))
    near_flat = jnp.pad(near_feature.reshape(B, Kn * P).astype(bf16),
                        ((0, padB), (0, 0)))
    street = jnp.pad(poi_street_embedding.astype(bf16), ((0, padB), (0, Dsp - Ds)))

    def data_spec(width):
        return pl.BlockSpec((TB, width), lambda i: (i, 0))

    def weight_spec(arr):
        # Constant index map -> weight is VMEM-resident across the whole grid.
        if single_buffer_weights:
            return pl.BlockSpec(arr.shape, lambda i: (0, 0),
                                pipeline_mode=pl.Buffered(1))
        return pl.BlockSpec(arr.shape, lambda i: (0, 0))

    weight_inputs = [kparams[k] for k in KPARAM_ORDER]

    logits_pad = pl.pallas_call(
        m3pa_kernel,
        grid=(n_blocks,),
        in_specs=[data_spec(Dbp), data_spec(Kn), data_spec(Kn * P), data_spec(Dsp)]
                 + [weight_spec(w) for w in weight_inputs],
        out_specs=pl.BlockSpec((TB, Cp), lambda i: (i, 0)),
        out_shape=jax.ShapeDtypeStruct((B_pad, Cp), bf16),
        compiler_params=pltpu.CompilerParams(
            dimension_semantics=("parallel",),
            vmem_limit_bytes=64 * 1024 * 1024),
    )(bert, ndist, near_flat, street, *weight_inputs)

    # Strip batch / lane padding; upcast for the loss.
    logits = logits_pad[:B, :num_semantic_types].astype(jnp.float32)

    # Mean cross-entropy in plain XLA (keeps the kernel grid purely parallel).
    logp = jax.nn.log_softmax(logits, axis=-1)
    labels2d = labels.reshape(-1, 1).astype(jnp.int32)
    nll = -jnp.take_along_axis(logp, labels2d, axis=-1)
    return jnp.mean(nll), logits


# ----------------------------------------------------------------------------
# Pure-JAX f32 reference (mirrors the PyTorch forward) for a tolerance check.
# ----------------------------------------------------------------------------
def m3pa_reference(bert, n_dist, near, street, labels, p, *,
                   street_input_dim, shape_input_phenomenon):
    simi = jnp.exp(-n_dist * 50.0)
    w = jax.nn.softmax(simi @ p["geo_k"] + p["geo_b"], axis=1)
    neiber = jnp.sum(w[:, :, None] * near, axis=1)
    if street_input_dim != shape_input_phenomenon:
        neiber = neiber @ p["cs_w"] + p["cs_b"]
    batch_vec = neiber + street
    h1 = jnp.maximum(bert @ p["p1_w1"] + p["p1_b1"], 0.0) @ p["p1_w2"] + p["p1_b2"]
    h2 = jnp.maximum(batch_vec @ p["p2_w1"] + p["p2_b1"], 0.0) @ p["p2_w2"] + p["p2_b2"]

    def att_score(x):
        return jnp.tanh(x @ p["att_l1_w"] + p["att_l1_b"]) @ p["att_l2_w"]

    beta = jax.nn.softmax(jnp.concatenate([att_score(h1), att_score(h2)], axis=1), axis=1)
    fused = beta[:, 0:1] * h1 + beta[:, 1:2] * h2
    out = jnp.maximum(fused @ p["fus_w1"] + p["fus_b1"], 0.0) @ p["fus_w2"] + p["fus_b2"]
    out = jnp.maximum(out, 0.0)
    logits = out @ p["cls_w"] + p["cls_b"]
    logp = jax.nn.log_softmax(logits, axis=-1)
    nll = -jnp.take_along_axis(logp, labels.reshape(-1, 1).astype(jnp.int32), axis=-1)
    return jnp.mean(nll), logits


if __name__ == "__main__":
    # Small, module-consistent shapes (batch tiled into 2 grid blocks of 32 rows).
    B = 64
    num_nearest = 8             # K
    shape_input_phenomenon = 16  # P   (K*P = 128 -> one full lane row)
    street_input_dim = 32
    bert_input_dim = 32
    hidden_dim = 32
    num_semantic_types = 8

    key = jax.random.PRNGKey(0)
    k_params, k_bert, k_dist, k_near, k_street, k_lab = jax.random.split(key, 6)

    params = init_params(
        k_params,
        bert_input_dim=bert_input_dim,
        street_input_dim=street_input_dim,
        hidden_dim=hidden_dim,
        num_nearest=num_nearest,
        shape_input_phenomenon=shape_input_phenomenon,
        num_semantic_types=num_semantic_types,
    )
    kparams = prepare_kernel_params(
        params,
        street_input_dim=street_input_dim,
        shape_input_phenomenon=shape_input_phenomenon,
    )

    # TODO(synk): geobert is an external BERT submodule; its `.hidden_states`
    # output is synthesized here as a direct (B, bert_input_dim) input.
    bert_embedding = jax.random.normal(k_bert, (B, bert_input_dim), jnp.float32)
    n_dist = jax.random.uniform(k_dist, (B, num_nearest), jnp.float32, 0.0, 0.1)
    near_feature = jax.random.normal(
        k_near, (B, num_nearest, shape_input_phenomenon), jnp.float32)
    poi_street_embedding = jax.random.normal(
        k_street, (B, street_input_dim), jnp.float32)
    labels = jax.random.randint(k_lab, (B,), 0, num_semantic_types, jnp.int32)

    def run(single_buffer):
        out = m3pa_forward(
            bert_embedding, n_dist, near_feature, poi_street_embedding, labels,
            kparams, num_semantic_types=num_semantic_types, block_b=512,
            single_buffer_weights=single_buffer)
        jax.block_until_ready(out)
        return out

    try:
        loss, logits = run(True)
    except Exception:
        # pipeline_mode=pl.Buffered(1) not supported on this build: fall back to
        # default double-buffered (but still VMEM-resident) weight specs.
        loss, logits = run(False)

    # Tolerance check against a plain-JAX f32 reference (covers bf16 deltas).
    ref_loss, ref_logits = m3pa_reference(
        bert_embedding, n_dist, near_feature, poi_street_embedding, labels, params,
        street_input_dim=street_input_dim,
        shape_input_phenomenon=shape_input_phenomenon)

    assert logits.shape == (B, num_semantic_types)
    assert loss.shape == ()
    assert bool(jnp.all(jnp.isfinite(logits))) and bool(jnp.isfinite(loss))
    assert float(jnp.max(jnp.abs(logits - ref_logits))) < 1e-1
    assert float(jnp.abs(loss - ref_loss)) < 5e-2
    print("KERNEL_OK")
</pallas_src>

<mosaic_0001>
module attributes {stable_mosaic.version = 11 : i64} {
  func.func @m3pa_kernel(%arg0: i32, %arg1: memref<32x128xbf16, #tpu.memory_space<vmem>>, %arg2: memref<32x8xf32, #tpu.memory_space<vmem>>, %arg3: memref<32x128xbf16, #tpu.memory_space<vmem>>, %arg4: memref<32x128xbf16, #tpu.memory_space<vmem>>, %arg5: memref<8x8xbf16, #tpu.memory_space<vmem>>, %arg6: memref<1x8xf32, #tpu.memory_space<vmem>>, %arg7: memref<8x128xbf16, #tpu.memory_space<vmem>>, %arg8: memref<128x128xbf16, #tpu.memory_space<vmem>>, %arg9: memref<1x128xf32, #tpu.memory_space<vmem>>, %arg10: memref<256x256xbf16, #tpu.memory_space<vmem>>, %arg11: memref<1x256xf32, #tpu.memory_space<vmem>>, %arg12: memref<256x256xbf16, #tpu.memory_space<vmem>>, %arg13: memref<1x256xf32, #tpu.memory_space<vmem>>, %arg14: memref<256x256xbf16, #tpu.memory_space<vmem>>, %arg15: memref<1x256xf32, #tpu.memory_space<vmem>>, %arg16: memref<256x1xbf16, #tpu.memory_space<vmem>>, %arg17: memref<128x128xbf16, #tpu.memory_space<vmem>>, %arg18: memref<1x128xf32, #tpu.memory_space<vmem>>, %arg19: memref<128x128xbf16, #tpu.memory_space<vmem>>, %arg20: memref<1x128xf32, #tpu.memory_space<vmem>>, %arg21: memref<128x128xbf16, #tpu.memory_space<vmem>>, %arg22: memref<1x128xf32, #tpu.memory_space<vmem>>, %arg23: memref<32x128xbf16, #tpu.memory_space<vmem>>) attributes {dimension_semantics = [#tpu.dimension_semantics<parallel>], iteration_bounds = array<i64: 2>, scalar_prefetch = 0 : i64, scratch_operands = 0 : i64, tpu.core_type = #tpu.core_type<tc>, window_params = [{transform_indices = @transform_0, window_bounds = array<i64: 32, 128>}, {transform_indices = @transform_1, window_bounds = array<i64: 32, 8>}, {transform_indices = @transform_2, window_bounds = array<i64: 32, 128>}, {transform_indices = @transform_3, window_bounds = array<i64: 32, 128>}, {pipeline_mode = #tpu.pipeline_mode<synchronous>, transform_indices = @transform_4, window_bounds = array<i64: 8, 8>}, {pipeline_mode = #tpu.pipeline_mode<synchronous>, transform_indices = @transform_5, window_bounds = array<i64: 1, 8>}, {pipeline_mode = #tpu.pipeline_mode<synchronous>, transform_indices = @transform_6, window_bounds = array<i64: 8, 128>}, {pipeline_mode = #tpu.pipeline_mode<synchronous>, transform_indices = @transform_7, window_bounds = array<i64: 128, 128>}, {pipeline_mode = #tpu.pipeline_mode<synchronous>, transform_indices = @transform_8, window_bounds = array<i64: 1, 128>}, {pipeline_mode = #tpu.pipeline_mode<synchronous>, transform_indices = @transform_9, window_bounds = array<i64: 256, 256>}, {pipeline_mode = #tpu.pipeline_mode<synchronous>, transform_indices = @transform_10, window_bounds = array<i64: 1, 256>}, {pipeline_mode = #tpu.pipeline_mode<synchronous>, transform_indices = @transform_11, window_bounds = array<i64: 256, 256>}, {pipeline_mode = #tpu.pipeline_mode<synchronous>, transform_indices = @transform_12, window_bounds = array<i64: 1, 256>}, {pipeline_mode = #tpu.pipeline_mode<synchronous>, transform_indices = @transform_13, window_bounds = array<i64: 256, 256>}, {pipeline_mode = #tpu.pipeline_mode<synchronous>, transform_indices = @transform_14, window_bounds = array<i64: 1, 256>}, {pipeline_mode = #tpu.pipeline_mode<synchronous>, transform_indices = @transform_15, window_bounds = array<i64: 256, 1>}, {pipeline_mode = #tpu.pipeline_mode<synchronous>, transform_indices = @transform_16, window_bounds = array<i64: 128, 128>}, {pipeline_mode = #tpu.pipeline_mode<synchronous>, transform_indices = @transform_17, window_bounds = array<i64: 1, 128>}, {pipeline_mode = #tpu.pipeline_mode<synchronous>, transform_indices = @transform_18, window_bounds = array<i64: 128, 128>}, {pipeline_mode = #tpu.pipeline_mode<synchronous>, transform_indices = @transform_19, window_bounds = array<i64: 1, 128>}, {pipeline_mode = #tpu.pipeline_mode<synchronous>, transform_indices = @transform_20, window_bounds = array<i64: 128, 128>}, {pipeline_mode = #tpu.pipeline_mode<synchronous>, transform_indices = @transform_21, window_bounds = array<i64: 1, 128>}, {transform_indices = @transform_22, window_bounds = array<i64: 32, 128>}]} {
    %c0 = arith.constant 0 : index
    %c0_0 = arith.constant 0 : index
    %0 = vector.load %arg2[%c0, %c0_0] : memref<32x8xf32, #tpu.memory_space<vmem>>, vector<32x8xf32>
    %cst = arith.constant -5.000000e+01 : f32
    %1 = vector.broadcast %cst : f32 to vector<32x8xf32>
    %2 = arith.mulf %0, %1 : vector<32x8xf32>
    %3 = math.exp %2 : vector<32x8xf32>
    %4 = arith.truncf %3 : vector<32x8xf32> to vector<32x8xbf16>
    %c0_1 = arith.constant 0 : index
    %c0_2 = arith.constant 0 : index
    %5 = vector.load %arg5[%c0_1, %c0_2] : memref<8x8xbf16, #tpu.memory_space<vmem>>, vector<8x8xbf16>
    %cst_3 = arith.constant dense<0.000000e+00> : vector<32x8xf32>
    %6 = tpu.matmul %4, %5, %cst_3 {dimension_numbers = #tpu.dot_dimension_numbers<[1], [0], [0], [1], [0, 0, 1, 1], [], []>} : vector<32x8xbf16>, vector<8x8xbf16>, vector<32x8xf32> -> vector<32x8xf32>
    %c0_4 = arith.constant 0 : index
    %c0_5 = arith.constant 0 : index
    %7 = vector.load %arg6[%c0_4, %c0_5] : memref<1x8xf32, #tpu.memory_space<vmem>>, vector<1x8xf32>
    %8 = vector.broadcast %7 : vector<1x8xf32> to vector<32x8xf32>
    %9 = arith.addf %6, %8 : vector<32x8xf32>
    %cst_6 = arith.constant dense<0xFF800000> : vector<32xf32>
    %10 = vector.multi_reduction <maximumf>, %9, %cst_6 [1] : vector<32x8xf32> to vector<32xf32>
    %11 = vector.shape_cast %10 : vector<32xf32> to vector<32x1xf32>
    %12 = vector.broadcast %11 : vector<32x1xf32> to vector<32x8xf32>
    %13 = arith.subf %9, %12 : vector<32x8xf32>
    %14 = math.exp %13 : vector<32x8xf32>
    %cst_7 = arith.constant dense<0.000000e+00> : vector<32xf32>
    %15 = vector.multi_reduction <add>, %14, %cst_7 [1] : vector<32x8xf32> to vector<32xf32>
    %16 = vector.shape_cast %15 : vector<32xf32> to vector<32x1xf32>
    %17 = vector.broadcast %16 : vector<32x1xf32> to vector<32x8xf32>
    %18 = arith.divf %14, %17 : vector<32x8xf32>
    %19 = arith.truncf %18 : vector<32x8xf32> to vector<32x8xbf16>
    %c0_8 = arith.constant 0 : index
    %c0_9 = arith.constant 0 : index
    %20 = vector.load %arg7[%c0_8, %c0_9] : memref<8x128xbf16, #tpu.memory_space<vmem>>, vector<8x128xbf16>
    %cst_10 = arith.constant dense<0.000000e+00> : vector<32x128xf32>
    %21 = tpu.matmul %19, %20, %cst_10 {dimension_numbers = #tpu.dot_dimension_numbers<[1], [0], [0], [1], [0, 0, 1, 1], [], []>} : vector<32x8xbf16>, vector<8x128xbf16>, vector<32x128xf32> -> vector<32x128xf32>
    %c0_11 = arith.constant 0 : index
    %c0_12 = arith.constant 0 : index
    %22 = vector.load %arg3[%c0_11, %c0_12] : memref<32x128xbf16, #tpu.memory_space<vmem>>, vector<32x128xbf16>
    %23 = arith.extf %22 : vector<32x128xbf16> to vector<32x128xf32>
    %24 = arith.mulf %21, %23 : vector<32x128xf32>
    %25 = arith.truncf %24 : vector<32x128xf32> to vector<32x128xbf16>
    %c0_13 = arith.constant 0 : index
    %c0_14 = arith.constant 0 : index
    %26 = vector.load %arg8[%c0_13, %c0_14] : memref<128x128xbf16, #tpu.memory_space<vmem>>, vector<128x128xbf16>
    %cst_15 = arith.constant dense<0.000000e+00> : vector<32x128xf32>
    %27 = tpu.matmul %25, %26, %cst_15 {dimension_numbers = #tpu.dot_dimension_numbers<[1], [0], [0], [1], [0, 0, 1, 1], [], []>} : vector<32x128xbf16>, vector<128x128xbf16>, vector<32x128xf32> -> vector<32x128xf32>
    %c0_16 = arith.constant 0 : index
    %c0_17 = arith.constant 0 : index
    %28 = vector.load %arg9[%c0_16, %c0_17] : memref<1x128xf32, #tpu.memory_space<vmem>>, vector<1x128xf32>
    %29 = vector.broadcast %28 : vector<1x128xf32> to vector<32x128xf32>
    %30 = arith.addf %27, %29 : vector<32x128xf32>
    %c0_18 = arith.constant 0 : index
    %c0_19 = arith.constant 0 : index
    %31 = vector.load %arg4[%c0_18, %c0_19] : memref<32x128xbf16, #tpu.memory_space<vmem>>, vector<32x128xbf16>
    %32 = arith.extf %31 : vector<32x128xbf16> to vector<32x128xf32>
    %33 = arith.addf %30, %32 : vector<32x128xf32>
    %c0_20 = arith.constant 0 : index
    %c0_21 = arith.constant 0 : index
    %34 = vector.load %arg1[%c0_20, %c0_21] : memref<32x128xbf16, #tpu.memory_space<vmem>>, vector<32x128xbf16>
    %35 = arith.truncf %33 : vector<32x128xf32> to vector<32x128xbf16>
    %36 = tpu.concatenate %34, %35 in 1 : vector<32x128xbf16>, vector<32x128xbf16> -> vector<32x256xbf16>
    %c0_22 = arith.constant 0 : index
    %c0_23 = arith.constant 0 : index
    %37 = vector.load %arg10[%c0_22, %c0_23] : memref<256x256xbf16, #tpu.memory_space<vmem>>, vector<256x256xbf16>
    %cst_24 = arith.constant dense<0.000000e+00> : vector<32x256xf32>
    %38 = tpu.matmul %36, %37, %cst_24 {dimension_numbers = #tpu.dot_dimension_numbers<[1], [0], [0], [1], [0, 0, 1, 1], [], []>} : vector<32x256xbf16>, vector<256x256xbf16>, vector<32x256xf32> -> vector<32x256xf32>
    %c0_25 = arith.constant 0 : index
    %c0_26 = arith.constant 0 : index
    %39 = vector.load %arg11[%c0_25, %c0_26] : memref<1x256xf32, #tpu.memory_space<vmem>>, vector<1x256xf32>
    %40 = vector.broadcast %39 : vector<1x256xf32> to vector<32x256xf32>
    %41 = arith.addf %38, %40 : vector<32x256xf32>
    %cst_27 = arith.constant 0.000000e+00 : f32
    %42 = vector.broadcast %cst_27 : f32 to vector<32x256xf32>
    %43 = arith.maximumf %41, %42 : vector<32x256xf32>
    %44 = arith.truncf %43 : vector<32x256xf32> to vector<32x256xbf16>
    %c0_28 = arith.constant 0 : index
    %c0_29 = arith.constant 0 : index
    %45 = vector.load %arg12[%c0_28, %c0_29] : memref<256x256xbf16, #tpu.memory_space<vmem>>, vector<256x256xbf16>
    %cst_30 = arith.constant dense<0.000000e+00> : vector<32x256xf32>
    %46 = tpu.matmul %44, %45, %cst_30 {dimension_numbers = #tpu.dot_dimension_numbers<[1], [0], [0], [1], [0, 0, 1, 1], [], []>} : vector<32x256xbf16>, vector<256x256xbf16>, vector<32x256xf32> -> vector<32x256xf32>
    %c0_31 = arith.constant 0 : index
    %c0_32 = arith.constant 0 : index
    %47 = vector.load %arg13[%c0_31, %c0_32] : memref<1x256xf32, #tpu.memory_space<vmem>>, vector<1x256xf32>
    %48 = vector.broadcast %47 : vector<1x256xf32> to vector<32x256xf32>
    %49 = arith.addf %46, %48 : vector<32x256xf32>
    %50 = vector.extract_strided_slice %49 {offsets = [0, 0], sizes = [32, 128], strides = [1, 1]} : vector<32x256xf32> to vector<32x128xf32>
    %51 = vector.extract_strided_slice %49 {offsets = [0, 128], sizes = [32, 128], strides = [1, 1]} : vector<32x256xf32> to vector<32x128xf32>
    %52 = arith.truncf %49 : vector<32x256xf32> to vector<32x256xbf16>
    %c0_33 = arith.constant 0 : index
    %c0_34 = arith.constant 0 : index
    %53 = vector.load %arg14[%c0_33, %c0_34] : memref<256x256xbf16, #tpu.memory_space<vmem>>, vector<256x256xbf16>
    %cst_35 = arith.constant dense<0.000000e+00> : vector<32x256xf32>
    %54 = tpu.matmul %52, %53, %cst_35 {dimension_numbers = #tpu.dot_dimension_numbers<[1], [0], [0], [1], [0, 0, 1, 1], [], []>} : vector<32x256xbf16>, vector<256x256xbf16>, vector<32x256xf32> -> vector<32x256xf32>
    %c0_36 = arith.constant 0 : index
    %c0_37 = arith.constant 0 : index
    %55 = vector.load %arg15[%c0_36, %c0_37] : memref<1x256xf32, #tpu.memory_space<vmem>>, vector<1x256xf32>
    %56 = vector.broadcast %55 : vector<1x256xf32> to vector<32x256xf32>
    %57 = arith.addf %54, %56 : vector<32x256xf32>
    %58 = math.tanh %57 : vector<32x256xf32>
    %59 = arith.truncf %58 : vector<32x256xf32> to vector<32x256xbf16>
    %c0_38 = arith.constant 0 : index
    %c0_39 = arith.constant 0 : index
    %60 = vector.load %arg16[%c0_38, %c0_39] : memref<256x1xbf16, #tpu.memory_space<vmem>>, vector<256x1xbf16>
    %cst_40 = arith.constant dense<0.000000e+00> : vector<32x1xf32>
    %61 = tpu.matmul %59, %60, %cst_40 {dimension_numbers = #tpu.dot_dimension_numbers<[1], [0], [0], [1], [0, 0, 1, 1], [], []>} : vector<32x256xbf16>, vector<256x1xbf16>, vector<32x1xf32> -> vector<32x1xf32>
    %cst_41 = arith.constant 0.000000e+00 : f32
    %62 = vector.broadcast %cst_41 : f32 to vector<32x1xf32>
    %63 = arith.subf %62, %61 : vector<32x1xf32>
    %64 = math.exp %63 : vector<32x1xf32>
    %cst_42 = arith.constant 1.000000e+00 : f32
    %65 = vector.broadcast %cst_42 : f32 to vector<32x1xf32>
    %66 = arith.addf %65, %64 : vector<32x1xf32>
    %cst_43 = arith.constant 1.000000e+00 : f32
    %67 = vector.broadcast %cst_43 : f32 to vector<32x1xf32>
    %68 = arith.divf %67, %66 : vector<32x1xf32>
    %69 = vector.broadcast %68 : vector<32x1xf32> to vector<32x128xf32>
    %70 = arith.mulf %69, %50 : vector<32x128xf32>
    %cst_44 = arith.constant 1.000000e+00 : f32
    %71 = vector.broadcast %cst_44 : f32 to vector<32x1xf32>
    %72 = arith.subf %71, %68 : vector<32x1xf32>
    %73 = vector.broadcast %72 : vector<32x1xf32> to vector<32x128xf32>
    %74 = arith.mulf %73, %51 : vector<32x128xf32>
    %75 = arith.addf %70, %74 : vector<32x128xf32>
    %76 = arith.truncf %75 : vector<32x128xf32> to vector<32x128xbf16>
    %c0_45 = arith.constant 0 : index
    %c0_46 = arith.constant 0 : index
    %77 = vector.load %arg17[%c0_45, %c0_46] : memref<128x128xbf16, #tpu.memory_space<vmem>>, vector<128x128xbf16>
    %cst_47 = arith.constant dense<0.000000e+00> : vector<32x128xf32>
    %78 = tpu.matmul %76, %77, %cst_47 {dimension_numbers = #tpu.dot_dimension_numbers<[1], [0], [0], [1], [0, 0, 1, 1], [], []>} : vector<32x128xbf16>, vector<128x128xbf16>, vector<32x128xf32> -> vector<32x128xf32>
    %c0_48 = arith.constant 0 : index
    %c0_49 = arith.constant 0 : index
    %79 = vector.load %arg18[%c0_48, %c0_49] : memref<1x128xf32, #tpu.memory_space<vmem>>, vector<1x128xf32>
    %80 = vector.broadcast %79 : vector<1x128xf32> to vector<32x128xf32>
    %81 = arith.addf %78, %80 : vector<32x128xf32>
    %cst_50 = arith.constant 0.000000e+00 : f32
    %82 = vector.broadcast %cst_50 : f32 to vector<32x128xf32>
    %83 = arith.maximumf %81, %82 : vector<32x128xf32>
    %84 = arith.truncf %83 : vector<32x128xf32> to vector<32x128xbf16>
    %c0_51 = arith.constant 0 : index
    %c0_52 = arith.constant 0 : index
    %85 = vector.load %arg19[%c0_51, %c0_52] : memref<128x128xbf16, #tpu.memory_space<vmem>>, vector<128x128xbf16>
    %cst_53 = arith.constant dense<0.000000e+00> : vector<32x128xf32>
    %86 = tpu.matmul %84, %85, %cst_53 {dimension_numbers = #tpu.dot_dimension_numbers<[1], [0], [0], [1], [0, 0, 1, 1], [], []>} : vector<32x128xbf16>, vector<128x128xbf16>, vector<32x128xf32> -> vector<32x128xf32>
    %c0_54 = arith.constant 0 : index
    %c0_55 = arith.constant 0 : index
    %87 = vector.load %arg20[%c0_54, %c0_55] : memref<1x128xf32, #tpu.memory_space<vmem>>, vector<1x128xf32>
    %88 = vector.broadcast %87 : vector<1x128xf32> to vector<32x128xf32>
    %89 = arith.addf %86, %88 : vector<32x128xf32>
    %cst_56 = arith.constant 0.000000e+00 : f32
    %90 = vector.broadcast %cst_56 : f32 to vector<32x128xf32>
    %91 = arith.maximumf %89, %90 : vector<32x128xf32>
    %92 = arith.truncf %91 : vector<32x128xf32> to vector<32x128xbf16>
    %c0_57 = arith.constant 0 : index
    %c0_58 = arith.constant 0 : index
    %93 = vector.load %arg21[%c0_57, %c0_58] : memref<128x128xbf16, #tpu.memory_space<vmem>>, vector<128x128xbf16>
    %cst_59 = arith.constant dense<0.000000e+00> : vector<32x128xf32>
    %94 = tpu.matmul %92, %93, %cst_59 {dimension_numbers = #tpu.dot_dimension_numbers<[1], [0], [0], [1], [0, 0, 1, 1], [], []>} : vector<32x128xbf16>, vector<128x128xbf16>, vector<32x128xf32> -> vector<32x128xf32>
    %c0_60 = arith.constant 0 : index
    %c0_61 = arith.constant 0 : index
    %95 = vector.load %arg22[%c0_60, %c0_61] : memref<1x128xf32, #tpu.memory_space<vmem>>, vector<1x128xf32>
    %96 = vector.broadcast %95 : vector<1x128xf32> to vector<32x128xf32>
    %97 = arith.addf %94, %96 : vector<32x128xf32>
    %98 = arith.truncf %97 : vector<32x128xf32> to vector<32x128xbf16>
    %c0_62 = arith.constant 0 : index
    %c0_63 = arith.constant 0 : index
    %99 = vector.load %arg23[%c0_62, %c0_63] : memref<32x128xbf16, #tpu.memory_space<vmem>>, vector<32x128xbf16>
    tpu.vector_store %arg23[%c0_62, %c0_63], %98 {strides = array<i32>} : memref<32x128xbf16, #tpu.memory_space<vmem>>, vector<32x128xbf16>,
    return
  }
  func.func @transform_0(%arg0: i32) -> (i32, i32) {
    %c0_i32 = arith.constant 0 : i32
    %c0_i32_0 = arith.constant 0 : i32
    return %arg0, %c0_i32 : i32, i32
  }
  func.func @transform_1(%arg0: i32) -> (i32, i32) {
    %c0_i32 = arith.constant 0 : i32
    %c0_i32_0 = arith.constant 0 : i32
    return %arg0, %c0_i32 : i32, i32
  }
  func.func @transform_2(%arg0: i32) -> (i32, i32) {
    %c0_i32 = arith.constant 0 : i32
    %c0_i32_0 = arith.constant 0 : i32
    return %arg0, %c0_i32 : i32, i32
  }
  func.func @transform_3(%arg0: i32) -> (i32, i32) {
    %c0_i32 = arith.constant 0 : i32
    %c0_i32_0 = arith.constant 0 : i32
    return %arg0, %c0_i32 : i32, i32
  }
  func.func @transform_4(%arg0: i32) -> (i32, i32) {
    %c0_i32 = arith.constant 0 : i32
    %c0_i32_0 = arith.constant 0 : i32
    %c0_i32_1 = arith.constant 0 : i32
    return %c0_i32, %c0_i32_0 : i32, i32
  }
  func.func @transform_5(%arg0: i32) -> (i32, i32) {
    %c0_i32 = arith.constant 0 : i32
    %c0_i32_0 = arith.constant 0 : i32
    %c0_i32_1 = arith.constant 0 : i32
    return %c0_i32, %c0_i32_0 : i32, i32
  }
  func.func @transform_6(%arg0: i32) -> (i32, i32) {
    %c0_i32 = arith.constant 0 : i32
    %c0_i32_0 = arith.constant 0 : i32
    %c0_i32_1 = arith.constant 0 : i32
    return %c0_i32, %c0_i32_0 : i32, i32
  }
  func.func @transform_7(%arg0: i32) -> (i32, i32) {
    %c0_i32 = arith.constant 0 : i32
    %c0_i32_0 = arith.constant 0 : i32
    %c0_i32_1 = arith.constant 0 : i32
    return %c0_i32, %c0_i32_0 : i32, i32
  }
  func.func @transform_8(%arg0: i32) -> (i32, i32) {
    %c0_i32 = arith.constant 0 : i32
    %c0_i32_0 = arith.constant 0 : i32
    %c0_i32_1 = arith.constant 0 : i32
    return %c0_i32, %c0_i32_0 : i32, i32
  }
  func.func @transform_9(%arg0: i32) -> (i32, i32) {
    %c0_i32 = arith.constant 0 : i32
    %c0_i32_0 = arith.constant 0 : i32
    %c0_i32_1 = arith.constant 0 : i32
    return %c0_i32, %c0_i32_0 : i32, i32
  }
  func.func @transform_10(%arg0: i32) -> (i32, i32) {
    %c0_i32 = arith.constant 0 : i32
    %c0_i32_0 = arith.constant 0 : i32
    %c0_i32_1 = arith.constant 0 : i32
    return %c0_i32, %c0_i32_0 : i32, i32
  }
  func.func @transform_11(%arg0: i32) -> (i32, i32) {
    %c0_i32 = arith.constant 0 : i32
    %c0_i32_0 = arith.constant 0 : i32
    %c0_i32_1 = arith.constant 0 : i32
    return %c0_i32, %c0_i32_0 : i32, i32
  }
  func.func @transform_12(%arg0: i32) -> (i32, i32) {
    %c0_i32 = arith.constant 0 : i32
    %c0_i32_0 = arith.constant 0 : i32
    %c0_i32_1 = arith.constant 0 : i32
    return %c0_i32, %c0_i32_0 : i32, i32
  }
  func.func @transform_13(%arg0: i32) -> (i32, i32) {
    %c0_i32 = arith.constant 0 : i32
    %c0_i32_0 = arith.constant 0 : i32
    %c0_i32_1 = arith.constant 0 : i32
    return %c0_i32, %c0_i32_0 : i32, i32
  }
  func.func @transform_14(%arg0: i32) -> (i32, i32) {
    %c0_i32 = arith.constant 0 : i32
    %c0_i32_0 = arith.constant 0 : i32
    %c0_i32_1 = arith.constant 0 : i32
    return %c0_i32, %c0_i32_0 : i32, i32
  }
  func.func @transform_15(%arg0: i32) -> (i32, i32) {
    %c0_i32 = arith.constant 0 : i32
    %c0_i32_0 = arith.constant 0 : i32
    %c0_i32_1 = arith.constant 0 : i32
    return %c0_i32, %c0_i32_0 : i32, i32
  }
  func.func @transform_16(%arg0: i32) -> (i32, i32) {
    %c0_i32 = arith.constant 0 : i32
    %c0_i32_0 = arith.constant 0 : i32
    %c0_i32_1 = arith.constant 0 : i32
    return %c0_i32, %c0_i32_0 : i32, i32
  }
  func.func @transform_17(%arg0: i32) -> (i32, i32) {
    %c0_i32 = arith.constant 0 : i32
    %c0_i32_0 = arith.constant 0 : i32
    %c0_i32_1 = arith.constant 0 : i32
    return %c0_i32, %c0_i32_0 : i32, i32
  }
  func.func @transform_18(%arg0: i32) -> (i32, i32) {
    %c0_i32 = arith.constant 0 : i32
    %c0_i32_0 = arith.constant 0 : i32
    %c0_i32_1 = arith.constant 0 : i32
    return %c0_i32, %c0_i32_0 : i32, i32
  }
  func.func @transform_19(%arg0: i32) -> (i32, i32) {
    %c0_i32 = arith.constant 0 : i32
    %c0_i32_0 = arith.constant 0 : i32
    %c0_i32_1 = arith.constant 0 : i32
    return %c0_i32, %c0_i32_0 : i32, i32
  }
  func.func @transform_20(%arg0: i32) -> (i32, i32) {
    %c0_i32 = arith.constant 0 : i32
    %c0_i32_0 = arith.constant 0 : i32
    %c0_i32_1 = arith.constant 0 : i32
    return %c0_i32, %c0_i32_0 : i32, i32
  }
  func.func @transform_21(%arg0: i32) -> (i32, i32) {
    %c0_i32 = arith.constant 0 : i32
    %c0_i32_0 = arith.constant 0 : i32
    %c0_i32_1 = arith.constant 0 : i32
    return %c0_i32, %c0_i32_0 : i32, i32
  }
  func.func @transform_22(%arg0: i32) -> (i32, i32) {
    %c0_i32 = arith.constant 0 : i32
    %c0_i32_0 = arith.constant 0 : i32
    return %arg0, %c0_i32 : i32, i32
  }
}

module attributes {stable_mosaic.version = 11 : i64} {
  func.func @m3pa_kernel(%arg0: i32, %arg1: memref<32x128xbf16, #tpu.memory_space<vmem>>, %arg2: memref<32x8xf32, #tpu.memory_space<vmem>>, %arg3: memref<32x128xbf16, #tpu.memory_space<vmem>>, %arg4: memref<32x128xbf16, #tpu.memory_space<vmem>>, %arg5: memref<8x8xbf16, #tpu.memory_space<vmem>>, %arg6: memref<1x8xf32, #tpu.memory_space<vmem>>, %arg7: memref<8x128xbf16, #tpu.memory_space<vmem>>, %arg8: memref<128x128xbf16, #tpu.memory_space<vmem>>, %arg9: memref<1x128xf32, #tpu.memory_space<vmem>>, %arg10: memref<256x256xbf16, #tpu.memory_space<vmem>>, %arg11: memref<1x256xf32, #tpu.memory_space<vmem>>, %arg12: memref<256x256xbf16, #tpu.memory_space<vmem>>, %arg13: memref<1x256xf32, #tpu.memory_space<vmem>>, %arg14: memref<256x256xbf16, #tpu.memory_space<vmem>>, %arg15: memref<1x256xf32, #tpu.memory_space<vmem>>, %arg16: memref<256x1xbf16, #tpu.memory_space<vmem>>, %arg17: memref<128x128xbf16, #tpu.memory_space<vmem>>, %arg18: memref<1x128xf32, #tpu.memory_space<vmem>>, %arg19: memref<128x128xbf16, #tpu.memory_space<vmem>>, %arg20: memref<1x128xf32, #tpu.memory_space<vmem>>, %arg21: memref<128x128xbf16, #tpu.memory_space<vmem>>, %arg22: memref<1x128xf32, #tpu.memory_space<vmem>>, %arg23: memref<32x128xbf16, #tpu.memory_space<vmem>>) attributes {dimension_semantics = [#tpu.dimension_semantics<parallel>], iteration_bounds = array<i64: 2>, scalar_prefetch = 0 : i64, scratch_operands = 0 : i64, tpu.core_type = #tpu.core_type<tc>, window_params = [{transform_indices = @transform_0, window_bounds = array<i64: 32, 128>}, {transform_indices = @transform_1, window_bounds = array<i64: 32, 8>}, {transform_indices = @transform_2, window_bounds = array<i64: 32, 128>}, {transform_indices = @transform_3, window_bounds = array<i64: 32, 128>}, {pipeline_mode = #tpu.pipeline_mode<synchronous>, transform_indices = @transform_4, window_bounds = array<i64: 8, 8>}, {pipeline_mode = #tpu.pipeline_mode<synchronous>, transform_indices = @transform_5, window_bounds = array<i64: 1, 8>}, {pipeline_mode = #tpu.pipeline_mode<synchronous>, transform_indices = @transform_6, window_bounds = array<i64: 8, 128>}, {pipeline_mode = #tpu.pipeline_mode<synchronous>, transform_indices = @transform_7, window_bounds = array<i64: 128, 128>}, {pipeline_mode = #tpu.pipeline_mode<synchronous>, transform_indices = @transform_8, window_bounds = array<i64: 1, 128>}, {pipeline_mode = #tpu.pipeline_mode<synchronous>, transform_indices = @transform_9, window_bounds = array<i64: 256, 256>}, {pipeline_mode = #tpu.pipeline_mode<synchronous>, transform_indices = @transform_10, window_bounds = array<i64: 1, 256>}, {pipeline_mode = #tpu.pipeline_mode<synchronous>, transform_indices = @transform_11, window_bounds = array<i64: 256, 256>}, {pipeline_mode = #tpu.pipeline_mode<synchronous>, transform_indices = @transform_12, window_bounds = array<i64: 1, 256>}, {pipeline_mode = #tpu.pipeline_mode<synchronous>, transform_indices = @transform_13, window_bounds = array<i64: 256, 256>}, {pipeline_mode = #tpu.pipeline_mode<synchronous>, transform_indices = @transform_14, window_bounds = array<i64: 1, 256>}, {pipeline_mode = #tpu.pipeline_mode<synchronous>, transform_indices = @transform_15, window_bounds = array<i64: 256, 1>}, {pipeline_mode = #tpu.pipeline_mode<synchronous>, transform_indices = @transform_16, window_bounds = array<i64: 128, 128>}, {pipeline_mode = #tpu.pipeline_mode<synchronous>, transform_indices = @transform_17, window_bounds = array<i64: 1, 128>}, {pipeline_mode = #tpu.pipeline_mode<synchronous>, transform_indices = @transform_18, window_bounds = array<i64: 128, 128>}, {pipeline_mode = #tpu.pipeline_mode<synchronous>, transform_indices = @transform_19, window_bounds = array<i64: 1, 128>}, {pipeline_mode = #tpu.pipeline_mode<synchronous>, transform_indices = @transform_20, window_bounds = array<i64: 128, 128>}, {pipeline_mode = #tpu.pipeline_mode<synchronous>, transform_indices = @transform_21, window_bounds = array<i64: 1, 128>}, {transform_indices = @transform_22, window_bounds = array<i64: 32, 128>}]} {
    %c0 = arith.constant 0 : index
    %c0_0 = arith.constant 0 : index
    %0 = vector.load %arg2[%c0, %c0_0] : memref<32x8xf32, #tpu.memory_space<vmem>>, vector<32x8xf32>
    %cst = arith.constant -5.000000e+01 : f32
    %1 = vector.broadcast %cst : f32 to vector<32x8xf32>
    %2 = arith.mulf %0, %1 : vector<32x8xf32>
    %3 = math.exp %2 : vector<32x8xf32>
    %4 = arith.truncf %3 : vector<32x8xf32> to vector<32x8xbf16>
    %c0_1 = arith.constant 0 : index
    %c0_2 = arith.constant 0 : index
    %5 = vector.load %arg5[%c0_1, %c0_2] : memref<8x8xbf16, #tpu.memory_space<vmem>>, vector<8x8xbf16>
    %cst_3 = arith.constant dense<0.000000e+00> : vector<32x8xf32>
    %6 = tpu.matmul %4, %5, %cst_3 {dimension_numbers = #tpu.dot_dimension_numbers<[1], [0], [0], [1], [0, 0, 1, 1], [], []>} : vector<32x8xbf16>, vector<8x8xbf16>, vector<32x8xf32> -> vector<32x8xf32>
    %c0_4 = arith.constant 0 : index
    %c0_5 = arith.constant 0 : index
    %7 = vector.load %arg6[%c0_4, %c0_5] : memref<1x8xf32, #tpu.memory_space<vmem>>, vector<1x8xf32>
    %8 = vector.broadcast %7 : vector<1x8xf32> to vector<32x8xf32>
    %9 = arith.addf %6, %8 : vector<32x8xf32>
    %cst_6 = arith.constant dense<0xFF800000> : vector<32xf32>
    %10 = vector.multi_reduction <maximumf>, %9, %cst_6 [1] : vector<32x8xf32> to vector<32xf32>
    %11 = vector.shape_cast %10 : vector<32xf32> to vector<32x1xf32>
    %12 = vector.broadcast %11 : vector<32x1xf32> to vector<32x8xf32>
    %13 = arith.subf %9, %12 : vector<32x8xf32>
    %14 = math.exp %13 : vector<32x8xf32>
    %cst_7 = arith.constant dense<0.000000e+00> : vector<32xf32>
    %15 = vector.multi_reduction <add>, %14, %cst_7 [1] : vector<32x8xf32> to vector<32xf32>
    %16 = vector.shape_cast %15 : vector<32xf32> to vector<32x1xf32>
    %17 = vector.broadcast %16 : vector<32x1xf32> to vector<32x8xf32>
    %18 = arith.divf %14, %17 : vector<32x8xf32>
    %19 = arith.truncf %18 : vector<32x8xf32> to vector<32x8xbf16>
    %c0_8 = arith.constant 0 : index
    %c0_9 = arith.constant 0 : index
    %20 = vector.load %arg7[%c0_8, %c0_9] : memref<8x128xbf16, #tpu.memory_space<vmem>>, vector<8x128xbf16>
    %cst_10 = arith.constant dense<0.000000e+00> : vector<32x128xf32>
    %21 = tpu.matmul %19, %20, %cst_10 {dimension_numbers = #tpu.dot_dimension_numbers<[1], [0], [0], [1], [0, 0, 1, 1], [], []>} : vector<32x8xbf16>, vector<8x128xbf16>, vector<32x128xf32> -> vector<32x128xf32>
    %c0_11 = arith.constant 0 : index
    %c0_12 = arith.constant 0 : index
    %22 = vector.load %arg3[%c0_11, %c0_12] : memref<32x128xbf16, #tpu.memory_space<vmem>>, vector<32x128xbf16>
    %23 = arith.extf %22 : vector<32x128xbf16> to vector<32x128xf32>
    %24 = arith.mulf %21, %23 : vector<32x128xf32>
    %25 = arith.truncf %24 : vector<32x128xf32> to vector<32x128xbf16>
    %c0_13 = arith.constant 0 : index
    %c0_14 = arith.constant 0 : index
    %26 = vector.load %arg8[%c0_13, %c0_14] : memref<128x128xbf16, #tpu.memory_space<vmem>>, vector<128x128xbf16>
    %cst_15 = arith.constant dense<0.000000e+00> : vector<32x128xf32>
    %27 = tpu.matmul %25, %26, %cst_15 {dimension_numbers = #tpu.dot_dimension_numbers<[1], [0], [0], [1], [0, 0, 1, 1], [], []>} : vector<32x128xbf16>, vector<128x128xbf16>, vector<32x128xf32> -> vector<32x128xf32>
    %c0_16 = arith.constant 0 : index
    %c0_17 = arith.constant 0 : index
    %28 = vector.load %arg9[%c0_16, %c0_17] : memref<1x128xf32, #tpu.memory_space<vmem>>, vector<1x128xf32>
    %29 = vector.broadcast %28 : vector<1x128xf32> to vector<32x128xf32>
    %30 = arith.addf %27, %29 : vector<32x128xf32>
    %c0_18 = arith.constant 0 : index
    %c0_19 = arith.constant 0 : index
    %31 = vector.load %arg4[%c0_18, %c0_19] : memref<32x128xbf16, #tpu.memory_space<vmem>>, vector<32x128xbf16>
    %32 = arith.extf %31 : vector<32x128xbf16> to vector<32x128xf32>
    %33 = arith.addf %30, %32 : vector<32x128xf32>
    %c0_20 = arith.constant 0 : index
    %c0_21 = arith.constant 0 : index
    %34 = vector.load %arg1[%c0_20, %c0_21] : memref<32x128xbf16, #tpu.memory_space<vmem>>, vector<32x128xbf16>
    %35 = arith.truncf %33 : vector<32x128xf32> to vector<32x128xbf16>
    %36 = tpu.concatenate %34, %35 in 1 : vector<32x128xbf16>, vector<32x128xbf16> -> vector<32x256xbf16>
    %c0_22 = arith.constant 0 : index
    %c0_23 = arith.constant 0 : index
    %37 = vector.load %arg10[%c0_22, %c0_23] : memref<256x256xbf16, #tpu.memory_space<vmem>>, vector<256x256xbf16>
    %cst_24 = arith.constant dense<0.000000e+00> : vector<32x256xf32>
    %38 = tpu.matmul %36, %37, %cst_24 {dimension_numbers = #tpu.dot_dimension_numbers<[1], [0], [0], [1], [0, 0, 1, 1], [], []>} : vector<32x256xbf16>, vector<256x256xbf16>, vector<32x256xf32> -> vector<32x256xf32>
    %c0_25 = arith.constant 0 : index
    %c0_26 = arith.constant 0 : index
    %39 = vector.load %arg11[%c0_25, %c0_26] : memref<1x256xf32, #tpu.memory_space<vmem>>, vector<1x256xf32>
    %40 = vector.broadcast %39 : vector<1x256xf32> to vector<32x256xf32>
    %41 = arith.addf %38, %40 : vector<32x256xf32>
    %cst_27 = arith.constant 0.000000e+00 : f32
    %42 = vector.broadcast %cst_27 : f32 to vector<32x256xf32>
    %43 = arith.maximumf %41, %42 : vector<32x256xf32>
    %44 = arith.truncf %43 : vector<32x256xf32> to vector<32x256xbf16>
    %c0_28 = arith.constant 0 : index
    %c0_29 = arith.constant 0 : index
    %45 = vector.load %arg12[%c0_28, %c0_29] : memref<256x256xbf16, #tpu.memory_space<vmem>>, vector<256x256xbf16>
    %cst_30 = arith.constant dense<0.000000e+00> : vector<32x256xf32>
    %46 = tpu.matmul %44, %45, %cst_30 {dimension_numbers = #tpu.dot_dimension_numbers<[1], [0], [0], [1], [0, 0, 1, 1], [], []>} : vector<32x256xbf16>, vector<256x256xbf16>, vector<32x256xf32> -> vector<32x256xf32>
    %c0_31 = arith.constant 0 : index
    %c0_32 = arith.constant 0 : index
    %47 = vector.load %arg13[%c0_31, %c0_32] : memref<1x256xf32, #tpu.memory_space<vmem>>, vector<1x256xf32>
    %48 = vector.broadcast %47 : vector<1x256xf32> to vector<32x256xf32>
    %49 = arith.addf %46, %48 : vector<32x256xf32>
    %50 = vector.extract_strided_slice %49 {offsets = [0, 0], sizes = [32, 128], strides = [1, 1]} : vector<32x256xf32> to vector<32x128xf32>
    %51 = vector.extract_strided_slice %49 {offsets = [0, 128], sizes = [32, 128], strides = [1, 1]} : vector<32x256xf32> to vector<32x128xf32>
    %52 = arith.truncf %49 : vector<32x256xf32> to vector<32x256xbf16>
    %c0_33 = arith.constant 0 : index
    %c0_34 = arith.constant 0 : index
    %53 = vector.load %arg14[%c0_33, %c0_34] : memref<256x256xbf16, #tpu.memory_space<vmem>>, vector<256x256xbf16>
    %cst_35 = arith.constant dense<0.000000e+00> : vector<32x256xf32>
    %54 = tpu.matmul %52, %53, %cst_35 {dimension_numbers = #tpu.dot_dimension_numbers<[1], [0], [0], [1], [0, 0, 1, 1], [], []>} : vector<32x256xbf16>, vector<256x256xbf16>, vector<32x256xf32> -> vector<32x256xf32>
    %c0_36 = arith.constant 0 : index
    %c0_37 = arith.constant 0 : index
    %55 = vector.load %arg15[%c0_36, %c0_37] : memref<1x256xf32, #tpu.memory_space<vmem>>, vector<1x256xf32>
    %56 = vector.broadcast %55 : vector<1x256xf32> to vector<32x256xf32>
    %57 = arith.addf %54, %56 : vector<32x256xf32>
    %58 = math.tanh %57 : vector<32x256xf32>
    %59 = arith.truncf %58 : vector<32x256xf32> to vector<32x256xbf16>
    %c0_38 = arith.constant 0 : index
    %c0_39 = arith.constant 0 : index
    %60 = vector.load %arg16[%c0_38, %c0_39] : memref<256x1xbf16, #tpu.memory_space<vmem>>, vector<256x1xbf16>
    %cst_40 = arith.constant dense<0.000000e+00> : vector<32x1xf32>
    %61 = tpu.matmul %59, %60, %cst_40 {dimension_numbers = #tpu.dot_dimension_numbers<[1], [0], [0], [1], [0, 0, 1, 1], [], []>} : vector<32x256xbf16>, vector<256x1xbf16>, vector<32x1xf32> -> vector<32x1xf32>
    %cst_41 = arith.constant 0.000000e+00 : f32
    %62 = vector.broadcast %cst_41 : f32 to vector<32x1xf32>
    %63 = arith.subf %62, %61 : vector<32x1xf32>
    %64 = math.exp %63 : vector<32x1xf32>
    %cst_42 = arith.constant 1.000000e+00 : f32
    %65 = vector.broadcast %cst_42 : f32 to vector<32x1xf32>
    %66 = arith.addf %65, %64 : vector<32x1xf32>
    %cst_43 = arith.constant 1.000000e+00 : f32
    %67 = vector.broadcast %cst_43 : f32 to vector<32x1xf32>
    %68 = arith.divf %67, %66 : vector<32x1xf32>
    %69 = vector.broadcast %68 : vector<32x1xf32> to vector<32x128xf32>
    %70 = arith.mulf %69, %50 : vector<32x128xf32>
    %cst_44 = arith.constant 1.000000e+00 : f32
    %71 = vector.broadcast %cst_44 : f32 to vector<32x1xf32>
    %72 = arith.subf %71, %68 : vector<32x1xf32>
    %73 = vector.broadcast %72 : vector<32x1xf32> to vector<32x128xf32>
    %74 = arith.mulf %73, %51 : vector<32x128xf32>
    %75 = arith.addf %70, %74 : vector<32x128xf32>
    %76 = arith.truncf %75 : vector<32x128xf32> to vector<32x128xbf16>
    %c0_45 = arith.constant 0 : index
    %c0_46 = arith.constant 0 : index
    %77 = vector.load %arg17[%c0_45, %c0_46] : memref<128x128xbf16, #tpu.memory_space<vmem>>, vector<128x128xbf16>
    %cst_47 = arith.constant dense<0.000000e+00> : vector<32x128xf32>
    %78 = tpu.matmul %76, %77, %cst_47 {dimension_numbers = #tpu.dot_dimension_numbers<[1], [0], [0], [1], [0, 0, 1, 1], [], []>} : vector<32x128xbf16>, vector<128x128xbf16>, vector<32x128xf32> -> vector<32x128xf32>
    %c0_48 = arith.constant 0 : index
    %c0_49 = arith.constant 0 : index
    %79 = vector.load %arg18[%c0_48, %c0_49] : memref<1x128xf32, #tpu.memory_space<vmem>>, vector<1x128xf32>
    %80 = vector.broadcast %79 : vector<1x128xf32> to vector<32x128xf32>
    %81 = arith.addf %78, %80 : vector<32x128xf32>
    %cst_50 = arith.constant 0.000000e+00 : f32
    %82 = vector.broadcast %cst_50 : f32 to vector<32x128xf32>
    %83 = arith.maximumf %81, %82 : vector<32x128xf32>
    %84 = arith.truncf %83 : vector<32x128xf32> to vector<32x128xbf16>
    %c0_51 = arith.constant 0 : index
    %c0_52 = arith.constant 0 : index
    %85 = vector.load %arg19[%c0_51, %c0_52] : memref<128x128xbf16, #tpu.memory_space<vmem>>, vector<128x128xbf16>
    %cst_53 = arith.constant dense<0.000000e+00> : vector<32x128xf32>
    %86 = tpu.matmul %84, %85, %cst_53 {dimension_numbers = #tpu.dot_dimension_numbers<[1], [0], [0], [1], [0, 0, 1, 1], [], []>} : vector<32x128xbf16>, vector<128x128xbf16>, vector<32x128xf32> -> vector<32x128xf32>
    %c0_54 = arith.constant 0 : index
    %c0_55 = arith.constant 0 : index
    %87 = vector.load %arg20[%c0_54, %c0_55] : memref<1x128xf32, #tpu.memory_space<vmem>>, vector<1x128xf32>
    %88 = vector.broadcast %87 : vector<1x128xf32> to vector<32x128xf32>
    %89 = arith.addf %86, %88 : vector<32x128xf32>
    %cst_56 = arith.constant 0.000000e+00 : f32
    %90 = vector.broadcast %cst_56 : f32 to vector<32x128xf32>
    %91 = arith.maximumf %89, %90 : vector<32x128xf32>
    %92 = arith.truncf %91 : vector<32x128xf32> to vector<32x128xbf16>
    %c0_57 = arith.constant 0 : index
    %c0_58 = arith.constant 0 : index
    %93 = vector.load %arg21[%c0_57, %c0_58] : memref<128x128xbf16, #tpu.memory_space<vmem>>, vector<128x128xbf16>
    %cst_59 = arith.constant dense<0.000000e+00> : vector<32x128xf32>
    %94 = tpu.matmul %92, %93, %cst_59 {dimension_numbers = #tpu.dot_dimension_numbers<[1], [0], [0], [1], [0, 0, 1, 1], [], []>} : vector<32x128xbf16>, vector<128x128xbf16>, vector<32x128xf32> -> vector<32x128xf32>
    %c0_60 = arith.constant 0 : index
    %c0_61 = arith.constant 0 : index
    %95 = vector.load %arg22[%c0_60, %c0_61] : memref<1x128xf32, #tpu.memory_space<vmem>>, vector<1x128xf32>
    %96 = vector.broadcast %95 : vector<1x128xf32> to vector<32x128xf32>
    %97 = arith.addf %94, %96 : vector<32x128xf32>
    %98 = arith.truncf %97 : vector<32x128xf32> to vector<32x128xbf16>
    %c0_62 = arith.constant 0 : index
    %c0_63 = arith.constant 0 : index
    %99 = vector.load %arg23[%c0_62, %c0_63] : memref<32x128xbf16, #tpu.memory_space<vmem>>, vector<32x128xbf16>
    tpu.vector_store %arg23[%c0_62, %c0_63], %98 {strides = array<i32>} : memref<32x128xbf16, #tpu.memory_space<vmem>>, vector<32x128xbf16>,
    return
  }
  func.func @transform_0(%arg0: i32) -> (i32, i32) {
    %c0_i32 = arith.constant 0 : i32
    %c0_i32_0 = arith.constant 0 : i32
    return %arg0, %c0_i32 : i32, i32
  }
  func.func @transform_1(%arg0: i32) -> (i32, i32) {
    %c0_i32 = arith.constant 0 : i32
    %c0_i32_0 = arith.constant 0 : i32
    return %arg0, %c0_i32 : i32, i32
  }
  func.func @transform_2(%arg0: i32) -> (i32, i32) {
    %c0_i32 = arith.constant 0 : i32
    %c0_i32_0 = arith.constant 0 : i32
    return %arg0, %c0_i32 : i32, i32
  }
  func.func @transform_3(%arg0: i32) -> (i32, i32) {
    %c0_i32 = arith.constant 0 : i32
    %c0_i32_0 = arith.constant 0 : i32
    return %arg0, %c0_i32 : i32, i32
  }
  func.func @transform_4(%arg0: i32) -> (i32, i32) {
    %c0_i32 = arith.constant 0 : i32
    %c0_i32_0 = arith.constant 0 : i32
    %c0_i32_1 = arith.constant 0 : i32
    return %c0_i32, %c0_i32_0 : i32, i32
  }
  func.func @transform_5(%arg0: i32) -> (i32, i32) {
    %c0_i32 = arith.constant 0 : i32
    %c0_i32_0 = arith.constant 0 : i32
    %c0_i32_1 = arith.constant 0 : i32
    return %c0_i32, %c0_i32_0 : i32, i32
  }
  func.func @transform_6(%arg0: i32) -> (i32, i32) {
    %c0_i32 = arith.constant 0 : i32
    %c0_i32_0 = arith.constant 0 : i32
    %c0_i32_1 = arith.constant 0 : i32
    return %c0_i32, %c0_i32_0 : i32, i32
  }
  func.func @transform_7(%arg0: i32) -> (i32, i32) {
    %c0_i32 = arith.constant 0 : i32
    %c0_i32_0 = arith.constant 0 : i32
    %c0_i32_1 = arith.constant 0 : i32
    return %c0_i32, %c0_i32_0 : i32, i32
  }
  func.func @transform_8(%arg0: i32) -> (i32, i32) {
    %c0_i32 = arith.constant 0 : i32
    %c0_i32_0 = arith.constant 0 : i32
    %c0_i32_1 = arith.constant 0 : i32
    return %c0_i32, %c0_i32_0 : i32, i32
  }
  func.func @transform_9(%arg0: i32) -> (i32, i32) {
    %c0_i32 = arith.constant 0 : i32
    %c0_i32_0 = arith.constant 0 : i32
    %c0_i32_1 = arith.constant 0 : i32
    return %c0_i32, %c0_i32_0 : i32, i32
  }
  func.func @transform_10(%arg0: i32) -> (i32, i32) {
    %c0_i32 = arith.constant 0 : i32
    %c0_i32_0 = arith.constant 0 : i32
    %c0_i32_1 = arith.constant 0 : i32
    return %c0_i32, %c0_i32_0 : i32, i32
  }
  func.func @transform_11(%arg0: i32) -> (i32, i32) {
    %c0_i32 = arith.constant 0 : i32
    %c0_i32_0 = arith.constant 0 : i32
    %c0_i32_1 = arith.constant 0 : i32
    return %c0_i32, %c0_i32_0 : i32, i32
  }
  func.func @transform_12(%arg0: i32) -> (i32, i32) {
    %c0_i32 = arith.constant 0 : i32
    %c0_i32_0 = arith.constant 0 : i32
    %c0_i32_1 = arith.constant 0 : i32
    return %c0_i32, %c0_i32_0 : i32, i32
  }
  func.func @transform_13(%arg0: i32) -> (i32, i32) {
    %c0_i32 = arith.constant 0 : i32
    %c0_i32_0 = arith.constant 0 : i32
    %c0_i32_1 = arith.constant 0 : i32
    return %c0_i32, %c0_i32_0 : i32, i32
  }
  func.func @transform_14(%arg0: i32) -> (i32, i32) {
    %c0_i32 = arith.constant 0 : i32
    %c0_i32_0 = arith.constant 0 : i32
    %c0_i32_1 = arith.constant 0 : i32
    return %c0_i32, %c0_i32_0 : i32, i32
  }
  func.func @transform_15(%arg0: i32) -> (i32, i32) {
    %c0_i32 = arith.constant 0 : i32
    %c0_i32_0 = arith.constant 0 : i32
    %c0_i32_1 = arith.constant 0 : i32
    return %c0_i32, %c0_i32_0 : i32, i32
  }
  func.func @transform_16(%arg0: i32) -> (i32, i32) {
    %c0_i32 = arith.constant 0 : i32
    %c0_i32_0 = arith.constant 0 : i32
    %c0_i32_1 = arith.constant 0 : i32
    return %c0_i32, %c0_i32_0 : i32, i32
  }
  func.func @transform_17(%arg0: i32) -> (i32, i32) {
    %c0_i32 = arith.constant 0 : i32
    %c0_i32_0 = arith.constant 0 : i32
    %c0_i32_1 = arith.constant 0 : i32
    return %c0_i32, %c0_i32_0 : i32, i32
  }
  func.func @transform_18(%arg0: i32) -> (i32, i32) {
    %c0_i32 = arith.constant 0 : i32
    %c0_i32_0 = arith.constant 0 : i32
    %c0_i32_1 = arith.constant 0 : i32
    return %c0_i32, %c0_i32_0 : i32, i32
  }
  func.func @transform_19(%arg0: i32) -> (i32, i32) {
    %c0_i32 = arith.constant 0 : i32
    %c0_i32_0 = arith.constant 0 : i32
    %c0_i32_1 = arith.constant 0 : i32
    return %c0_i32, %c0_i32_0 : i32, i32
  }
  func.func @transform_20(%arg0: i32) -> (i32, i32) {
    %c0_i32 = arith.constant 0 : i32
    %c0_i32_0 = arith.constant 0 : i32
    %c0_i32_1 = arith.constant 0 : i32
    return %c0_i32, %c0_i32_0 : i32, i32
  }
  func.func @transform_21(%arg0: i32) -> (i32, i32) {
    %c0_i32 = arith.constant 0 : i32
    %c0_i32_0 = arith.constant 0 : i32
    %c0_i32_1 = arith.constant 0 : i32
    return %c0_i32, %c0_i32_0 : i32, i32
  }
  func.func @transform_22(%arg0: i32) -> (i32, i32) {
    %c0_i32 = arith.constant 0 : i32
    %c0_i32_0 = arith.constant 0 : i32
    return %arg0, %c0_i32 : i32, i32
  }
}

</mosaic_0001>

<bundles_post_ra>
// kernel: m3pa_forward.1
= control target key start
LH: loop header
LB: loop body
LE: loop exit
PB: predicated region body
PF: predicated region fallthrough
CT: control target
= control target key end

     0   :  { %s4820_s0 = inlined_call_operand.vmem [shape: bf16[64,128], index: 0, kind: input, shape index: {}]   ;;  %s4821_s1 = inlined_call_operand.vmem [shape: f32[64,8], index: 1, kind: input, shape index: {}]   ;;  %s4822_s2 = inlined_call_operand.vmem [shape: bf16[64,128], index: 2, kind: input, shape index: {}]   ;;  %s4823_s3 = inlined_call_operand.vmem [shape: bf16[64,128], index: 3, kind: input, shape index: {}]   ;;  %s4824_s4 = inlined_call_operand.hbm [shape: bf16[8,8], index: 4, kind: input, shape index: {}]   ;;  %s4825_s5 = inlined_call_operand.hbm [shape: f32[1,8], index: 5, kind: input, shape index: {}]   ;;  %s4826_s6 = inlined_call_operand.hbm [shape: bf16[8,128], index: 6, kind: input, shape index: {}]   ;;  %s4827_s7 = inlined_call_operand.vmem [shape: bf16[128,128], index: 7, kind: input, shape index: {}]   ;;  %s4828_s8 = inlined_call_operand.hbm [shape: f32[1,128], index: 8, kind: input, shape index: {}]   ;;  %s4829_s9 = inlined_call_operand.vmem [shape: bf16[256,256], index: 9, kind: input, shape index: {}]   ;;  %s4830_s10 = inlined_call_operand.hbm [shape: f32[1,256], index: 10, kind: input, shape index: {}]   ;;  %s4831_s11 = inlined_call_operand.vmem [shape: bf16[256,256], index: 11, kind: input, shape index: {}]   ;;  %s4832_s12 = inlined_call_operand.hbm [shape: f32[1,256], index: 12, kind: input, shape index: {}]   ;;  %s4833_s13 = inlined_call_operand.vmem [shape: bf16[256,256], index: 13, kind: input, shape index: {}]   ;;  %s4834_s14 = inlined_call_operand.hbm [shape: f32[1,256], index: 14, kind: input, shape index: {}]   ;;  %s4835_s15 = inlined_call_operand.vmem [shape: bf16[256,1], index: 15, kind: input, shape index: {}]   ;;  %s4836_s16 = inlined_call_operand.hbm [shape: bf16[128,128], index: 16, kind: input, shape index: {}]   ;;  %s4837_s17 = inlined_call_operand.hbm [shape: f32[1,128], index: 17, kind: input, shape index: {}]   ;;  %s4838_s18 = inlined_call_operand.hbm [shape: bf16[128,128], index: 18, kind: input, shape index: {}]   ;;  %s4839_s19 = inlined_call_operand.hbm [shape: f32[1,128], index: 19, kind: input, shape index: {}]   ;;  %s4840_s20 = inlined_call_operand.hbm [shape: bf16[128,128], index: 20, kind: input, shape index: {}]   ;;  %s4841_s21 = inlined_call_operand.vmem [shape: f32[1,128], index: 21, kind: input, shape index: {}]   ;;  %s4842_s22 = inlined_call_operand.vmem [shape: bf16[64,128], index: 22, kind: output, shape index: {}]  }
   0x1   :  { %4849 = sst [smem:[#allocation28_spill]] %s4820_s0 }
   0x2   :  { %4850 = sst [smem:[#allocation29_spill]] %s4821_s1 }
   0x3   :  { %4851 = sst [smem:[#allocation30_spill]] %s4822_s2 }
   0x4   :  { %4852 = sst [smem:[#allocation31_spill]] %s4823_s3 }
   0x5   :  { %4853 = sst [smem:[#allocation32_spill]] %s4824_s4 }
   0x6   :  { %4854 = sst [smem:[#allocation33_spill]] %s4825_s5 }
   0x7   :  { %4855 = sst [smem:[#allocation34_spill]] %s4826_s6 }
   0x8   :  { %27 = vsyncpa [#allocation3], 0 }
   0x9   :  { %28 = vsyncpa [#allocation5], 0 }
   0xa   :  { %29 = vsyncpa [#allocation8], 0 }
   0xb   :  { %30 = vsyncpa [#allocation11], 0 }
   0xc   :  { %31 = vsyncpa [#allocation14], 0 }
   0xd   :  { %32 = vsyncpa [#allocation17], 0 }
   0xe   :  { %33 = vsyncpa [#allocation20], 0  ;;  %s4188_s3 = smov 0  }
   0xf LB: > { %s4058_s28 = smov [#allocation4]   ;;  %s4843_s30 = sadd.s32 4294967295, %s4056_s3   ;;  %s4056_s3 = sphi %s4188_s3, %s39_s3  }
  0x10   : > { %s576_s29 = sshll.u32 %s4058_s28, 4  ;;  %p2927_p0 = scmp.ge.s32.totalorder %s4056_s3, 1  ;;  %s577_s29 = int_to_ptr.vmem [resolvable:$true] %s576_s29 }
  0x11   : > { %p552_p1 = scmp.lt.s32.totalorder %s4056_s3, 3  ;;  %p4198_p2 = scmp.eq.s32.totalorder %s4843_s30, 0 }
  0x12   : > { %s4059_s23 = smov [#allocation7]   ;;  %s4060_s5 = smov [#allocation10]  }
  0x13   : > { %s4856_s4 = scalar_select %p4198_p2, 1, 0 }
  0x14   : > { %p4202_p3 = pnand %p2927_p0, %p552_p1  ;;  %s601_s1 = sshll.u32 %s4059_s23, 4  ;;  %s4208_s1 = int_to_ptr.vmem [resolvable:$true] %s601_s1 }
  0x15   : > { %s629_s24 = sshll.u32 %s4060_s5, 4  ;;  %s4061_s25 = smov [#allocation13]   ;;  %s4216_s24 = int_to_ptr.vmem [resolvable:$true] %s629_s24 }
  0x16   : > { %s4857_s0 = scalar_select %p4202_p3, 1, 0 }
  0x17   : > { %p3374_p4 = pneg %p4202_p3  ;;  %s656_s26 = sshll.u32 %s4061_s25, 4  ;;  %s4218_s26 = int_to_ptr.vmem [resolvable:$true] %s656_s26 }
  0x18   : > { %s3721_s27 = scalar_lea.vmem %s577_s29, 16  ;;  %s3728_s28 = scalar_lea.vmem %s577_s29, 32 }
  0x19   : > { %p4212_p5 = pnand %p4198_p2, %p3374_p4  ;;  %p3722_p7 = scmp.ne.s32.totalorder %s577_s29, %s3721_s27 }
  0x1a   : > { %p3729_p10 = scmp.lt.s32.totalorder %s577_s29, %s577_s29  ;;  %p3730_p11 = scmp.lt.s32.totalorder %s3728_s28, %s3721_s27 }
  0x1b   : > { %p4222_p6 = pneg %p4212_p5 }
  0x1c   : > { %p3731_p12 = por %p3730_p11, %p3729_p10 }
  0x1d   : > { %p3724_p8 = pnand %p3722_p7, %p4222_p6 }
  0x1f   : > { %p3725_p9 = pneg %p3724_p8 }
  0x21   : > { %p3732_p13 = pnand %p3731_p12, %p3725_p9 }
  0x23   : > { %3735 = shalt.err (!%p3732_p13)
}
  0x24   : > { %s4860_s25 = sld [smem:[#allocation33_spill]]  ;;  %s3747_s30 = scalar_lea.vmem %s4208_s1, 16 }
  0x25   : > { %p3748_p0 = scmp.ne.s32.totalorder %s4208_s1, %s3747_s30  ;;  %s3754_s27 = scalar_lea.vmem %s4208_s1, 32 }
  0x26   : > { %p3755_p7 = scmp.lt.s32.totalorder %s4208_s1, %s4208_s1  ;;  %p3756_p8 = scmp.lt.s32.totalorder %s3754_s27, %s3747_s30 }
  0x27   : > { %p3750_p1 = pnand %p3748_p0, %p4222_p6 }
  0x28   : > { %p3757_p9 = por %p3756_p8, %p3755_p7 }
  0x29   : > { %p3751_p4 = pneg %p3750_p1 }
  0x2a   : > { %3380 = dma.hbm_to_vmem [thread:$0]  (!%p4212_p5), %s4860_s25, 16, %s577_s29, [#allocation5]  }
  0x2b   : > { %p3758_p10 = pnand %p3757_p9, %p3751_p4 }
  0x2d   : > { %3761 = shalt.err (!%p3758_p10)
}
  0x2e   : > { %3386 = dma.hbm_to_vmem [thread:$0]  (!%p4212_p5), %s4828_s8, 16, %s4208_s1, [#allocation8]  }
  0x2f   : > { %s3773_s29 = scalar_lea.vmem %s4216_s24, 32  ;;  %p3781_p0 = scmp.lt.s32.totalorder %s4216_s24, %s4216_s24 }
  0x30   : > { %p3774_p11 = scmp.ne.s32.totalorder %s4216_s24, %s3773_s29  ;;  %p3782_p1 = scmp.lt.s32.totalorder %s3773_s29, %s3773_s29 }
  0x32   : > { %p3776_p12 = pnand %p3774_p11, %p4222_p6  ;;  %p3783_p4 = por %p3782_p1, %p3781_p0 }
  0x34   : > { %p3777_p13 = pneg %p3776_p12 }
  0x36   : > { %p3784_p7 = pnand %p3783_p4, %p3777_p13 }
  0x38   : > { %3787 = shalt.err (!%p3784_p7)
}
  0x39   : > { %3392 = dma.hbm_to_vmem [thread:$0]  (!%p4212_p5), %s4832_s12, 32, %s4216_s24, [#allocation11]  }
  0x3a   : > { %s3799_s1 = scalar_lea.vmem %s4218_s26, 1024  ;;  %p3807_p11 = scmp.lt.s32.totalorder %s4218_s26, %s4218_s26 }
  0x3b   : > { %p3800_p8 = scmp.ne.s32.totalorder %s4218_s26, %s3799_s1  ;;  %p3808_p12 = scmp.lt.s32.totalorder %s3799_s1, %s3799_s1 }
  0x3d   : > { %p3802_p9 = pnand %p3800_p8, %p4222_p6  ;;  %p3809_p13 = por %p3808_p12, %p3807_p11 }
  0x3f   : > { %p3803_p10 = pneg %p3802_p9 }
  0x41   : > { %p3810_p0 = pnand %p3809_p13, %p3803_p10 }
  0x43   : > { %3813 = shalt.err (!%p3810_p0)
}
  0x44   : > { %s4844_s25 = smov 64   ;;  %s4845_s27 = smov 4  }
  0x45   : > { %3398 = dma.hbm_to_vmem [thread:$0]  (!%p4212_p5), %s4836_s16, 1024, %s4218_s26, [#allocation14], %s4844_s25, %s4844_s25, %s4845_s27  }
  0x46   : > { %s4064_s23 = smov [#allocation16]   ;;  %s4065_s30 = smov [#allocation2]  }
  0x47   : > { %s680_s29 = sshll.u32 %s4064_s23, 4  ;;  %s565_s5 = sshll.u32 %s4065_s30, 4  ;;  %s681_s29 = int_to_ptr.vmem [resolvable:$true] %s680_s29  ;;  %s566_s5 = int_to_ptr.vmem [resolvable:$true] %s565_s5 }
  0x48   : > { %s3825_s1 = scalar_lea.vmem %s681_s29, 1024  ;;  %p3833_p8 = scmp.lt.s32.totalorder %s681_s29, %s681_s29 }
  0x49   : > { %p3826_p1 = scmp.ne.s32.totalorder %s681_s29, %s3825_s1  ;;  %p3834_p9 = scmp.lt.s32.totalorder %s3825_s1, %s3825_s1 }
  0x4b   : > { %p3828_p4 = pnand %p3826_p1, %p4222_p6  ;;  %p3835_p10 = por %p3834_p9, %p3833_p8 }
  0x4d   : > { %p3829_p7 = pneg %p3828_p4 }
  0x4f   : > { %p3836_p11 = pnand %p3835_p10, %p3829_p7 }
  0x51   : > { %3839 = shalt.err (!%p3836_p11)
}
  0x52   : > { %3404 = dma.hbm_to_vmem [thread:$0]  (!%p4212_p5), %s4838_s18, 1024, %s681_s29, [#allocation17], %s4844_s25, %s4844_s25, %s4845_s27  }
  0x53   : > { %s3851_s28 = scalar_lea.vmem %s566_s5, 64  ;;  %p3859_p1 = scmp.lt.s32.totalorder %s566_s5, %s566_s5 }
  0x54   : > { %p3852_p12 = scmp.ne.s32.totalorder %s566_s5, %s3851_s28  ;;  %p3860_p4 = scmp.lt.s32.totalorder %s3851_s28, %s3851_s28 }
  0x56   : > { %p3854_p13 = pnand %p3852_p12, %p4222_p6  ;;  %p3861_p7 = por %p3860_p4, %p3859_p1 }
  0x58   : > { %p3855_p0 = pneg %p3854_p13 }
  0x5a   : > { %p3862_p8 = pnand %p3861_p7, %p3855_p0 }
  0x5c   : > { %3865 = shalt.err (!%p3862_p8)
}
  0x5d   : > { %s4861_s1 = sld [smem:[#allocation32_spill]]  ;;  %s4066_s26 = smov [#allocation6]  }
  0x5e   : > { %s587_s29 = sshll.u32 %s4066_s26, 4  ;;  %s4067_s24 = smov [#allocation9]   ;;  %s588_s29 = int_to_ptr.vmem [resolvable:$true] %s587_s29 }
  0x5f   : > { %s615_s25 = sshll.u32 %s4067_s24, 4  ;;  %s3877_s27 = scalar_lea.vmem %s588_s29, 64  ;;  %s616_s25 = int_to_ptr.vmem [resolvable:$true] %s615_s25 }
  0x60   : > { %p3878_p9 = scmp.ne.s32.totalorder %s588_s29, %s3877_s27  ;;  %p3885_p12 = scmp.lt.s32.totalorder %s588_s29, %s588_s29 }
  0x61   : > { %p3886_p13 = scmp.lt.s32.totalorder %s3877_s27, %s3877_s27 }
  0x62   : > { %p3880_p10 = pnand %p3878_p9, %p4222_p6 }
  0x63   : > { %3377 = dma.hbm_to_vmem [thread:$0]  (!%p4212_p5), %s4861_s1, 64, %s566_s5, [#allocation3]  }
  0x64   : > { %p3881_p11 = pneg %p3880_p10  ;;  %p3887_p0 = por %p3886_p13, %p3885_p12 }
  0x66   : > { %p3888_p1 = pnand %p3887_p0, %p3881_p11 }
  0x68   : > { %3891 = shalt.err (!%p3888_p1)
}
  0x69   : > { %s4862_s5 = sld [smem:[#allocation34_spill]]  ;;  %s3903_s30 = scalar_lea.vmem %s616_s25, 32 }
  0x6a   : > { %p3904_p4 = scmp.ne.s32.totalorder %s616_s25, %s3903_s30  ;;  %p3911_p9 = scmp.lt.s32.totalorder %s616_s25, %s616_s25 }
  0x6b   : > { %p3912_p10 = scmp.lt.s32.totalorder %s3903_s30, %s3903_s30 }
  0x6c   : > { %p3906_p7 = pnand %p3904_p4, %p4222_p6 }
  0x6d   : > { %p3913_p2 = por %p3912_p10, %p3911_p9 }
  0x6e   : > { %p3907_p8 = pneg %p3906_p7 }
  0x6f   : > { %3383 = dma.hbm_to_vmem [thread:$0]  (!%p4212_p5), %s4862_s5, 64, %s588_s29, [#allocation5]  }
  0x70   : > { %p3914_p3 = pnand %p3913_p2, %p3907_p8 }
  0x72   : > { %3917 = shalt.err (!%p3914_p3)
}
  0x73   : > { %3389 = dma.hbm_to_vmem [thread:$0]  (!%p4212_p5), %s4830_s10, 32, %s616_s25, [#allocation8]  }
  0x74   : > { %s4068_s26 = smov [#allocation12]   ;;  %s4069_s24 = smov [#allocation15]  }
  0x75   : > { %s643_s29 = sshll.u32 %s4068_s26, 4  ;;  %s670_s28 = sshll.u32 %s4069_s24, 4  ;;  %s644_s29 = int_to_ptr.vmem [resolvable:$true] %s643_s29  ;;  %s671_s28 = int_to_ptr.vmem [resolvable:$true] %s670_s28 }
  0x76   : > { %s3929_s23 = scalar_lea.vmem %s644_s29, 32  ;;  %p3937_p0 = scmp.lt.s32.totalorder %s644_s29, %s644_s29 }
  0x77   : > { %p3930_p11 = scmp.ne.s32.totalorder %s644_s29, %s3929_s23  ;;  %p3938_p2 = scmp.lt.s32.totalorder %s3929_s23, %s3929_s23 }
  0x79   : > { %p3932_p12 = pnand %p3930_p11, %p4222_p6  ;;  %p3939_p3 = por %p3938_p2, %p3937_p0 }
  0x7b   : > { %p3933_p13 = pneg %p3932_p12 }
  0x7d   : > { %p3940_p1 = pnand %p3939_p3, %p3933_p13 }
  0x7f   : > { %3943 = shalt.err (!%p3940_p1)
}
  0x80   : > { %3395 = dma.hbm_to_vmem [thread:$0]  (!%p4212_p5), %s4834_s14, 32, %s644_s29, [#allocation11]  }
  0x81   : > { %s3955_s25 = scalar_lea.vmem %s671_s28, 16  ;;  %s3962_s27 = scalar_lea.vmem %s671_s28, 32 }
  0x82   : > { %p3956_p4 = scmp.ne.s32.totalorder %s671_s28, %s3955_s25  ;;  %p3963_p9 = scmp.lt.s32.totalorder %s671_s28, %s671_s28 }
  0x83   : > { %p3964_p10 = scmp.lt.s32.totalorder %s3962_s27, %s3955_s25 }
  0x84   : > { %p3958_p7 = pnand %p3956_p4, %p4222_p6 }
  0x85   : > { %p3965_p11 = por %p3964_p10, %p3963_p9 }
  0x86   : > { %p3959_p8 = pneg %p3958_p7 }
  0x88   : > { %p3966_p12 = pnand %p3965_p11, %p3959_p8 }
  0x8a   : > { %3969 = shalt.err (!%p3966_p12)
}
  0x8b   : > { %3401 = dma.hbm_to_vmem [thread:$0]  (!%p4212_p5), %s4837_s17, 16, %s671_s28, [#allocation14]  }
  0x8c   : > { %s4070_s29 = smov [#allocation18]   ;;  %s4071_s23 = smov [#allocation19]  }
  0x8d   : > { %s694_s24 = sshll.u32 %s4070_s29, 4  ;;  %s704_s5 = sshll.u32 %s4071_s23, 4  ;;  %s695_s24 = int_to_ptr.vmem [resolvable:$true] %s694_s24  ;;  %s705_s5 = int_to_ptr.vmem [resolvable:$true] %s704_s5 }
  0x8e   : > { %s3981_s30 = scalar_lea.vmem %s695_s24, 16  ;;  %s3988_s25 = scalar_lea.vmem %s695_s24, 32 }
  0x8f   : > { %p3982_p13 = scmp.ne.s32.totalorder %s695_s24, %s3981_s30  ;;  %p3989_p3 = scmp.lt.s32.totalorder %s695_s24, %s695_s24 }
  0x90   : > { %p3990_p1 = scmp.lt.s32.totalorder %s3988_s25, %s3981_s30 }
  0x91   : > { %p3984_p0 = pnand %p3982_p13, %p4222_p6 }
  0x92   : > { %p3991_p4 = por %p3990_p1, %p3989_p3 }
  0x93   : > { %p3985_p2 = pneg %p3984_p0 }
  0x95   : > { %p3992_p7 = pnand %p3991_p4, %p3985_p2 }
  0x97   : > { %3995 = shalt.err (!%p3992_p7)
}
  0x98   : > { %3407 = dma.hbm_to_vmem [thread:$0]  (!%p4212_p5), %s4839_s19, 16, %s695_s24, [#allocation17]  }
  0x99   : > { %s4007_s1 = scalar_lea.vmem %s705_s5, 1024  ;;  %p4015_p11 = scmp.lt.s32.totalorder %s705_s5, %s705_s5 }
  0x9a   : > { %p4008_p8 = scmp.ne.s32.totalorder %s705_s5, %s4007_s1  ;;  %p4016_p12 = scmp.lt.s32.totalorder %s4007_s1, %s4007_s1 }
  0x9c   : > { %p4010_p9 = pnand %p4008_p8, %p4222_p6  ;;  %p4017_p13 = por %p4016_p12, %p4015_p11 }
  0x9e   : > { %p4011_p10 = pneg %p4010_p9 }
  0xa0   : > { %p4018_p0 = pnand %p4017_p13, %p4011_p10 }
  0xa2   : > { %4021 = shalt.err (!%p4018_p0)
}
  0xa3   : > { %s4863_s26 = smov 4   ;;  %s4864_s29 = smov 64  }
  0xa4   : > { %3410 = dma.hbm_to_vmem [thread:$0]  (!%p4212_p5), %s4840_s20, 1024, %s705_s5, [#allocation20], %s4864_s29, %s4864_s29, %s4863_s26  }
  0xa5   : > { %p4865_p2 = scmp.ne.s32.totalorder %s4857_s0, 0 }
  0xa6   : > { %p4866_p6 = scmp.ne.s32.totalorder (!%p4865_p2), %s4856_s4, 0 }
  0xa7   : > { %759 = sbr.rel (%p4865_p2) target bundleno = 2776 (0xad8), region = 108 }
  0xac   : > { %4027 = dma.done.wait (%p4866_p6), [#allocation3], 64  }
  0xad   : > { %4029 = vsyncadd (%p4866_p6), [#allocation3], 4294967232 }
  0xae   : > { %4031 = dma.done.wait (%p4866_p6), [#allocation5], 80  }
  0xaf   : > { %4033 = vsyncadd (%p4866_p6), [#allocation5], 4294967216 }
  0xb0   : > { %4035 = dma.done.wait (%p4866_p6), [#allocation8], 48  }
  0xb1   : > { %4037 = vsyncadd (%p4866_p6), [#allocation8], 4294967248 }
  0xb2   : > { %4039 = dma.done.wait (%p4866_p6), [#allocation11], 64  }
  0xb3   : > { %4041 = vsyncadd (%p4866_p6), [#allocation11], 4294967232 }
  0xb4   : > { %4043 = dma.done.wait (%p4866_p6), [#allocation14], 1040  }
  0xb5   : > { %4045 = vsyncadd (%p4866_p6), [#allocation14], 4294966256 }
  0xb6   : > { %4047 = dma.done.wait (%p4866_p6), [#allocation17], 1040  }
  0xb7   : > { %4049 = vsyncadd (%p4866_p6), [#allocation17], 4294966256 }
  0xb8   : > { %4051 = dma.done.wait (%p4866_p6), [#allocation20], 1024  }
  0xb9   : > { %4053 = vsyncadd (%p4866_p6), [#allocation20], 4294966272  ;;  %s4867_s0 = sadd.s32 4294967295, %s4056_s3   ;;  %vm944_vm0 = vcmask 1043456   ;;  %s4868_s25 = sld [smem:[#allocation29_spill]]  ;;  %vm937_vm1 = vcmask 64512  }
  0xba   : > { %s2954_s6 = sshll.u32 %s4867_s0, 2  ;;  %v929_v0 = vld [vmem:[#allocation2] sm:$0xf]  ;;  %v2964_v20 = vld [vmem:[#allocation4] ss:$0 sm:$0xff]  ;;  %v3460_v55 = vld [vmem:[%s4827_s7 + $0x38] sm:$0xff]  }
  0xbb   : > { %p881_p5 = scmp.lt.s32.totalorder %s2954_s6, 7  ;;  %3324 = vmatprep.subr.msk.bf16.mxu1 %vm944_vm0, %v929_v0  ;;  %v946_v3 = vsel %vm944_vm0, %v929_v0, 0  ;;  %v1043_v53 = vld [vmem:[#allocation6] sm:$0xf]  ;;  %v3461_v56 = vld [vmem:[%s4827_s7 + $0x30] sm:$0xff]   ;;  %3244 = vmatprep.subr.bf16.mxu0 %v3460_v55  ;;  %v3464_v59 = vld [vmem:[%s4827_s7 + $0x18] sm:$0xff]  }
  0xbc   : > { %3233 = vmatpush3.bf16.msra.mxu1 %v946_v3  ;;  %v1051_v54 = vsel %vm944_vm0, %v1043_v53, 0  ;;  %3245 = vmatpush3.bf16.msra.mxu0 %v3460_v55  ;;  %v3462_v57 = vld [vmem:[%s4827_s7 + $0x28] sm:$0xff]   ;;  %v3463_v58 = vld [vmem:[%s4827_s7 + $0x20] sm:$0xff]   ;;  %s4869_s30 = sld [smem:[#allocation30_spill]] }
  0xbd   : > { %s4873_s6 = smov (!%p881_p5, %s2954_s6), 7  ;;  %3325 = vmatprep.subr.msk.bf16.mxu1 %vm944_vm0, %v1043_v53  ;;  %3246 = vmatprep.subr.bf16.mxu0 %v3461_v56  ;;  %v3509_v55 = vld [vmem:[%s4829_s9 + $0xa4] ss:$8 sps:$4 sm:$0xff]   ;;  %s4871_s29 = sld [smem:[#allocation31_spill]] }
  0xbe   : > { %s2957_s2 = sshll.u32 %s4873_s6, 3  ;;  %s4492_s26 = sshll.u32 %s4873_s6, 2 }
  0xbf   : > { %s890_s27 = scalar_lea.vmem %s4868_s25, %s2957_s2  ;;  %s4870_s2 = sld [smem:[#allocation28_spill]] }
  0xc0   : > { %v911_v1 = vld [vmem:[%s890_s27] sm:$0xff]  ;;  %v912_v2 = vld [vmem:[%s890_s27 + $0x8] sm:$0xff]  ;;  %v913_v6 = vld [vmem:[%s890_s27 + $0x10] sm:$0xff]  ;;  %3247 = vmatpush3.bf16.msra.mxu0 %v3461_v56 }
  0xc1   : > { %v915_v4 = vmul.f32 -50.0, %v911_v1  ;;  %v916_v5 = vmul.f32 -50.0, %v912_v2  ;;  %v914_v7 = vld [vmem:[%s890_s27 + $0x18] sm:$0xff]  ;;  %v917_v8 = vmul.f32 -50.0, %v913_v6  ;;  %3248 = vmatprep.subr.bf16.mxu0 %v3462_v57  ;;  %v3507_v56 = vld [vmem:[%s4829_s9 + $0xa0] ss:$8 sps:$4 sm:$0xff]  }
  0xc2   : > { %v918_v9 = vmul.f32 -50.0, %v914_v7  ;;  %s896_s0 = scalar_lea.vmem %s4869_s30, %s4492_s26 }
  0xc3   : > { %v919_v10 = vmul.f32 1.442695, %v915_v4  ;;  %v921_v11 = vmul.f32 1.442695, %v916_v5  ;;  %v923_v12 = vmul.f32 1.442695, %v917_v8  ;;  %s902_s23 = scalar_lea.vmem %s4871_s29, %s4492_s26 }
  0xc4   : > { %v925_v13 = vmul.f32 1.442695, %v918_v9  ;;  %3249 = vmatpush3.bf16.msra.mxu0 %v3462_v57  ;;  %v3512_v57 = vld [vmem:[%s4829_s9 + $0x94] ss:$8 sps:$4 sm:$0xff]  }
  0xc5   : > { %3654 = vpow2.f32 %v919_v10  ;;  %3250 = vmatprep.subr.bf16.mxu0 %v3463_v58  ;;  %v3465_v10 = vld [vmem:[%s4827_s7 + $0x10] sm:$0xff]   ;;  %s4520_s24 = scalar_lea.vmem %s4870_s2, %s4492_s26 }
  0xc6   : > { %3656 = vpow2.f32 %v921_v11  ;;  %v3466_v11 = vld [vmem:[%s4827_s7 + $0x8] sm:$0xff]  }
  0xc7   : > { %3658 = vpow2.f32 %v923_v12  ;;  %v3467_v12 = vld [vmem:[%s4827_s7] sm:$0xff]  }
  0xc8   : > { %3660 = vpow2.f32 %v925_v13  ;;  %3251 = vmatpush3.bf16.msra.mxu0 %v3463_v58  ;;  %v3468_v13 = vld [vmem:[%s4829_s9 + $0x70] ss:$8 sps:$4 sm:$0xff]  }
  0xc9   : > { %3252 = vmatprep.subr.bf16.mxu0 %v3464_v59  ;;  %v3510_v58 = vld [vmem:[%s4829_s9 + $0x90] ss:$8 sps:$4 sm:$0xff]  }
  0xcc   : > { %3253 = vmatpush3.bf16.msra.mxu0 %v3464_v59  ;;  %v3513_v59 = vld [vmem:[%s4829_s9 + $0x80] ss:$8 sps:$4 sm:$0xff]  }
  0xcd   : > { %3254 = vmatprep.subr.bf16.mxu0 %v3465_v10 }
  0xd0   : > { %3255 = vmatpush3.bf16.msra.mxu0 %v3465_v10  ;;  %v3536_v10 = vld [vmem:[%s4831_s11 + $0x10] ss:$8 sps:$4 sm:$0xff]  }
  0xd1   : > { %3256 = vmatprep.subr.bf16.mxu0 %v3466_v11 }
  0xd2   : > { %v3655_v14 = vpop.eup %3654 }
  0xd3   : > { %v3657_v15 = vpop.eup %3656 }
  0xd4   : > { %v3659_v16 = vpop.eup %3658  ;;  %v927_v17 = vpack.c.bf16 %v3657_v15, %v3655_v14  ;;  %3257 = vmatpush3.bf16.msra.mxu0 %v3466_v11  ;;  %v3470_v14 = vld [vmem:[%s4829_s9 + $0x74] ss:$8 sps:$4 sm:$0xff]   ;;  %v3473_v15 = vld [vmem:[%s4829_s9 + $0x64] ss:$8 sps:$4 sm:$0xff]  }
  0xd5   : > { %v3661_v18 = vpop.eup %3660  ;;  %3258 = vmatprep.subr.bf16.mxu0 %v3467_v12  ;;  %v3541_v11 = vld [vmem:[%s4831_s11 + $0x4] ss:$8 sps:$4 sm:$0xff]  }
  0xd6   : > { %3234 = vmatprep.mubr.msk.bf16.mxu1 %vm937_vm1, %v927_v17  ;;  %v928_v19 = vpack.c.bf16 %v3661_v18, %v3659_v16  ;;  %v3471_v16 = vld [vmem:[%s4829_s9 + $0x60] ss:$8 sps:$4 sm:$0xff]   ;;  %v3476_v17 = vld [vmem:[%s4829_s9 + $0x54] ss:$8 sps:$4 sm:$0xff]   ;;  %v3474_v18 = vld [vmem:[%s4829_s9 + $0x50] ss:$8 sps:$4 sm:$0xff]  }
  0xd8   : > { %3235 = vmatmul.mubr.msk.bf16.vlgmr.msra.gmra.mxu1 %vm937_vm1, %v928_v19  ;;  %3259 = vmatpush3.bf16.msra.mxu0 %v3467_v12  ;;  %v3479_v19 = vld [vmem:[%s4829_s9 + $0x44] ss:$8 sps:$4 sm:$0xff]   ;;  %v3539_v12 = vld [vmem:[%s4831_s11] ss:$8 sps:$4 sm:$0xff]  }
  0xd9   : > { %3239 = vmatpush3.bf16.msra.mxu1 %v1051_v54 }
  0xda   : > { %1470 = vmatprep.subr.bf16.mxu1 %v3470_v14  ;;  %v3542_v14 = vld [vmem:[%s4831_s11 + $0xf0] ss:$8 sps:$4 sm:$0xff]  }
 0x198   : > { %v3236_v21 = vpop.f32.mrf.mxu1 }
 0x199   : > { %v991_v22 = vadd.f32 %v3236_v21, %v2964_v20  ;;  %v3482_v21 = vld [vmem:[%s4829_s9 + $0x34] ss:$8 sps:$4 sm:$0xff]  }
 0x19a   : > { %v982_v23 = vpop.f32.mrf.mxu1 }
 0x19b   : > { %v983_v24 = vadd.f32 %v2964_v20, %v982_v23  ;;  %v1003_v25 = vsel %vm937_vm1, %v991_v22, -inf  ;;  %v3485_v23 = vld [vmem:[%s4829_s9 + $0x24] ss:$8 sps:$4 sm:$0xff]  }
 0x19c   : > { %1004 = vmax.xlane.f32.xlu1 %v1003_v25  ;;  %v3237_v26 = vpop.f32.mrf.mxu1  ;;  %v3488_v25 = vld [vmem:[%s4829_s9 + $0x14] ss:$8 sps:$4 sm:$0xff]  }
 0x19d   : > { %v994_v27 = vadd.f32 %v3237_v26, %v2964_v20  ;;  %v997_v28 = vsel %vm937_vm1, %v983_v24, -inf  ;;  %v3486_v26 = vld [vmem:[%s4829_s9 + $0x10] ss:$8 sps:$4 sm:$0xff]  }
 0x19e   : > { %v985_v29 = vpop.f32.mrf.mxu1  ;;  %998 = vmax.xlane.f32.xlu0 %v997_v28  ;;  %v3489_v28 = vld [vmem:[%s4829_s9] ss:$8 sps:$4 sm:$0xff]  }
 0x19f   : > { %v986_v30 = vadd.f32 %v2964_v20, %v985_v29  ;;  %v1006_v31 = vsel %vm937_vm1, %v994_v27, -inf  ;;  %v3477_v20 = vld [vmem:[%s4829_s9 + $0x40] ss:$8 sps:$4 sm:$0xff]   ;;  %v3494_v29 = vld [vmem:[%s4829_s9 + $0xf4] ss:$8 sps:$4 sm:$0xff]  }
 0x1a0   : > { %1007 = vmax.xlane.f32.xlu1 %v1006_v31  ;;  %v3497_v31 = vld [vmem:[%s4829_s9 + $0xe4] ss:$8 sps:$4 sm:$0xff]  }
 0x1a1   : > { %v1000_v32 = vsel %vm937_vm1, %v986_v30, -inf }
 0x1a2   : > { %1001 = vmax.xlane.f32.xlu0 %v1000_v32  ;;  %v3495_v32 = vld [vmem:[%s4829_s9 + $0xe0] ss:$8 sps:$4 sm:$0xff]  }
 0x225   : > { %v1005_v33 = vpop.xlane.xlu1 %1004 }
 0x226   : > { %v1011_v34 = vsub.f32 %v991_v22, %v1005_v33  ;;  %v3480_v22 = vld [vmem:[%s4829_s9 + $0x30] ss:$8 sps:$4 sm:$0xff]   ;;  %v3500_v33 = vld [vmem:[%s4829_s9 + $0xd4] ss:$8 sps:$4 sm:$0xff]  }
 0x227   : > { %v999_v35 = vpop.xlane.xlu0 %998 }
 0x228   : > { %v1009_v36 = vsub.f32 %v983_v24, %v999_v35  ;;  %v1017_v38 = vmul.f32 1.442695, %v1011_v34  ;;  %v3483_v24 = vld [vmem:[%s4829_s9 + $0x20] ss:$8 sps:$4 sm:$0xff]   ;;  %v3498_v34 = vld [vmem:[%s4829_s9 + $0xd0] ss:$8 sps:$4 sm:$0xff]  }
 0x229   : > { %v1008_v37 = vpop.xlane.xlu1 %1007  ;;  %v3503_v35 = vld [vmem:[%s4829_s9 + $0xc4] ss:$8 sps:$4 sm:$0xff]  }
 0x22a   : > { %v1013_v39 = vmul.f32 1.442695, %v1009_v36  ;;  %v1012_v40 = vsub.f32 %v994_v27, %v1008_v37  ;;  %v3491_v27 = vld [vmem:[%s4829_s9 + $0x4] ss:$8 sps:$4 sm:$0xff]   ;;  %v3501_v36 = vld [vmem:[%s4829_s9 + $0xc0] ss:$8 sps:$4 sm:$0xff]  }
 0x22b   : > { %v1002_v41 = vpop.xlane.xlu0 %1001  ;;  %v3506_v37 = vld [vmem:[%s4829_s9 + $0xb4] ss:$8 sps:$4 sm:$0xff]  }
 0x22c   : > { %3662 = vpow2.f32 %v1013_v39  ;;  %v1010_v42 = vsub.f32 %v986_v30, %v1002_v41  ;;  %v1019_v43 = vmul.f32 1.442695, %v1012_v40  ;;  %v3492_v30 = vld [vmem:[%s4829_s9 + $0xf0] ss:$8 sps:$4 sm:$0xff]   ;;  %v3130_v40 = vld [vmem:[%s896_s0] sm:$0xff]   ;;  %v3155_v41 = vld [vmem:[%s896_s0 + $0x8] sm:$0xff]  }
 0x22d   : > { %3664 = vpow2.f32 %v1017_v38  ;;  %v3504_v38 = vld [vmem:[%s4829_s9 + $0xb0] ss:$8 sps:$4 sm:$0xff]  }
 0x22e   : > { %v1015_v44 = vmul.f32 1.442695, %v1010_v42 }
 0x230   : > { %3666 = vpow2.f32 %v1015_v44  ;;  %v3131_v44 = vunpack.c.l.bf16 %v3130_v40 }
 0x231   : > { %3668 = vpow2.f32 %v1019_v43  ;;  %v3136_v43 = vunpack.c.h.bf16 %v3155_v41 }
 0x239   : > { %v3663_v45 = vpop.eup %3662 }
 0x23a   : > { %v1021_v46 = vsel %vm937_vm1, %v3663_v45, 0.0  ;;  %v3665_v47 = vpop.eup %3664 }
 0x23b   : > { %1022 = vadd.xlane.f32.xlu0 %v1021_v46  ;;  %v1027_v49 = vsel %vm937_vm1, %v3665_v47, 0.0  ;;  %v3135_v46 = vunpack.c.l.bf16 %v3155_v41  ;;  %v3516_v41 = vld [vmem:[%s4520_s24] sm:$0xff]  }
 0x23d   : > { %v3667_v48 = vpop.eup %3666 }
 0x23e   : > { %v1024_v50 = vsel %vm937_vm1, %v3667_v48, 0.0  ;;  %v3669_v51 = vpop.eup %3668 }
 0x23f   : > { %1028 = vadd.xlane.f32.xlu0 %v1027_v49  ;;  %1025 = vadd.xlane.f32.xlu1 %v1024_v50  ;;  %v1030_v52 = vsel %vm937_vm1, %v3669_v51, 0.0 }
 0x243   : > { %1031 = vadd.xlane.f32.xlu1 %v1030_v52 }
 0x2c4   : > { %v1023_v60 = vpop.xlane.xlu0 %1022 }
 0x2c5   : > { %3670 = vrcp.f32 %v1023_v60  ;;  %v3515_v60 = vld [vmem:[%s4829_s9 + $0x84] ss:$8 sps:$4 sm:$0xff]  }
 0x2c8   : > { %v1026_v61 = vpop.xlane.xlu1 %1025  ;;  %v1029_v62 = vpop.xlane.xlu0 %1028 }
 0x2c9   : > { %3672 = vrcp.f32 %v1026_v61  ;;  %v3518_v61 = vld [vmem:[%s4831_s11 + $0x70] ss:$8 sps:$4 sm:$0xff]  }
 0x2ca   : > { %3674 = vrcp.f32 %v1029_v62  ;;  %v3520_v62 = vld [vmem:[%s4831_s11 + $0x74] ss:$8 sps:$4 sm:$0xff]  }
 0x2cb   : > { %1739 = vmatprep.subr.bf16.mxu0 %v3520_v62  ;;  %v3583_v62 = vld [vmem:[%s4833_s13 + $0x24] ss:$8 sps:$4 sm:$0xff]  }
 0x2cc   : > { %v1032_v63 = vpop.xlane.xlu1 %1031 }
 0x2cd   : > { %3676 = vrcp.f32 %v1032_v63  ;;  %v3523_v63 = vld [vmem:[%s4831_s11 + $0x64] ss:$8 sps:$4 sm:$0xff]  }
 0x2d2   : > { %v3671_v0 = vpop.eup %3670 }
 0x2d3   : > { %v1034_v2 = vmul.f32 %v3671_v0, %v3663_v45  ;;  %v3132_v45 = vunpack.c.h.bf16 %v3130_v40  ;;  %v3521_v0 = vld [vmem:[%s4831_s11 + $0x60] ss:$8 sps:$4 sm:$0xff]  }
 0x2d6   : > { %v3673_v1 = vpop.eup %3672 }
 0x2d7   : > { %v1036_v3 = vmul.f32 %v3673_v1, %v3667_v48  ;;  %v3675_v4 = vpop.eup %3674  ;;  %v3526_v1 = vld [vmem:[%s4831_s11 + $0x54] ss:$8 sps:$4 sm:$0xff]  }
 0x2d8   : > { %v1038_v7 = vmul.f32 %v3675_v4, %v3665_v47  ;;  %v3527_v4 = vld [vmem:[%s4831_s11 + $0x40] ss:$8 sps:$4 sm:$0xff]  }
 0x2d9   : > { %v1041_v5 = vpack.c.bf16 %v1036_v3, %v1034_v2  ;;  %v3524_v2 = vld [vmem:[%s4831_s11 + $0x50] ss:$8 sps:$4 sm:$0xff]   ;;  %v3529_v3 = vld [vmem:[%s4831_s11 + $0x44] ss:$8 sps:$4 sm:$0xff]  }
 0x2da   : > { %v3677_v6 = vpop.eup %3676 }
 0x2db   : > { %3240 = vmatprep.mubr.msk.bf16.mxu1 %vm937_vm1, %v1041_v5  ;;  %v1040_v8 = vmul.f32 %v3677_v6, %v3669_v51  ;;  %v3532_v5 = vld [vmem:[%s4831_s11 + $0x34] ss:$8 sps:$4 sm:$0xff]   ;;  %v3530_v6 = vld [vmem:[%s4831_s11 + $0x30] ss:$8 sps:$4 sm:$0xff]  }
 0x2dd   : > { %v1042_v9 = vpack.c.bf16 %v1040_v8, %v1038_v7  ;;  %v3535_v7 = vld [vmem:[%s4831_s11 + $0x24] ss:$8 sps:$4 sm:$0xff]   ;;  %v3533_v8 = vld [vmem:[%s4831_s11 + $0x20] ss:$8 sps:$4 sm:$0xff]  }
 0x2df   : > { %3241 = vmatmul.mubr.msk.bf16.vlgmr.msra.gmra.mxu1 %vm937_vm1, %v1042_v9  ;;  %v3538_v9 = vld [vmem:[%s4831_s11 + $0x14] ss:$8 sps:$4 sm:$0xff]  }
 0x2e0   : > { %1471 = vmatpush1.bf16.msra.mxu1 %v3468_v13  ;;  %v3544_v13 = vld [vmem:[%s4831_s11 + $0xf4] ss:$8 sps:$4 sm:$0xff]  }
 0x2e1   : > { %1472 = vmatprep.subr.bf16.mxu1 %v3473_v15  ;;  %v3547_v15 = vld [vmem:[%s4831_s11 + $0xe4] ss:$8 sps:$4 sm:$0xff]  }
 0x2e4   : > { %1473 = vmatpush1.bf16.msra.mxu1 %v3471_v16  ;;  %v3545_v16 = vld [vmem:[%s4831_s11 + $0xe0] ss:$8 sps:$4 sm:$0xff]  }
 0x2e5   : > { %1474 = vmatprep.subr.bf16.mxu1 %v3476_v17  ;;  %v3550_v17 = vld [vmem:[%s4831_s11 + $0xd4] ss:$8 sps:$4 sm:$0xff]  }
 0x2e8   : > { %1475 = vmatpush1.bf16.msra.mxu1 %v3474_v18  ;;  %v3548_v18 = vld [vmem:[%s4831_s11 + $0xd0] ss:$8 sps:$4 sm:$0xff]  }
 0x2e9   : > { %1476 = vmatprep.subr.bf16.mxu1 %v3479_v19  ;;  %v3553_v19 = vld [vmem:[%s4831_s11 + $0xc4] ss:$8 sps:$4 sm:$0xff]  }
 0x2ec   : > { %1477 = vmatpush1.bf16.msra.mxu1 %v3477_v20  ;;  %v3551_v20 = vld [vmem:[%s4831_s11 + $0xc0] ss:$8 sps:$4 sm:$0xff]  }
 0x2ed   : > { %1478 = vmatprep.subr.bf16.mxu1 %v3482_v21  ;;  %v3556_v21 = vld [vmem:[%s4831_s11 + $0xb4] ss:$8 sps:$4 sm:$0xff]  }
 0x2f0   : > { %1479 = vmatpush1.bf16.msra.mxu1 %v3480_v22  ;;  %v3554_v22 = vld [vmem:[%s4831_s11 + $0xb0] ss:$8 sps:$4 sm:$0xff]  }
 0x2f1   : > { %1480 = vmatprep.subr.bf16.mxu1 %v3485_v23 }
 0x2f4   : > { %1481 = vmatpush1.bf16.msra.mxu1 %v3483_v24  ;;  %v3138_v24 = vld [vmem:[%s902_s23] sm:$0xff]  }
 0x2f5   : > { %1482 = vmatprep.subr.bf16.mxu1 %v3488_v25 }
 0x2f8   : > { %1483 = vmatpush1.bf16.msra.mxu1 %v3486_v26  ;;  %v2969_v26 = vld [vmem:[#allocation7] ss:$0 sm:$0xff] }
 0x2f9   : > { %1484 = vmatprep.subr.bf16.mxu1 %v3491_v27  ;;  %v3156_v27 = vld [vmem:[%s902_s23 + $0x8] sm:$0xff]  }
 0x2fc   : > { %1485 = vmatpush1.bf16.msra.mxu1 %v3489_v28  ;;  %v3139_v28 = vunpack.c.l.bf16 %v3138_v24 }
 0x2fd   : > { %1486 = vmatprep.subr.bf16.mxu1 %v3494_v29 }
 0x300   : > { %1487 = vmatpush2.bf16.msra.mxu1 %v3492_v30 }
 0x301   : > { %1488 = vmatprep.subr.bf16.mxu1 %v3497_v31 }
 0x304   : > { %1489 = vmatpush2.bf16.msra.mxu1 %v3495_v32  ;;  %v3144_v32 = vunpack.c.h.bf16 %v3156_v27 }
 0x305   : > { %1490 = vmatprep.subr.bf16.mxu1 %v3500_v33  ;;  %v3140_v33 = vunpack.c.h.bf16 %v3138_v24 }
 0x308   : > { %1491 = vmatpush2.bf16.msra.mxu1 %v3498_v34 }
 0x309   : > { %1492 = vmatprep.subr.bf16.mxu1 %v3503_v35 }
 0x30c   : > { %1493 = vmatpush2.bf16.msra.mxu1 %v3501_v36  ;;  %v3143_v36 = vunpack.c.l.bf16 %v3156_v27 }
 0x30d   : > { %1494 = vmatprep.subr.bf16.mxu1 %v3506_v37 }
 0x310   : > { %1495 = vmatpush2.bf16.msra.mxu1 %v3504_v38 }
 0x311   : > { %1496 = vmatprep.subr.bf16.mxu1 %v3509_v55  ;;  %v3569_v55 = vld [vmem:[%s4833_s13 + $0x60] ss:$8 sps:$4 sm:$0xff]  }
 0x314   : > { %1497 = vmatpush2.bf16.msra.mxu1 %v3507_v56  ;;  %v3574_v56 = vld [vmem:[%s4833_s13 + $0x54] ss:$8 sps:$4 sm:$0xff]  }
 0x315   : > { %1498 = vmatprep.subr.bf16.mxu1 %v3512_v57  ;;  %v3572_v57 = vld [vmem:[%s4833_s13 + $0x50] ss:$8 sps:$4 sm:$0xff]  }
 0x318   : > { %1499 = vmatpush2.bf16.msra.mxu1 %v3510_v58  ;;  %v3577_v58 = vld [vmem:[%s4833_s13 + $0x44] ss:$8 sps:$4 sm:$0xff]  }
 0x319   : > { %1500 = vmatprep.subr.bf16.mxu1 %v3515_v60  ;;  %v3580_v60 = vld [vmem:[%s4833_s13 + $0x34] ss:$8 sps:$4 sm:$0xff]  }
 0x31c   : > { %1501 = vmatpush2.bf16.msra.mxu1 %v3513_v59  ;;  %v3575_v59 = vld [vmem:[%s4833_s13 + $0x40] ss:$8 sps:$4 sm:$0xff]  }
 0x39f   : > { %v3242_v39 = vpop.f32.mrf.mxu1 }
 0x3a0   : > { %v1112_v52 = vmul.f32 %v3242_v39, %v3135_v46  ;;  %v3559_v46 = vld [vmem:[%s4831_s11 + $0xa4] ss:$8 sps:$4 sm:$0xff]  }
 0x3a1   : > { %v1087_v42 = vpop.f32.mrf.mxu1 }
 0x3a2   : > { %v1110_v50 = vmul.f32 %v3131_v44, %v1087_v42 }
 0x3a3   : > { %v3243_v47 = vpop.f32.mrf.mxu1 }
 0x3a4   : > { %v1113_v48 = vmul.f32 %v3243_v47, %v3136_v43  ;;  %v3557_v47 = vld [vmem:[%s4831_s11 + $0xa0] ss:$8 sps:$4 sm:$0xff]  }
 0x3a5   : > { %v1090_v49 = vpop.f32.mrf.mxu1 }
 0x3a6   : > { %v1111_v51 = vmul.f32 %v3132_v45, %v1090_v49  ;;  %v1115_v54 = vpack.c.bf16 %v1113_v48, %v1112_v52  ;;  %v3517_v45 = vld [vmem:[%s4520_s24 + $0x8] sm:$0xff]   ;;  %v3562_v48 = vld [vmem:[%s4831_s11 + $0x94] ss:$8 sps:$4 sm:$0xff]   ;;  %v3560_v49 = vld [vmem:[%s4831_s11 + $0x90] ss:$8 sps:$4 sm:$0xff]   ;;  %s908_s24 = scalar_lea.vmem %s4842_s22, %s4492_s26 }
 0x3a7   : > { %v3566_v52 = vld [vmem:[%s4833_s13 + $0x70] ss:$8 sps:$4 sm:$0xff]  }
 0x3a8   : > { %v1114_v53 = vpack.c.bf16 %v1111_v51, %v1110_v50  ;;  %v3565_v50 = vld [vmem:[%s4831_s11 + $0x84] ss:$8 sps:$4 sm:$0xff]   ;;  %v3563_v51 = vld [vmem:[%s4831_s11 + $0x80] ss:$8 sps:$4 sm:$0xff]  }
 0x3aa   : > { %3260 = vmatprep.mubr.bf16.mxu0 %v1114_v53  ;;  %v3568_v53 = vld [vmem:[%s4833_s13 + $0x74] ss:$8 sps:$4 sm:$0xff]  }
 0x3ab   : > { %3261 = vmatmul.mubr.bf16.vlgmr.msra.gmra.mxu0 %v1115_v54  ;;  %v3571_v54 = vld [vmem:[%s4833_s13 + $0x64] ss:$8 sps:$4 sm:$0xff]   ;;  %2000 = vmatprep.subr.bf16.mxu1 %v3568_v53 }
 0x3ac   : > { %1740 = vmatpush1.bf16.msra.mxu0 %v3518_v61  ;;  %v3578_v61 = vld [vmem:[%s4833_s13 + $0x30] ss:$8 sps:$4 sm:$0xff]   ;;  %v3613_v53 = vld [vmem:[%s4833_s13 + $0x84] ss:$8 sps:$4 sm:$0xff]  }
 0x3ad   : > { %1741 = vmatprep.subr.bf16.mxu0 %v3523_v63  ;;  %v3581_v63 = vld [vmem:[%s4833_s13 + $0x20] ss:$8 sps:$4 sm:$0xff]  }
 0x3b0   : > { %1742 = vmatpush1.bf16.msra.mxu0 %v3521_v0  ;;  %v3586_v0 = vld [vmem:[%s4833_s13 + $0x14] ss:$8 sps:$4 sm:$0xff]  }
 0x3b1   : > { %1743 = vmatprep.subr.bf16.mxu0 %v3526_v1  ;;  %v3584_v1 = vld [vmem:[%s4833_s13 + $0x10] ss:$8 sps:$4 sm:$0xff]  }
 0x3b4   : > { %1744 = vmatpush1.bf16.msra.mxu0 %v3524_v2  ;;  %v3589_v2 = vld [vmem:[%s4833_s13 + $0x4] ss:$8 sps:$4 sm:$0xff]  }
 0x3b5   : > { %1745 = vmatprep.subr.bf16.mxu0 %v3529_v3  ;;  %v3587_v3 = vld [vmem:[%s4833_s13] ss:$8 sps:$4 sm:$0xff]  }
 0x3b8   : > { %1746 = vmatpush1.bf16.msra.mxu0 %v3527_v4  ;;  %v3592_v4 = vld [vmem:[%s4833_s13 + $0xf4] ss:$8 sps:$4 sm:$0xff]  }
 0x3b9   : > { %1747 = vmatprep.subr.bf16.mxu0 %v3532_v5  ;;  %v3590_v5 = vld [vmem:[%s4833_s13 + $0xf0] ss:$8 sps:$4 sm:$0xff]  }
 0x3bc   : > { %1748 = vmatpush1.bf16.msra.mxu0 %v3530_v6  ;;  %v3595_v6 = vld [vmem:[%s4833_s13 + $0xe4] ss:$8 sps:$4 sm:$0xff]  }
 0x3bd   : > { %1749 = vmatprep.subr.bf16.mxu0 %v3535_v7  ;;  %v3593_v7 = vld [vmem:[%s4833_s13 + $0xe0] ss:$8 sps:$4 sm:$0xff]  }
 0x3c0   : > { %1750 = vmatpush1.bf16.msra.mxu0 %v3533_v8  ;;  %v3598_v8 = vld [vmem:[%s4833_s13 + $0xd4] ss:$8 sps:$4 sm:$0xff]  }
 0x3c1   : > { %1751 = vmatprep.subr.bf16.mxu0 %v3538_v9  ;;  %v3596_v9 = vld [vmem:[%s4833_s13 + $0xd0] ss:$8 sps:$4 sm:$0xff]  }
 0x3c4   : > { %1752 = vmatpush1.bf16.msra.mxu0 %v3536_v10  ;;  %v3601_v10 = vld [vmem:[%s4833_s13 + $0xc4] ss:$8 sps:$4 sm:$0xff]  }
 0x3c5   : > { %1753 = vmatprep.subr.bf16.mxu0 %v3541_v11  ;;  %v3599_v11 = vld [vmem:[%s4833_s13 + $0xc0] ss:$8 sps:$4 sm:$0xff]  }
 0x3c8   : > { %1754 = vmatpush1.bf16.msra.mxu0 %v3539_v12  ;;  %v3604_v12 = vld [vmem:[%s4833_s13 + $0xb4] ss:$8 sps:$4 sm:$0xff]  }
 0x3c9   : > { %1755 = vmatprep.subr.bf16.mxu0 %v3544_v13  ;;  %v3602_v13 = vld [vmem:[%s4833_s13 + $0xb0] ss:$8 sps:$4 sm:$0xff]  }
 0x3cc   : > { %1756 = vmatpush2.bf16.msra.mxu0 %v3542_v14  ;;  %v1300_v14 = vlaneseq }
 0x3cd   : > { %1757 = vmatprep.subr.bf16.mxu0 %v3547_v15 }
 0x3ce   : > { %v1301_v15 = vshrl.u32 %v1300_v14, 7 }
 0x3d0   : > { %1758 = vmatpush2.bf16.msra.mxu0 %v3545_v16  ;;  %v4702_v16 = vsub.s32 1, %v1301_v15 }
 0x3d1   : > { %1759 = vmatprep.subr.bf16.mxu0 %v3550_v17  ;;  %v4704_v17 = vsub.s32 0, %v1301_v15 }
 0x3d4   : > { %1760 = vmatpush2.bf16.msra.mxu0 %v3548_v18  ;;  %v1298_v18 = vld [vmem:[#allocation9] sm:$0x3] }
 0x3d5   : > { %1761 = vmatprep.subr.bf16.mxu0 %v3553_v19 }
 0x3d8   : > { %1762 = vmatpush2.bf16.msra.mxu0 %v3551_v20  ;;  %v1307_v20 = vrot.slane %v1298_v18, %v4702_v16 }
 0x3d9   : > { %1763 = vmatprep.subr.bf16.mxu0 %v3556_v21  ;;  %v1303_v21 = vrot.slane %v1298_v18, %v4704_v17 }
 0x3dc   : > { %1764 = vmatpush2.bf16.msra.mxu0 %v3554_v22 }
 0x3dd   : > { %1765 = vmatprep.subr.bf16.mxu0 %v3559_v46 }
 0x3e0   : > { %1766 = vmatpush2.bf16.msra.mxu0 %v3557_v47 }
 0x3e1   : > { %1767 = vmatprep.subr.bf16.mxu0 %v3562_v48 }
 0x3e4   : > { %1768 = vmatpush2.bf16.msra.mxu0 %v3560_v49  ;;  %v3607_v49 = vld [vmem:[%s4833_s13 + $0xa4] ss:$8 sps:$4 sm:$0xff]  }
 0x3e5   : > { %1769 = vmatprep.subr.bf16.mxu0 %v3565_v50  ;;  %v3605_v50 = vld [vmem:[%s4833_s13 + $0xa0] ss:$8 sps:$4 sm:$0xff]  }
 0x3e8   : > { %1770 = vmatpush2.bf16.msra.mxu0 %v3563_v51  ;;  %v3610_v51 = vld [vmem:[%s4833_s13 + $0x94] ss:$8 sps:$4 sm:$0xff]  }
 0x46b   : > { %v3262_v23 = vpop.f32.mrf.mxu0 }
 0x46c   : > { %v1230_v35 = vadd.f32 %v3262_v23, %v2969_v26 }
 0x46d   : > { %v1221_v25 = vpop.f32.mrf.mxu0 }
 0x46e   : > { %v1222_v30 = vadd.f32 %v2969_v26, %v1221_v25  ;;  %v1246_v42 = vadd.f32 %v3143_v36, %v1230_v35 }
 0x46f   : > { %v3263_v29 = vpop.f32.mrf.mxu0 }
 0x470   : > { %v1233_v31 = vadd.f32 %v3263_v29, %v2969_v26  ;;  %v1244_v38 = vadd.f32 %v3139_v28, %v1222_v30 }
 0x471   : > { %v1224_v34 = vpop.f32.mrf.mxu0 }
 0x472   : > { %v1225_v37 = vadd.f32 %v2969_v26, %v1224_v34  ;;  %v1247_v39 = vadd.f32 %v3144_v32, %v1233_v31 }
 0x474   : > { %v1245_v40 = vadd.f32 %v3140_v33, %v1225_v37  ;;  %v1253_v44 = vpack.c.bf16 %v1247_v39, %v1246_v42 }
 0x476   : > { %v1252_v43 = vpack.c.bf16 %v1245_v40, %v1244_v38 }
 0x478   : > { %1502 = vmatprep.mubr.bf16.mxu1 %v1252_v43 }
 0x479   : > { %1503 = vmatmul.mubr.bf16.vlgmr.msra.gmra.mxu1 %v3516_v41 }
 0x47a   : > { %1512 = vmatprep.mubr.bf16.mxu1 %v1253_v44  ;;  %2001 = vmatpush1.bf16.msra.mxu1 %v3566_v52  ;;  %v3608_v52 = vld [vmem:[%s4833_s13 + $0x90] ss:$8 sps:$4 sm:$0xff]  }
 0x47b   : > { %2002 = vmatprep.subr.bf16.mxu1 %v3571_v54  ;;  %v3611_v54 = vld [vmem:[%s4833_s13 + $0x80] ss:$8 sps:$4 sm:$0xff]  }
 0x47e   : > { %2003 = vmatpush1.bf16.msra.mxu1 %v3569_v55  ;;  %v3614_v55 = vld [vmem:[%s4835_s15 + $0x78] sm:$0xff]  }
 0x47f   : > { %2004 = vmatprep.subr.bf16.mxu1 %v3574_v56  ;;  %v3615_v56 = vld [vmem:[%s4835_s15 + $0x38] sm:$0xff]   ;;  %3174 = vmatprep.subr.bf16.mxu0 %v3614_v55 }
 0x481   : > { %1513 = vmatmul.mubr.bf16.gmra.mxu1 %v3517_v45 }
 0x482   : > { %2005 = vmatpush1.bf16.msra.mxu1 %v3572_v57  ;;  %v3616_v57 = vld [vmem:[%s4835_s15 + $0x70] sm:$0xff]  }
 0x483   : > { %2006 = vmatprep.subr.bf16.mxu1 %v3577_v58  ;;  %v3617_v58 = vld [vmem:[%s4835_s15 + $0x30] sm:$0xff]  }
 0x486   : > { %2007 = vmatpush1.bf16.msra.mxu1 %v3575_v59 }
 0x487   : > { %2008 = vmatprep.subr.bf16.mxu1 %v3580_v60  ;;  %v1567_v60 = vld [vmem:[#allocation10] sm:$0x3] }
 0x48a   : > { %2009 = vmatpush1.bf16.msra.mxu1 %v3578_v61 }
 0x48b   : > { %2010 = vmatprep.subr.bf16.mxu1 %v3583_v62  ;;  %v1576_v62 = vrot.slane %v1567_v60, %v4702_v16 }
 0x48e   : > { %2011 = vmatpush1.bf16.msra.mxu1 %v3581_v63  ;;  %v1572_v63 = vrot.slane %v1567_v60, %v4704_v17 }
 0x48f   : > { %2012 = vmatprep.subr.bf16.mxu1 %v3586_v0 }
 0x492   : > { %2013 = vmatpush1.bf16.msra.mxu1 %v3584_v1 }
 0x493   : > { %2014 = vmatprep.subr.bf16.mxu1 %v3589_v2 }
 0x496   : > { %2015 = vmatpush1.bf16.msra.mxu1 %v3587_v3 }
 0x497   : > { %2016 = vmatprep.subr.bf16.mxu1 %v3592_v4 }
 0x49a   : > { %2017 = vmatpush2.bf16.msra.mxu1 %v3590_v5 }
 0x49b   : > { %2018 = vmatprep.subr.bf16.mxu1 %v3595_v6 }
 0x49e   : > { %2019 = vmatpush2.bf16.msra.mxu1 %v3593_v7 }
 0x49f   : > { %2020 = vmatprep.subr.bf16.mxu1 %v3598_v8 }
 0x4a2   : > { %2021 = vmatpush2.bf16.msra.mxu1 %v3596_v9 }
 0x4a3   : > { %2022 = vmatprep.subr.bf16.mxu1 %v3601_v10 }
 0x4a6   : > { %2023 = vmatpush2.bf16.msra.mxu1 %v3599_v11 }
 0x4a7   : > { %2024 = vmatprep.subr.bf16.mxu1 %v3604_v12 }
 0x4aa   : > { %2025 = vmatpush2.bf16.msra.mxu1 %v3602_v13 }
 0x4ab   : > { %2026 = vmatprep.subr.bf16.mxu1 %v3607_v49 }
 0x4ae   : > { %2027 = vmatpush2.bf16.msra.mxu1 %v3605_v50 }
 0x4af   : > { %2028 = vmatprep.subr.bf16.mxu1 %v3610_v51 }
 0x4b2   : > { %2029 = vmatpush2.bf16.msra.mxu1 %v3608_v52 }
 0x4b3   : > { %2030 = vmatprep.subr.bf16.mxu1 %v3613_v53 }
 0x4b6   : > { %2031 = vmatpush2.bf16.msra.mxu1 %v3611_v54 }
 0x539   : > { %v1504_v19 = vpop.f32.mrf.mxu1 }
 0x53a   : > { %v1505_v26 = vadd.f32 %v1504_v19, %v1303_v21 }
 0x53b   : > { %v1506_v22 = vpop.f32.mrf.mxu1 }
 0x53c   : > { %v1507_v24 = vadd.f32 %v1506_v22, %v1307_v20  ;;  %v1523_v33 = vmax.f32 %v1505_v26, 0.0  ;;  %v3620_v22 = vld [vmem:[%s4835_s15 + $0x60] sm:$0xff]   ;;  %v3624_v26 = vld [vmem:[%s4835_s15 + $0x50] sm:$0xff]  }
 0x53d   : > { %v1508_v23 = vpop.f32.mrf.mxu1 }
 0x53e   : > { %v1509_v25 = vadd.f32 %v1508_v23, %v1303_v21  ;;  %v1524_v31 = vmax.f32 %v1507_v24, 0.0  ;;  %v3621_v23 = vld [vmem:[%s4835_s15 + $0x20] sm:$0xff]   ;;  %v3622_v24 = vld [vmem:[%s4835_s15 + $0x58] sm:$0xff]  }
 0x53f   : > { %v1510_v27 = vpop.f32.mrf.mxu1 }
 0x540   : > { %v1511_v28 = vadd.f32 %v1510_v27, %v1307_v20  ;;  %v1525_v29 = vmax.f32 %v1509_v25, 0.0  ;;  %v3623_v25 = vld [vmem:[%s4835_s15 + $0x18] sm:$0xff]   ;;  %v3625_v27 = vld [vmem:[%s4835_s15 + $0x10] sm:$0xff]  }
 0x541   : > { %v1514_v30 = vpop.f32.mrf.mxu1 }
 0x542   : > { %v1526_v32 = vmax.f32 %v1511_v28, 0.0  ;;  %v1515_v34 = vadd.f32 %v1514_v30, %v1303_v21  ;;  %v1531_v38 = vpack.c.bf16 %v1525_v29, %v1523_v33  ;;  %v3626_v28 = vld [vmem:[%s4835_s15 + $0x48] sm:$0xff]   ;;  %v3628_v30 = vld [vmem:[%s4835_s15 + $0x40] sm:$0xff]  }
 0x543   : > { %v1516_v35 = vpop.f32.mrf.mxu1  ;;  %v3627_v29 = vld [vmem:[%s4835_s15 + $0x8] sm:$0xff]  }
 0x544   : > { %v1532_v36 = vpack.c.bf16 %v1526_v32, %v1524_v31  ;;  %v1517_v37 = vadd.f32 %v1516_v35, %v1307_v20  ;;  %v1527_v41 = vmax.f32 %v1515_v34, 0.0  ;;  %v3629_v31 = vld [vmem:[%s4835_s15] sm:$0xff]   ;;  %v1828_v32 = vld [vmem:[#allocation12] sm:$0x3] }
 0x545   : > { %v1518_v39 = vpop.f32.mrf.mxu1  ;;  %v1837_v33 = vrot.slane %v1828_v32, %v4702_v16  ;;  %v1833_v35 = vrot.slane %v1828_v32, %v4704_v17 }
 0x546   : > { %v1519_v40 = vadd.f32 %v1518_v39, %v1303_v21  ;;  %1771 = vmatprep.mubr.bf16.mxu0 %v1532_v36  ;;  %v1528_v43 = vmax.f32 %v1517_v37, 0.0  ;;  %v3619_v21 = vld [vmem:[%s4835_s15 + $0x28] sm:$0xff]  }
 0x547   : > { %v1520_v42 = vpop.f32.mrf.mxu1  ;;  %1772 = vmatmul.mubr.bf16.vlgmr.msra.gmra.mxu0 %v1531_v38 }
 0x548   : > { %v1529_v44 = vmax.f32 %v1519_v40, 0.0  ;;  %v1521_v45 = vadd.f32 %v1520_v42, %v1307_v20  ;;  %3175 = vmatpush3.bf16.msra.mxu0 %v3615_v56  ;;  %v3618_v20 = vld [vmem:[%s4835_s15 + $0x68] sm:$0xff]  }
 0x549   : > { %3176 = vmatprep.subr.bf16.mxu0 %v3616_v57 }
 0x54a   : > { %v1530_v46 = vmax.f32 %v1521_v45, 0.0  ;;  %v1533_v47 = vpack.c.bf16 %v1529_v44, %v1527_v41 }
 0x54c   : > { %v1534_v48 = vpack.c.bf16 %v1530_v46, %v1528_v43  ;;  %3177 = vmatpush3.bf16.msra.mxu0 %v3617_v58 }
 0x54d   : > { %3178 = vmatprep.subr.bf16.mxu0 %v3618_v20 }
 0x54e   : > { %1781 = vmatprep.mubr.bf16.mxu0 %v1534_v48 }
 0x54f   : > { %1782 = vmatmul.mubr.bf16.gmra.mxu0 %v1533_v47 }
 0x550   : > { %3179 = vmatpush3.bf16.msra.mxu0 %v3619_v21 }
 0x551   : > { %3180 = vmatprep.subr.bf16.mxu0 %v3620_v22 }
 0x554   : > { %3181 = vmatpush3.bf16.msra.mxu0 %v3621_v23 }
 0x555   : > { %3182 = vmatprep.subr.bf16.mxu0 %v3622_v24 }
 0x558   : > { %3183 = vmatpush3.bf16.msra.mxu0 %v3623_v25 }
 0x559   : > { %3184 = vmatprep.subr.bf16.mxu0 %v3624_v26 }
 0x55c   : > { %3185 = vmatpush3.bf16.msra.mxu0 %v3625_v27 }
 0x55d   : > { %3186 = vmatprep.subr.bf16.mxu0 %v3626_v28 }
 0x560   : > { %3187 = vmatpush3.bf16.msra.mxu0 %v3627_v29 }
 0x561   : > { %3188 = vmatprep.subr.bf16.mxu0 %v3628_v30 }
 0x564   : > { %3189 = vmatpush3.bf16.msra.mxu0 %v3629_v31 }
 0x607   : > { %v1773_v59 = vpop.f32.mrf.mxu0 }
 0x608   : > { %v4746_v5 = vadd.f32 %v1773_v59, %v1572_v63 }
 0x609   : > { %v1775_v61 = vpop.f32.mrf.mxu0 }
 0x60a   : > { %v4742_v3 = vadd.f32 %v1775_v61, %v1576_v62  ;;  %v4072_v61 = vmov 0  }
 0x60b   : > { %v1777_v0 = vpop.f32.mrf.mxu0  ;;  %3458 = vset.pattern.permute.xlu0 %v4072_v61  ;;  %3459 = vset.pattern.permute.xlu1 %v4072_v61 }
 0x60c   : > { %v4740_v1 = vadd.f32 %v1777_v0, %v1572_v63 }
 0x60d   : > { %v1779_v2 = vpop.f32.mrf.mxu0 }
 0x60e   : > { %v4744_v4 = vadd.f32 %v1779_v2, %v1576_v62  ;;  %v1792_v8 = vpack.c.bf16 %v4740_v1, %v4746_v5 }
 0x60f   : > { %v1783_v6 = vpop.f32.mrf.mxu0 }
 0x610   : > { %v1793_v7 = vpack.c.bf16 %v4744_v4, %v4742_v3  ;;  %v4758_v15 = vadd.f32 %v1783_v6, %v1572_v63 }
 0x611   : > { %v1785_v9 = vpop.f32.mrf.mxu0 }
 0x612   : > { %2032 = vmatprep.mubr.bf16.mxu1 %v1793_v7  ;;  %v4754_v13 = vadd.f32 %v1785_v9, %v1576_v62 }
 0x613   : > { %v1787_v10 = vpop.f32.mrf.mxu0  ;;  %2033 = vmatmul.mubr.bf16.vlgmr.msra.gmra.mxu1 %v1792_v8 }
 0x614   : > { %v4752_v11 = vadd.f32 %v1787_v10, %v1572_v63 }
 0x615   : > { %v1789_v12 = vpop.f32.mrf.mxu0 }
 0x616   : > { %v4756_v14 = vadd.f32 %v1789_v12, %v1576_v62  ;;  %v1794_v19 = vpack.c.bf16 %v4752_v11, %v4758_v15 }
 0x618   : > { %v1795_v18 = vpack.c.bf16 %v4756_v14, %v4754_v13 }
 0x61a   : > { %2042 = vmatprep.mubr.bf16.mxu1 %v1795_v18 }
 0x61b   : > { %2043 = vmatmul.mubr.bf16.gmra.mxu1 %v1794_v19 }
 0x6d3   : > { %v2034_v34 = vpop.f32.mrf.mxu1 }
 0x6d4   : > { %v2035_v40 = vadd.f32 %v2034_v34, %v1833_v35 }
 0x6d5   : > { %v2036_v36 = vpop.f32.mrf.mxu1 }
 0x6d6   : > { %v2037_v37 = vadd.f32 %v2036_v36, %v1837_v33  ;;  %v3631_v36 = vld [vmem:[#allocation13 + $0x30] sm:$0xff]  }
 0x6d7   : > { %v2038_v38 = vpop.f32.mrf.mxu1 }
 0x6d8   : > { %v2039_v39 = vadd.f32 %v2038_v38, %v1833_v35  ;;  %3678 = vtanh.f32 %v2037_v37 }
 0x6d9   : > { %v2040_v41 = vpop.f32.mrf.mxu1 }
 0x6da   : > { %v2041_v42 = vadd.f32 %v2040_v41, %v1837_v33  ;;  %3680 = vtanh.f32 %v2039_v39  ;;  %v3632_v39 = vld [vmem:[#allocation13 + $0x28] sm:$0xff]  }
 0x6db   : > { %v2044_v43 = vpop.f32.mrf.mxu1 }
 0x6dc   : > { %3682 = vtanh.f32 %v2041_v42  ;;  %v2045_v16 = vadd.f32 %v2044_v43, %v1833_v35  ;;  %v3633_v42 = vld [vmem:[#allocation13 + $0x20] sm:$0xff]  }
 0x6dd   : > { %3684 = vtanh.f32 %v2035_v40  ;;  %v2046_v44 = vpop.f32.mrf.mxu1 }
 0x6de   : > { %v2047_v45 = vadd.f32 %v2046_v44, %v1837_v33  ;;  %v3634_v44 = vld [vmem:[#allocation13 + $0x18] sm:$0xff]  }
 0x6df   : > { %v2048_v46 = vpop.f32.mrf.mxu1 }
 0x6e0   : > { %v2049_v47 = vadd.f32 %v2048_v46, %v1833_v35  ;;  %3686 = vtanh.f32 %v2047_v45  ;;  %v3635_v46 = vld [vmem:[#allocation13 + $0x10] sm:$0xff]  }
 0x6e1   : > { %v2050_v48 = vpop.f32.mrf.mxu1 }
 0x6e2   : > { %v2051_v17 = vadd.f32 %v2050_v48, %v1837_v33  ;;  %3688 = vtanh.f32 %v2049_v47  ;;  %v3630_v33 = vld [vmem:[#allocation13 + $0x38] sm:$0xff]  }
 0x6e3   : > { %3264 = vmatprep.subr.bf16.mxu0 %v3630_v33 }
 0x6e4   : > { %3690 = vtanh.f32 %v2051_v17  ;;  %v3637_v17 = vld [vmem:[#allocation13] sm:$0xff]  }
 0x6e5   : > { %3692 = vtanh.f32 %v2045_v16  ;;  %v3679_v49 = vpop.eup %3678  ;;  %v3636_v16 = vld [vmem:[#allocation13 + $0x8] sm:$0xff]  }
 0x6e7   : > { %v3681_v50 = vpop.eup %3680 }
 0x6e9   : > { %v3683_v51 = vpop.eup %3682 }
 0x6ea   : > { %v3685_v52 = vpop.eup %3684  ;;  %v2062_v53 = vpack.c.bf16 %v3683_v51, %v3679_v49  ;;  %v3639_v51 = vld [vmem:[#allocation16 + $0x30] sm:$0xff]  }
 0x6eb   : > { %v2061_v54 = vpack.c.bf16 %v3681_v50, %v3685_v52  ;;  %v3638_v50 = vld [vmem:[#allocation16 + $0x38] sm:$0xff]   ;;  %v3640_v52 = vld [vmem:[#allocation16 + $0x28] sm:$0xff]  }
 0x6ec   : > { %2225 = vmatprep.mubr.bf16.mxu0 %v2062_v53  ;;  %3284 = vmatprep.subr.bf16.mxu1 %v3638_v50  ;;  %v3641_v53 = vld [vmem:[#allocation16 + $0x20] sm:$0xff]  }
 0x6ed   : > { %2226 = vmatmul.mubr.bf16.vlgmr.msra.gmra.mxu0 %v2061_v54  ;;  %v3687_v55 = vpop.eup %3686  ;;  %3285 = vmatpush3.bf16.msra.mxu1 %v3638_v50  ;;  %v3642_v54 = vld [vmem:[#allocation16 + $0x18] sm:$0xff]  }
 0x6ee   : > { %3265 = vmatpush3.bf16.msra.mxu0 %v3630_v33  ;;  %3286 = vmatprep.subr.bf16.mxu1 %v3639_v51 }
 0x6ef   : > { %v3689_v56 = vpop.eup %3688  ;;  %3266 = vmatprep.subr.bf16.mxu0 %v3631_v36 }
 0x6f1   : > { %v3691_v57 = vpop.eup %3690  ;;  %3287 = vmatpush3.bf16.msra.mxu1 %v3639_v51 }
 0x6f2   : > { %v3693_v58 = vpop.eup %3692  ;;  %v2064_v59 = vpack.c.bf16 %v3691_v57, %v3687_v55  ;;  %3267 = vmatpush3.bf16.msra.mxu0 %v3631_v36  ;;  %3288 = vmatprep.subr.bf16.mxu1 %v3640_v52 }
 0x6f3   : > { %v2063_v60 = vpack.c.bf16 %v3689_v56, %v3693_v58  ;;  %3268 = vmatprep.subr.bf16.mxu0 %v3632_v39 }
 0x6f4   : > { %2233 = vmatprep.mubr.bf16.mxu0 %v2064_v59 }
 0x6f5   : > { %2234 = vmatmul.mubr.bf16.gmra.mxu0 %v2063_v60  ;;  %3289 = vmatpush3.bf16.msra.mxu1 %v3640_v52 }
 0x6f6   : > { %3269 = vmatpush3.bf16.msra.mxu0 %v3632_v39  ;;  %3290 = vmatprep.subr.bf16.mxu1 %v3641_v53  ;;  %v3652_v39 = vld [vmem:[#allocation19 + $0x8] sm:$0xff]  }
 0x6f7   : > { %3270 = vmatprep.subr.bf16.mxu0 %v3633_v42 }
 0x6f9   : > { %3291 = vmatpush3.bf16.msra.mxu1 %v3641_v53 }
 0x6fa   : > { %3271 = vmatpush3.bf16.msra.mxu0 %v3633_v42  ;;  %3292 = vmatprep.subr.bf16.mxu1 %v3642_v54 }
 0x6fb   : > { %3272 = vmatprep.subr.bf16.mxu0 %v3634_v44 }
 0x6fd   : > { %3293 = vmatpush3.bf16.msra.mxu1 %v3642_v54 }
 0x6fe   : > { %3273 = vmatpush3.bf16.msra.mxu0 %v3634_v44 }
 0x6ff   : > { %3274 = vmatprep.subr.bf16.mxu0 %v3635_v46 }
 0x702   : > { %3275 = vmatpush3.bf16.msra.mxu0 %v3635_v46 }
 0x703   : > { %3276 = vmatprep.subr.bf16.mxu0 %v3636_v16 }
 0x706   : > { %3277 = vmatpush3.bf16.msra.mxu0 %v3636_v16 }
 0x707   : > { %3278 = vmatprep.subr.bf16.mxu0 %v3637_v17 }
 0x70a   : > { %3279 = vmatpush3.bf16.msra.mxu0 %v3637_v17 }
 0x7ad   : > { %v3190_v62 = vpop.f32.mrf.mxu0 }
 0x7af   : > { %v3191_v63 = vpop.f32.mrf.mxu0 }
 0x7b0   : > { %v3192_v0 = vadd.f32 %v3191_v63, %v3190_v62 }
 0x7b1   : > { %v3193_v2 = vpop.f32.mrf.mxu0 }
 0x7b2   : > { %v2242_v6 = vsub.f32 0.0, %v3192_v0 }
 0x7b3   : > { %v3194_v7 = vpop.f32.mrf.mxu0 }
 0x7b4   : > { %v2246_v8 = vmul.f32 1.442695, %v2242_v6  ;;  %v3195_v9 = vadd.f32 %v3194_v7, %v3193_v2 }
 0x7b5   : > { %v3196_v10 = vpop.f32.mrf.mxu0 }
 0x7b6   : > { %3694 = vpow2.f32 %v2246_v8  ;;  %v2243_v12 = vsub.f32 0.0, %v3195_v9 }
 0x7b7   : > { %v3197_v18 = vpop.f32.mrf.mxu0 }
 0x7b8   : > { %v2248_v19 = vmul.f32 1.442695, %v2243_v12  ;;  %v3198_v20 = vadd.f32 %v3197_v18, %v3196_v10 }
 0x7b9   : > { %v3199_v21 = vpop.f32.mrf.mxu0 }
 0x7ba   : > { %3696 = vpow2.f32 %v2248_v19  ;;  %v2244_v22 = vsub.f32 0.0, %v3198_v20  ;;  %v3644_v20 = vld [vmem:[#allocation16 + $0x8] sm:$0xff]  }
 0x7bb   : > { %v3200_v23 = vpop.f32.mrf.mxu0 }
 0x7bc   : > { %v2250_v24 = vmul.f32 1.442695, %v2244_v22  ;;  %v3201_v25 = vadd.f32 %v3200_v23, %v3199_v21  ;;  %v3645_v21 = vld [vmem:[#allocation16] sm:$0xff]   ;;  %v3647_v22 = vld [vmem:[#allocation19 + $0x30] sm:$0xff]  }
 0x7be   : > { %3698 = vpow2.f32 %v2250_v24  ;;  %v2245_v26 = vsub.f32 0.0, %v3201_v25  ;;  %v3092_v25 = vld [vmem:[#allocation15] ss:$0 sm:$0xff] }
 0x7c0   : > { %v2252_v29 = vmul.f32 1.442695, %v2245_v26 }
 0x7c3   : > { %v3695_v27 = vpop.eup %3694 }
 0x7c4   : > { %v2254_v28 = vadd.f32 1.0, %v3695_v27 }
 0x7c6   : > { %3700 = vrcp.f32 %v2254_v28 }
 0x7c7   : > { %v3697_v30 = vpop.eup %3696  ;;  %3702 = vpow2.f32 %v2252_v29 }
 0x7c8   : > { %v2255_v31 = vadd.f32 1.0, %v3697_v30 }
 0x7ca   : > { %3704 = vrcp.f32 %v2255_v31 }
 0x7cb   : > { %v3699_v32 = vpop.eup %3698 }
 0x7cc   : > { %v2256_v34 = vadd.f32 1.0, %v3699_v32 }
 0x7ce   : > { %3706 = vrcp.f32 %v2256_v34 }
 0x7d3   : > { %v3701_v35 = vpop.eup %3700 }
 0x7d4   : > { %2268 = vperm.xlu0 %3458, %v3701_v35   ;;  %v2290_v37 = vsub.f32 1.0, %v3701_v35  ;;  %v3703_v38 = vpop.eup %3702 }
 0x7d5   : > { %v2257_v40 = vadd.f32 1.0, %v3703_v38  ;;  %v3651_v38 = vld [vmem:[#allocation19 + $0x10] sm:$0xff]  }
 0x7d6   : > { %2296 = vperm.xlu1 %3459, %v2290_v37  }
 0x7d7   : > { %v3705_v41 = vpop.eup %3704  ;;  %3708 = vrcp.f32 %v2257_v40  ;;  %v3653_v40 = vld [vmem:[#allocation19] sm:$0xff]  }
 0x7d8   : > { %v2291_v43 = vsub.f32 1.0, %v3705_v41 }
 0x7da   : > { %2273 = vperm.xlu1 %3459, %v3705_v41  }
 0x7db   : > { %v3707_v45 = vpop.eup %3706 }
 0x7dc   : > { %v2292_v47 = vsub.f32 1.0, %v3707_v45 }
 0x7de   : > { %2301 = vperm.xlu1 %3459, %v2291_v43   ;;  %v3101_v43 = vld [vmem:[#allocation18] ss:$0 sm:$0xff] }
 0x7e2   : > { %2278 = vperm.xlu1 %3459, %v3707_v45  }
 0x7e4   : > { %v3709_v48 = vpop.eup %3708 }
 0x7e5   : > { %v2293_v49 = vsub.f32 1.0, %v3709_v48 }
 0x7e6   : > { %2306 = vperm.xlu1 %3459, %v2292_v47  }
 0x7ea   : > { %2283 = vperm.xlu1 %3459, %v3709_v48  }
 0x7ee   : > { %2311 = vperm.xlu1 %3459, %v2293_v49  }
 0x84f   : > { %v2269_v57 = vpop.permute.xlu0 %2268 }
 0x850   : > { %v2286_v60 = vmul.f32 %v2269_v57, %v4746_v5  ;;  %v3110_v57 = vld [vmem:[%s4841_s21] ss:$0 sm:$0xff] }
 0x851   : > { %v2297_v55 = vpop.permute.xlu1 %2296 }
 0x852   : > { %v2314_v58 = vmul.f32 %v2297_v55, %v4742_v3 }
 0x854   : > { %v2318_v63 = vadd.f32 %v2314_v58, %v2286_v60 }
 0x855   : > { %v2274_v56 = vpop.permute.xlu1 %2273 }
 0x856   : > { %v2287_v61 = vmul.f32 %v2274_v56, %v4740_v1 }
 0x859   : > { %v2302_v59 = vpop.permute.xlu1 %2301 }
 0x85a   : > { %v2315_v62 = vmul.f32 %v2302_v59, %v4744_v4  ;;  %v3643_v4 = vld [vmem:[#allocation16 + $0x10] sm:$0xff]  }
 0x85b   : > { %3294 = vmatprep.subr.bf16.mxu1 %v3643_v4 }
 0x85c   : > { %v2319_v0 = vadd.f32 %v2315_v62, %v2287_v61  ;;  %3295 = vmatpush3.bf16.msra.mxu1 %v3643_v4 }
 0x85d   : > { %v2279_v2 = vpop.permute.xlu1 %2278  ;;  %3296 = vmatprep.subr.bf16.mxu1 %v3644_v20 }
 0x85e   : > { %v2322_v6 = vpack.c.bf16 %v2319_v0, %v2318_v63  ;;  %v2288_v12 = vmul.f32 %v2279_v2, %v4758_v15  ;;  %v3650_v15 = vld [vmem:[#allocation19 + $0x18] sm:$0xff]  }
 0x860   : > { %3280 = vmatprep.mubr.bf16.mxu0 %v2322_v6  ;;  %3297 = vmatpush3.bf16.msra.mxu1 %v3644_v20 }
 0x861   : > { %v2307_v7 = vpop.permute.xlu1 %2306  ;;  %3298 = vmatprep.subr.bf16.mxu1 %v3645_v21 }
 0x862   : > { %v2316_v9 = vmul.f32 %v2307_v7, %v4754_v13  ;;  %v3646_v13 = vld [vmem:[#allocation19 + $0x38] sm:$0xff]  }
 0x863   : > { %3304 = vmatprep.subr.bf16.mxu0 %v3646_v13 }
 0x864   : > { %v2320_v18 = vadd.f32 %v2316_v9, %v2288_v12  ;;  %3299 = vmatpush3.bf16.msra.mxu1 %v3645_v21 }
 0x865   : > { %v2284_v8 = vpop.permute.xlu1 %2283 }
 0x866   : > { %v2289_v3 = vmul.f32 %v2284_v8, %v4752_v11  ;;  %v3648_v11 = vld [vmem:[#allocation19 + $0x28] sm:$0xff]  }
 0x869   : > { %v2312_v10 = vpop.permute.xlu1 %2311 }
 0x86a   : > { %v2317_v5 = vmul.f32 %v2312_v10, %v4756_v14  ;;  %v3649_v14 = vld [vmem:[#allocation19 + $0x20] sm:$0xff]  }
 0x86c   : > { %v2321_v1 = vadd.f32 %v2317_v5, %v2289_v3 }
 0x86e   : > { %v2323_v19 = vpack.c.bf16 %v2321_v1, %v2320_v18 }
 0x870   : > { %3281 = vmatmul.mubr.bf16.vlgmr.msra.gmra.mxu0 %v2323_v19 }
 0x871   : > { %3305 = vmatpush3.bf16.msra.mxu0 %v3646_v13 }
 0x872   : > { %3306 = vmatprep.subr.bf16.mxu0 %v3647_v22 }
 0x875   : > { %3307 = vmatpush3.bf16.msra.mxu0 %v3647_v22 }
 0x876   : > { %3308 = vmatprep.subr.bf16.mxu0 %v3648_v11 }
 0x879   : > { %3309 = vmatpush3.bf16.msra.mxu0 %v3648_v11 }
 0x87a   : > { %3310 = vmatprep.subr.bf16.mxu0 %v3649_v14 }
 0x87d   : > { %3311 = vmatpush3.bf16.msra.mxu0 %v3649_v14 }
 0x87e   : > { %3312 = vmatprep.subr.bf16.mxu0 %v3650_v15 }
 0x881   : > { %3313 = vmatpush3.bf16.msra.mxu0 %v3650_v15 }
 0x882   : > { %3314 = vmatprep.subr.bf16.mxu0 %v3651_v38 }
 0x885   : > { %3315 = vmatpush3.bf16.msra.mxu0 %v3651_v38 }
 0x886   : > { %3316 = vmatprep.subr.bf16.mxu0 %v3652_v39 }
 0x889   : > { %3317 = vmatpush3.bf16.msra.mxu0 %v3652_v39 }
 0x88a   : > { %3318 = vmatprep.subr.bf16.mxu0 %v3653_v40 }
 0x88d   : > { %3319 = vmatpush3.bf16.msra.mxu0 %v3653_v40 }
 0x930   : > { %v3282_v23 = vpop.f32.mrf.mxu0 }
 0x931   : > { %v2438_v29 = vadd.f32 %v3282_v23, %v3092_v25 }
 0x932   : > { %v2429_v24 = vpop.f32.mrf.mxu0 }
 0x933   : > { %v2430_v27 = vadd.f32 %v3092_v25, %v2429_v24  ;;  %v2446_v35 = vmax.f32 %v2438_v29, 0.0 }
 0x934   : > { %v3283_v26 = vpop.f32.mrf.mxu0 }
 0x935   : > { %v2441_v28 = vadd.f32 %v3283_v26, %v3092_v25  ;;  %v2444_v33 = vmax.f32 %v2430_v27, 0.0 }
 0x936   : > { %v2432_v30 = vpop.f32.mrf.mxu0 }
 0x937   : > { %v2433_v31 = vadd.f32 %v3092_v25, %v2432_v30  ;;  %v2447_v32 = vmax.f32 %v2441_v28, 0.0 }
 0x939   : > { %v2445_v34 = vmax.f32 %v2433_v31, 0.0  ;;  %v2449_v37 = vpack.c.bf16 %v2447_v32, %v2446_v35 }
 0x93b   : > { %v2448_v36 = vpack.c.bf16 %v2445_v34, %v2444_v33 }
 0x93d   : > { %3300 = vmatprep.mubr.bf16.mxu1 %v2448_v36 }
 0x93e   : > { %3301 = vmatmul.mubr.bf16.vlgmr.msra.gmra.mxu1 %v2449_v37 }
 0x9fe   : > { %v3302_v41 = vpop.f32.mrf.mxu1 }
 0x9ff   : > { %v2564_v47 = vadd.f32 %v3302_v41, %v3101_v43 }
 0xa00   : > { %v2555_v42 = vpop.f32.mrf.mxu1 }
 0xa01   : > { %v2556_v45 = vadd.f32 %v3101_v43, %v2555_v42  ;;  %v2572_v51 = vmax.f32 %v2564_v47, 0.0 }
 0xa02   : > { %v3303_v44 = vpop.f32.mrf.mxu1 }
 0xa03   : > { %v2567_v46 = vadd.f32 %v3303_v44, %v3101_v43  ;;  %v2570_v49 = vmax.f32 %v2556_v45, 0.0 }
 0xa04   : > { %v2558_v16 = vpop.f32.mrf.mxu1 }
 0xa05   : > { %v2559_v48 = vadd.f32 %v3101_v43, %v2558_v16  ;;  %v2573_v17 = vmax.f32 %v2567_v46, 0.0 }
 0xa07   : > { %v2571_v50 = vmax.f32 %v2559_v48, 0.0  ;;  %v2575_v53 = vpack.c.bf16 %v2573_v17, %v2572_v51 }
 0xa09   : > { %v2574_v52 = vpack.c.bf16 %v2571_v50, %v2570_v49 }
 0xa0b   : > { %3320 = vmatprep.mubr.bf16.mxu0 %v2574_v52 }
 0xa0c   : > { %3321 = vmatmul.mubr.bf16.vlgmr.msra.gmra.mxu0 %v2575_v53 }
 0xacc   : > { %v3322_v54 = vpop.f32.mrf.mxu0 }
 0xacd   : > { %v2690_v62 = vadd.f32 %v3322_v54, %v3110_v57 }
 0xace   : > { %v2681_v55 = vpop.f32.mrf.mxu0 }
 0xacf   : > { %v2682_v60 = vadd.f32 %v3110_v57, %v2681_v55 }
 0xad0   : > { %v3323_v56 = vpop.f32.mrf.mxu0 }
 0xad1   : > { %v2693_v58 = vadd.f32 %v3323_v56, %v3110_v57 }
 0xad2   : > { %v2684_v59 = vpop.f32.mrf.mxu0 }
 0xad3   : > { %v2685_v61 = vadd.f32 %v3110_v57, %v2684_v59  ;;  %v3153_v0 = vpack.c.bf16 %v2693_v58, %v2690_v62 }
 0xad5   : > { %v3148_v63 = vpack.c.bf16 %v2685_v61, %v2682_v60  ;;  %3157 = vst [vmem:[%s908_s24 + $0x8] sm:$0xff] %v3153_v0  }
 0xad7   : > { %3149 = vst [vmem:[%s908_s24] sm:$0xff] %v3148_v63  }
 0xad8 PF: > { %s39_s3 = sadd.s32 1, %s4056_s3  }
 0xad9   : > { %p36_p3 = scmp.ge.s32.totalorder %s39_s3, 4  }
 0xadb   :  { %38 = sbr.rel (!%p36_p3) target bundleno = 15 (0xf), region = 196 }
 0xae0   :  { %2738 = vsyncpa [#allocation3], 1 }
 0xae1   :  { %2740 = vsyncpa [#allocation3 + $0x1], 1 }
 0xae2   :  { %2741 = vsyncpa [#allocation5], 1 }
 0xae3   :  { %2742 = vsyncpa [#allocation8], 1 }
 0xae4   :  { %2743 = vsyncpa [#allocation11], 1 }
 0xae5   :  { %2744 = vsyncpa [#allocation14], 1 }
 0xae6   :  { %2745 = vsyncpa [#allocation17], 1 }
 0xae7   :  { %2746 = vsyncpa [#allocation20], 1 }

// kernel: m3pa_forward.1
= control target key start
LH: loop header
LB: loop body
LE: loop exit
PB: predicated region body
PF: predicated region fallthrough
CT: control target
= control target key end

     0   :  { %s4820_s0 = inlined_call_operand.vmem [shape: bf16[64,128], index: 0, kind: input, shape index: {}]   ;;  %s4821_s1 = inlined_call_operand.vmem [shape: f32[64,8], index: 1, kind: input, shape index: {}]   ;;  %s4822_s2 = inlined_call_operand.vmem [shape: bf16[64,128], index: 2, kind: input, shape index: {}]   ;;  %s4823_s3 = inlined_call_operand.vmem [shape: bf16[64,128], index: 3, kind: input, shape index: {}]   ;;  %s4824_s4 = inlined_call_operand.hbm [shape: bf16[8,8], index: 4, kind: input, shape index: {}]   ;;  %s4825_s5 = inlined_call_operand.hbm [shape: f32[1,8], index: 5, kind: input, shape index: {}]   ;;  %s4826_s6 = inlined_call_operand.hbm [shape: bf16[8,128], index: 6, kind: input, shape index: {}]   ;;  %s4827_s7 = inlined_call_operand.vmem [shape: bf16[128,128], index: 7, kind: input, shape index: {}]   ;;  %s4828_s8 = inlined_call_operand.hbm [shape: f32[1,128], index: 8, kind: input, shape index: {}]   ;;  %s4829_s9 = inlined_call_operand.vmem [shape: bf16[256,256], index: 9, kind: input, shape index: {}]   ;;  %s4830_s10 = inlined_call_operand.hbm [shape: f32[1,256], index: 10, kind: input, shape index: {}]   ;;  %s4831_s11 = inlined_call_operand.vmem [shape: bf16[256,256], index: 11, kind: input, shape index: {}]   ;;  %s4832_s12 = inlined_call_operand.hbm [shape: f32[1,256], index: 12, kind: input, shape index: {}]   ;;  %s4833_s13 = inlined_call_operand.vmem [shape: bf16[256,256], index: 13, kind: input, shape index: {}]   ;;  %s4834_s14 = inlined_call_operand.hbm [shape: f32[1,256], index: 14, kind: input, shape index: {}]   ;;  %s4835_s15 = inlined_call_operand.vmem [shape: bf16[256,1], index: 15, kind: input, shape index: {}]   ;;  %s4836_s16 = inlined_call_operand.hbm [shape: bf16[128,128], index: 16, kind: input, shape index: {}]   ;;  %s4837_s17 = inlined_call_operand.hbm [shape: f32[1,128], index: 17, kind: input, shape index: {}]   ;;  %s4838_s18 = inlined_call_operand.hbm [shape: bf16[128,128], index: 18, kind: input, shape index: {}]   ;;  %s4839_s19 = inlined_call_operand.hbm [shape: f32[1,128], index: 19, kind: input, shape index: {}]   ;;  %s4840_s20 = inlined_call_operand.hbm [shape: bf16[128,128], index: 20, kind: input, shape index: {}]   ;;  %s4841_s21 = inlined_call_operand.vmem [shape: f32[1,128], index: 21, kind: input, shape index: {}]   ;;  %s4842_s22 = inlined_call_operand.vmem [shape: bf16[64,128], index: 22, kind: output, shape index: {}]  }
   0x1   :  { %4849 = sst [smem:[#allocation28_spill]] %s4820_s0 }
   0x2   :  { %4850 = sst [smem:[#allocation29_spill]] %s4821_s1 }
   0x3   :  { %4851 = sst [smem:[#allocation30_spill]] %s4822_s2 }
   0x4   :  { %4852 = sst [smem:[#allocation31_spill]] %s4823_s3 }
   0x5   :  { %4853 = sst [smem:[#allocation32_spill]] %s4824_s4 }
   0x6   :  { %4854 = sst [smem:[#allocation33_spill]] %s4825_s5 }
   0x7   :  { %4855 = sst [smem:[#allocation34_spill]] %s4826_s6 }
   0x8   :  { %27 = vsyncpa [#allocation3], 0 }
   0x9   :  { %28 = vsyncpa [#allocation5], 0 }
   0xa   :  { %29 = vsyncpa [#allocation8], 0 }
   0xb   :  { %30 = vsyncpa [#allocation11], 0 }
   0xc   :  { %31 = vsyncpa [#allocation14], 0 }
   0xd   :  { %32 = vsyncpa [#allocation17], 0 }
   0xe   :  { %33 = vsyncpa [#allocation20], 0  ;;  %s4188_s3 = smov 0  }
   0xf LB: > { %s4058_s28 = smov [#allocation4]   ;;  %s4843_s30 = sadd.s32 4294967295, %s4056_s3   ;;  %s4056_s3 = sphi %s4188_s3, %s39_s3  }
  0x10   : > { %s576_s29 = sshll.u32 %s4058_s28, 4  ;;  %p2927_p0 = scmp.ge.s32.totalorder %s4056_s3, 1  ;;  %s577_s29 = int_to_ptr.vmem [resolvable:$true] %s576_s29 }
  0x11   : > { %p552_p1 = scmp.lt.s32.totalorder %s4056_s3, 3  ;;  %p4198_p2 = scmp.eq.s32.totalorder %s4843_s30, 0 }
  0x12   : > { %s4059_s23 = smov [#allocation7]   ;;  %s4060_s5 = smov [#allocation10]  }
  0x13   : > { %s4856_s4 = scalar_select %p4198_p2, 1, 0 }
  0x14   : > { %p4202_p3 = pnand %p2927_p0, %p552_p1  ;;  %s601_s1 = sshll.u32 %s4059_s23, 4  ;;  %s4208_s1 = int_to_ptr.vmem [resolvable:$true] %s601_s1 }
  0x15   : > { %s629_s24 = sshll.u32 %s4060_s5, 4  ;;  %s4061_s25 = smov [#allocation13]   ;;  %s4216_s24 = int_to_ptr.vmem [resolvable:$true] %s629_s24 }
  0x16   : > { %s4857_s0 = scalar_select %p4202_p3, 1, 0 }
  0x17   : > { %p3374_p4 = pneg %p4202_p3  ;;  %s656_s26 = sshll.u32 %s4061_s25, 4  ;;  %s4218_s26 = int_to_ptr.vmem [resolvable:$true] %s656_s26 }
  0x18   : > { %s3721_s27 = scalar_lea.vmem %s577_s29, 16  ;;  %s3728_s28 = scalar_lea.vmem %s577_s29, 32 }
  0x19   : > { %p4212_p5 = pnand %p4198_p2, %p3374_p4  ;;  %p3722_p7 = scmp.ne.s32.totalorder %s577_s29, %s3721_s27 }
  0x1a   : > { %p3729_p10 = scmp.lt.s32.totalorder %s577_s29, %s577_s29  ;;  %p3730_p11 = scmp.lt.s32.totalorder %s3728_s28, %s3721_s27 }
  0x1b   : > { %p4222_p6 = pneg %p4212_p5 }
  0x1c   : > { %p3731_p12 = por %p3730_p11, %p3729_p10 }
  0x1d   : > { %p3724_p8 = pnand %p3722_p7, %p4222_p6 }
  0x1f   : > { %p3725_p9 = pneg %p3724_p8 }
  0x21   : > { %p3732_p13 = pnand %p3731_p12, %p3725_p9 }
  0x23   : > { %3735 = shalt.err (!%p3732_p13)
}
  0x24   : > { %s4860_s25 = sld [smem:[#allocation33_spill]]  ;;  %s3747_s30 = scalar_lea.vmem %s4208_s1, 16 }
  0x25   : > { %p3748_p0 = scmp.ne.s32.totalorder %s4208_s1, %s3747_s30  ;;  %s3754_s27 = scalar_lea.vmem %s4208_s1, 32 }
  0x26   : > { %p3755_p7 = scmp.lt.s32.totalorder %s4208_s1, %s4208_s1  ;;  %p3756_p8 = scmp.lt.s32.totalorder %s3754_s27, %s3747_s30 }
  0x27   : > { %p3750_p1 = pnand %p3748_p0, %p4222_p6 }
  0x28   : > { %p3757_p9 = por %p3756_p8, %p3755_p7 }
  0x29   : > { %p3751_p4 = pneg %p3750_p1 }
  0x2a   : > { %3380 = dma.hbm_to_vmem [thread:$0]  (!%p4212_p5), %s4860_s25, 16, %s577_s29, [#allocation5]  }
  0x2b   : > { %p3758_p10 = pnand %p3757_p9, %p3751_p4 }
  0x2d   : > { %3761 = shalt.err (!%p3758_p10)
}
  0x2e   : > { %3386 = dma.hbm_to_vmem [thread:$0]  (!%p4212_p5), %s4828_s8, 16, %s4208_s1, [#allocation8]  }
  0x2f   : > { %s3773_s29 = scalar_lea.vmem %s4216_s24, 32  ;;  %p3781_p0 = scmp.lt.s32.totalorder %s4216_s24, %s4216_s24 }
  0x30   : > { %p3774_p11 = scmp.ne.s32.totalorder %s4216_s24, %s3773_s29  ;;  %p3782_p1 = scmp.lt.s32.totalorder %s3773_s29, %s3773_s29 }
  0x32   : > { %p3776_p12 = pnand %p3774_p11, %p4222_p6  ;;  %p3783_p4 = por %p3782_p1, %p3781_p0 }
  0x34   : > { %p3777_p13 = pneg %p3776_p12 }
  0x36   : > { %p3784_p7 = pnand %p3783_p4, %p3777_p13 }
  0x38   : > { %3787 = shalt.err (!%p3784_p7)
}
  0x39   : > { %3392 = dma.hbm_to_vmem [thread:$0]  (!%p4212_p5), %s4832_s12, 32, %s4216_s24, [#allocation11]  }
  0x3a   : > { %s3799_s1 = scalar_lea.vmem %s4218_s26, 1024  ;;  %p3807_p11 = scmp.lt.s32.totalorder %s4218_s26, %s4218_s26 }
  0x3b   : > { %p3800_p8 = scmp.ne.s32.totalorder %s4218_s26, %s3799_s1  ;;  %p3808_p12 = scmp.lt.s32.totalorder %s3799_s1, %s3799_s1 }
  0x3d   : > { %p3802_p9 = pnand %p3800_p8, %p4222_p6  ;;  %p3809_p13 = por %p3808_p12, %p3807_p11 }
  0x3f   : > { %p3803_p10 = pneg %p3802_p9 }
  0x41   : > { %p3810_p0 = pnand %p3809_p13, %p3803_p10 }
  0x43   : > { %3813 = shalt.err (!%p3810_p0)
}
  0x44   : > { %s4844_s25 = smov 64   ;;  %s4845_s27 = smov 4  }
  0x45   : > { %3398 = dma.hbm_to_vmem [thread:$0]  (!%p4212_p5), %s4836_s16, 1024, %s4218_s26, [#allocation14], %s4844_s25, %s4844_s25, %s4845_s27  }
  0x46   : > { %s4064_s23 = smov [#allocation16]   ;;  %s4065_s30 = smov [#allocation2]  }
  0x47   : > { %s680_s29 = sshll.u32 %s4064_s23, 4  ;;  %s565_s5 = sshll.u32 %s4065_s30, 4  ;;  %s681_s29 = int_to_ptr.vmem [resolvable:$true] %s680_s29  ;;  %s566_s5 = int_to_ptr.vmem [resolvable:$true] %s565_s5 }
  0x48   : > { %s3825_s1 = scalar_lea.vmem %s681_s29, 1024  ;;  %p3833_p8 = scmp.lt.s32.totalorder %s681_s29, %s681_s29 }
  0x49   : > { %p3826_p1 = scmp.ne.s32.totalorder %s681_s29, %s3825_s1  ;;  %p3834_p9 = scmp.lt.s32.totalorder %s3825_s1, %s3825_s1 }
  0x4b   : > { %p3828_p4 = pnand %p3826_p1, %p4222_p6  ;;  %p3835_p10 = por %p3834_p9, %p3833_p8 }
  0x4d   : > { %p3829_p7 = pneg %p3828_p4 }
  0x4f   : > { %p3836_p11 = pnand %p3835_p10, %p3829_p7 }
  0x51   : > { %3839 = shalt.err (!%p3836_p11)
}
  0x52   : > { %3404 = dma.hbm_to_vmem [thread:$0]  (!%p4212_p5), %s4838_s18, 1024, %s681_s29, [#allocation17], %s4844_s25, %s4844_s25, %s4845_s27  }
  0x53   : > { %s3851_s28 = scalar_lea.vmem %s566_s5, 64  ;;  %p3859_p1 = scmp.lt.s32.totalorder %s566_s5, %s566_s5 }
  0x54   : > { %p3852_p12 = scmp.ne.s32.totalorder %s566_s5, %s3851_s28  ;;  %p3860_p4 = scmp.lt.s32.totalorder %s3851_s28, %s3851_s28 }
  0x56   : > { %p3854_p13 = pnand %p3852_p12, %p4222_p6  ;;  %p3861_p7 = por %p3860_p4, %p3859_p1 }
  0x58   : > { %p3855_p0 = pneg %p3854_p13 }
  0x5a   : > { %p3862_p8 = pnand %p3861_p7, %p3855_p0 }
  0x5c   : > { %3865 = shalt.err (!%p3862_p8)
}
  0x5d   : > { %s4861_s1 = sld [smem:[#allocation32_spill]]  ;;  %s4066_s26 = smov [#allocation6]  }
  0x5e   : > { %s587_s29 = sshll.u32 %s4066_s26, 4  ;;  %s4067_s24 = smov [#allocation9]   ;;  %s588_s29 = int_to_ptr.vmem [resolvable:$true] %s587_s29 }
  0x5f   : > { %s615_s25 = sshll.u32 %s4067_s24, 4  ;;  %s3877_s27 = scalar_lea.vmem %s588_s29, 64  ;;  %s616_s25 = int_to_ptr.vmem [resolvable:$true] %s615_s25 }
  0x60   : > { %p3878_p9 = scmp.ne.s32.totalorder %s588_s29, %s3877_s27  ;;  %p3885_p12 = scmp.lt.s32.totalorder %s588_s29, %s588_s29 }
  0x61   : > { %p3886_p13 = scmp.lt.s32.totalorder %s3877_s27, %s3877_s27 }
  0x62   : > { %p3880_p10 = pnand %p3878_p9, %p4222_p6 }
  0x63   : > { %3377 = dma.hbm_to_vmem [thread:$0]  (!%p4212_p5), %s4861_s1, 64, %s566_s5, [#allocation3]  }
  0x64   : > { %p3881_p11 = pneg %p3880_p10  ;;  %p3887_p0 = por %p3886_p13, %p3885_p12 }
  0x66   : > { %p3888_p1 = pnand %p3887_p0, %p3881_p11 }
  0x68   : > { %3891 = shalt.err (!%p3888_p1)
}
  0x69   : > { %s4862_s5 = sld [smem:[#allocation34_spill]]  ;;  %s3903_s30 = scalar_lea.vmem %s616_s25, 32 }
  0x6a   : > { %p3904_p4 = scmp.ne.s32.totalorder %s616_s25, %s3903_s30  ;;  %p3911_p9 = scmp.lt.s32.totalorder %s616_s25, %s616_s25 }
  0x6b   : > { %p3912_p10 = scmp.lt.s32.totalorder %s3903_s30, %s3903_s30 }
  0x6c   : > { %p3906_p7 = pnand %p3904_p4, %p4222_p6 }
  0x6d   : > { %p3913_p2 = por %p3912_p10, %p3911_p9 }
  0x6e   : > { %p3907_p8 = pneg %p3906_p7 }
  0x6f   : > { %3383 = dma.hbm_to_vmem [thread:$0]  (!%p4212_p5), %s4862_s5, 64, %s588_s29, [#allocation5]  }
  0x70   : > { %p3914_p3 = pnand %p3913_p2, %p3907_p8 }
  0x72   : > { %3917 = shalt.err (!%p3914_p3)
}
  0x73   : > { %3389 = dma.hbm_to_vmem [thread:$0]  (!%p4212_p5), %s4830_s10, 32, %s616_s25, [#allocation8]  }
  0x74   : > { %s4068_s26 = smov [#allocation12]   ;;  %s4069_s24 = smov [#allocation15]  }
  0x75   : > { %s643_s29 = sshll.u32 %s4068_s26, 4  ;;  %s670_s28 = sshll.u32 %s4069_s24, 4  ;;  %s644_s29 = int_to_ptr.vmem [resolvable:$true] %s643_s29  ;;  %s671_s28 = int_to_ptr.vmem [resolvable:$true] %s670_s28 }
  0x76   : > { %s3929_s23 = scalar_lea.vmem %s644_s29, 32  ;;  %p3937_p0 = scmp.lt.s32.totalorder %s644_s29, %s644_s29 }
  0x77   : > { %p3930_p11 = scmp.ne.s32.totalorder %s644_s29, %s3929_s23  ;;  %p3938_p2 = scmp.lt.s32.totalorder %s3929_s23, %s3929_s23 }
  0x79   : > { %p3932_p12 = pnand %p3930_p11, %p4222_p6  ;;  %p3939_p3 = por %p3938_p2, %p3937_p0 }
  0x7b   : > { %p3933_p13 = pneg %p3932_p12 }
  0x7d   : > { %p3940_p1 = pnand %p3939_p3, %p3933_p13 }
  0x7f   : > { %3943 = shalt.err (!%p3940_p1)
}
  0x80   : > { %3395 = dma.hbm_to_vmem [thread:$0]  (!%p4212_p5), %s4834_s14, 32, %s644_s29, [#allocation11]  }
  0x81   : > { %s3955_s25 = scalar_lea.vmem %s671_s28, 16  ;;  %s3962_s27 = scalar_lea.vmem %s671_s28, 32 }
  0x82   : > { %p3956_p4 = scmp.ne.s32.totalorder %s671_s28, %s3955_s25  ;;  %p3963_p9 = scmp.lt.s32.totalorder %s671_s28, %s671_s28 }
  0x83   : > { %p3964_p10 = scmp.lt.s32.totalorder %s3962_s27, %s3955_s25 }
  0x84   : > { %p3958_p7 = pnand %p3956_p4, %p4222_p6 }
  0x85   : > { %p3965_p11 = por %p3964_p10, %p3963_p9 }
  0x86   : > { %p3959_p8 = pneg %p3958_p7 }
  0x88   : > { %p3966_p12 = pnand %p3965_p11, %p3959_p8 }
  0x8a   : > { %3969 = shalt.err (!%p3966_p12)
}
  0x8b   : > { %3401 = dma.hbm_to_vmem [thread:$0]  (!%p4212_p5), %s4837_s17, 16, %s671_s28, [#allocation14]  }
  0x8c   : > { %s4070_s29 = smov [#allocation18]   ;;  %s4071_s23 = smov [#allocation19]  }
  0x8d   : > { %s694_s24 = sshll.u32 %s4070_s29, 4  ;;  %s704_s5 = sshll.u32 %s4071_s23, 4  ;;  %s695_s24 = int_to_ptr.vmem [resolvable:$true] %s694_s24  ;;  %s705_s5 = int_to_ptr.vmem [resolvable:$true] %s704_s5 }
  0x8e   : > { %s3981_s30 = scalar_lea.vmem %s695_s24, 16  ;;  %s3988_s25 = scalar_lea.vmem %s695_s24, 32 }
  0x8f   : > { %p3982_p13 = scmp.ne.s32.totalorder %s695_s24, %s3981_s30  ;;  %p3989_p3 = scmp.lt.s32.totalorder %s695_s24, %s695_s24 }
  0x90   : > { %p3990_p1 = scmp.lt.s32.totalorder %s3988_s25, %s3981_s30 }
  0x91   : > { %p3984_p0 = pnand %p3982_p13, %p4222_p6 }
  0x92   : > { %p3991_p4 = por %p3990_p1, %p3989_p3 }
  0x93   : > { %p3985_p2 = pneg %p3984_p0 }
  0x95   : > { %p3992_p7 = pnand %p3991_p4, %p3985_p2 }
  0x97   : > { %3995 = shalt.err (!%p3992_p7)
}
  0x98   : > { %3407 = dma.hbm_to_vmem [thread:$0]  (!%p4212_p5), %s4839_s19, 16, %s695_s24, [#allocation17]  }
  0x99   : > { %s4007_s1 = scalar_lea.vmem %s705_s5, 1024  ;;  %p4015_p11 = scmp.lt.s32.totalorder %s705_s5, %s705_s5 }
  0x9a   : > { %p4008_p8 = scmp.ne.s32.totalorder %s705_s5, %s4007_s1  ;;  %p4016_p12 = scmp.lt.s32.totalorder %s4007_s1, %s4007_s1 }
  0x9c   : > { %p4010_p9 = pnand %p4008_p8, %p4222_p6  ;;  %p4017_p13 = por %p4016_p12, %p4015_p11 }
  0x9e   : > { %p4011_p10 = pneg %p4010_p9 }
  0xa0   : > { %p4018_p0 = pnand %p4017_p13, %p4011_p10 }
  0xa2   : > { %4021 = shalt.err (!%p4018_p0)
}
  0xa3   : > { %s4863_s26 = smov 4   ;;  %s4864_s29 = smov 64  }
  0xa4   : > { %3410 = dma.hbm_to_vmem [thread:$0]  (!%p4212_p5), %s4840_s20, 1024, %s705_s5, [#allocation20], %s4864_s29, %s4864_s29, %s4863_s26  }
  0xa5   : > { %p4865_p2 = scmp.ne.s32.totalorder %s4857_s0, 0 }
  0xa6   : > { %p4866_p6 = scmp.ne.s32.totalorder (!%p4865_p2), %s4856_s4, 0 }
  0xa7   : > { %759 = sbr.rel (%p4865_p2) target bundleno = 2776 (0xad8), region = 108 }
  0xac   : > { %4027 = dma.done.wait (%p4866_p6), [#allocation3], 64  }
  0xad   : > { %4029 = vsyncadd (%p4866_p6), [#allocation3], 4294967232 }
  0xae   : > { %4031 = dma.done.wait (%p4866_p6), [#allocation5], 80  }
  0xaf   : > { %4033 = vsyncadd (%p4866_p6), [#allocation5], 4294967216 }
  0xb0   : > { %4035 = dma.done.wait (%p4866_p6), [#allocation8], 48  }
  0xb1   : > { %4037 = vsyncadd (%p4866_p6), [#allocation8], 4294967248 }
  0xb2   : > { %4039 = dma.done.wait (%p4866_p6), [#allocation11], 64  }
  0xb3   : > { %4041 = vsyncadd (%p4866_p6), [#allocation11], 4294967232 }
  0xb4   : > { %4043 = dma.done.wait (%p4866_p6), [#allocation14], 1040  }
  0xb5   : > { %4045 = vsyncadd (%p4866_p6), [#allocation14], 4294966256 }
  0xb6   : > { %4047 = dma.done.wait (%p4866_p6), [#allocation17], 1040  }
  0xb7   : > { %4049 = vsyncadd (%p4866_p6), [#allocation17], 4294966256 }
  0xb8   : > { %4051 = dma.done.wait (%p4866_p6), [#allocation20], 1024  }
  0xb9   : > { %4053 = vsyncadd (%p4866_p6), [#allocation20], 4294966272  ;;  %s4867_s0 = sadd.s32 4294967295, %s4056_s3   ;;  %vm944_vm0 = vcmask 1043456   ;;  %s4868_s25 = sld [smem:[#allocation29_spill]]  ;;  %vm937_vm1 = vcmask 64512  }
  0xba   : > { %s2954_s6 = sshll.u32 %s4867_s0, 2  ;;  %v929_v0 = vld [vmem:[#allocation2] sm:$0xf]  ;;  %v2964_v20 = vld [vmem:[#allocation4] ss:$0 sm:$0xff]  ;;  %v3460_v55 = vld [vmem:[%s4827_s7 + $0x38] sm:$0xff]  }
  0xbb   : > { %p881_p5 = scmp.lt.s32.totalorder %s2954_s6, 7  ;;  %3324 = vmatprep.subr.msk.bf16.mxu1 %vm944_vm0, %v929_v0  ;;  %v946_v3 = vsel %vm944_vm0, %v929_v0, 0  ;;  %v1043_v53 = vld [vmem:[#allocation6] sm:$0xf]  ;;  %v3461_v56 = vld [vmem:[%s4827_s7 + $0x30] sm:$0xff]   ;;  %3244 = vmatprep.subr.bf16.mxu0 %v3460_v55  ;;  %v3464_v59 = vld [vmem:[%s4827_s7 + $0x18] sm:$0xff]  }
  0xbc   : > { %3233 = vmatpush3.bf16.msra.mxu1 %v946_v3  ;;  %v1051_v54 = vsel %vm944_vm0, %v1043_v53, 0  ;;  %3245 = vmatpush3.bf16.msra.mxu0 %v3460_v55  ;;  %v3462_v57 = vld [vmem:[%s4827_s7 + $0x28] sm:$0xff]   ;;  %v3463_v58 = vld [vmem:[%s4827_s7 + $0x20] sm:$0xff]   ;;  %s4869_s30 = sld [smem:[#allocation30_spill]] }
  0xbd   : > { %s4873_s6 = smov (!%p881_p5, %s2954_s6), 7  ;;  %3325 = vmatprep.subr.msk.bf16.mxu1 %vm944_vm0, %v1043_v53  ;;  %3246 = vmatprep.subr.bf16.mxu0 %v3461_v56  ;;  %v3509_v55 = vld [vmem:[%s4829_s9 + $0xa4] ss:$8 sps:$4 sm:$0xff]   ;;  %s4871_s29 = sld [smem:[#allocation31_spill]] }
  0xbe   : > { %s2957_s2 = sshll.u32 %s4873_s6, 3  ;;  %s4492_s26 = sshll.u32 %s4873_s6, 2 }
  0xbf   : > { %s890_s27 = scalar_lea.vmem %s4868_s25, %s2957_s2  ;;  %s4870_s2 = sld [smem:[#allocation28_spill]] }
  0xc0   : > { %v911_v1 = vld [vmem:[%s890_s27] sm:$0xff]  ;;  %v912_v2 = vld [vmem:[%s890_s27 + $0x8] sm:$0xff]  ;;  %v913_v6 = vld [vmem:[%s890_s27 + $0x10] sm:$0xff]  ;;  %3247 = vmatpush3.bf16.msra.mxu0 %v3461_v56 }
  0xc1   : > { %v915_v4 = vmul.f32 -50.0, %v911_v1  ;;  %v916_v5 = vmul.f32 -50.0, %v912_v2  ;;  %v914_v7 = vld [vmem:[%s890_s27 + $0x18] sm:$0xff]  ;;  %v917_v8 = vmul.f32 -50.0, %v913_v6  ;;  %3248 = vmatprep.subr.bf16.mxu0 %v3462_v57  ;;  %v3507_v56 = vld [vmem:[%s4829_s9 + $0xa0] ss:$8 sps:$4 sm:$0xff]  }
  0xc2   : > { %v918_v9 = vmul.f32 -50.0, %v914_v7  ;;  %s896_s0 = scalar_lea.vmem %s4869_s30, %s4492_s26 }
  0xc3   : > { %v919_v10 = vmul.f32 1.442695, %v915_v4  ;;  %v921_v11 = vmul.f32 1.442695, %v916_v5  ;;  %v923_v12 = vmul.f32 1.442695, %v917_v8  ;;  %s902_s23 = scalar_lea.vmem %s4871_s29, %s4492_s26 }
  0xc4   : > { %v925_v13 = vmul.f32 1.442695, %v918_v9  ;;  %3249 = vmatpush3.bf16.msra.mxu0 %v3462_v57  ;;  %v3512_v57 = vld [vmem:[%s4829_s9 + $0x94] ss:$8 sps:$4 sm:$0xff]  }
  0xc5   : > { %3654 = vpow2.f32 %v919_v10  ;;  %3250 = vmatprep.subr.bf16.mxu0 %v3463_v58  ;;  %v3465_v10 = vld [vmem:[%s4827_s7 + $0x10] sm:$0xff]   ;;  %s4520_s24 = scalar_lea.vmem %s4870_s2, %s4492_s26 }
  0xc6   : > { %3656 = vpow2.f32 %v921_v11  ;;  %v3466_v11 = vld [vmem:[%s4827_s7 + $0x8] sm:$0xff]  }
  0xc7   : > { %3658 = vpow2.f32 %v923_v12  ;;  %v3467_v12 = vld [vmem:[%s4827_s7] sm:$0xff]  }
  0xc8   : > { %3660 = vpow2.f32 %v925_v13  ;;  %3251 = vmatpush3.bf16.msra.mxu0 %v3463_v58  ;;  %v3468_v13 = vld [vmem:[%s4829_s9 + $0x70] ss:$8 sps:$4 sm:$0xff]  }
  0xc9   : > { %3252 = vmatprep.subr.bf16.mxu0 %v3464_v59  ;;  %v3510_v58 = vld [vmem:[%s4829_s9 + $0x90] ss:$8 sps:$4 sm:$0xff]  }
  0xcc   : > { %3253 = vmatpush3.bf16.msra.mxu0 %v3464_v59  ;;  %v3513_v59 = vld [vmem:[%s4829_s9 + $0x80] ss:$8 sps:$4 sm:$0xff]  }
  0xcd   : > { %3254 = vmatprep.subr.bf16.mxu0 %v3465_v10 }
  0xd0   : > { %3255 = vmatpush3.bf16.msra.mxu0 %v3465_v10  ;;  %v3536_v10 = vld [vmem:[%s4831_s11 + $0x10] ss:$8 sps:$4 sm:$0xff]  }
  0xd1   : > { %3256 = vmatprep.subr.bf16.mxu0 %v3466_v11 }
  0xd2   : > { %v3655_v14 = vpop.eup %3654 }
  0xd3   : > { %v3657_v15 = vpop.eup %3656 }
  0xd4   : > { %v3659_v16 = vpop.eup %3658  ;;  %v927_v17 = vpack.c.bf16 %v3657_v15, %v3655_v14  ;;  %3257 = vmatpush3.bf16.msra.mxu0 %v3466_v11  ;;  %v3470_v14 = vld [vmem:[%s4829_s9 + $0x74] ss:$8 sps:$4 sm:$0xff]   ;;  %v3473_v15 = vld [vmem:[%s4829_s9 + $0x64] ss:$8 sps:$4 sm:$0xff]  }
  0xd5   : > { %v3661_v18 = vpop.eup %3660  ;;  %3258 = vmatprep.subr.bf16.mxu0 %v3467_v12  ;;  %v3541_v11 = vld [vmem:[%s4831_s11 + $0x4] ss:$8 sps:$4 sm:$0xff]  }
  0xd6   : > { %3234 = vmatprep.mubr.msk.bf16.mxu1 %vm937_vm1, %v927_v17  ;;  %v928_v19 = vpack.c.bf16 %v3661_v18, %v3659_v16  ;;  %v3471_v16 = vld [vmem:[%s4829_s9 + $0x60] ss:$8 sps:$4 sm:$0xff]   ;;  %v3476_v17 = vld [vmem:[%s4829_s9 + $0x54] ss:$8 sps:$4 sm:$0xff]   ;;  %v3474_v18 = vld [vmem:[%s4829_s9 + $0x50] ss:$8 sps:$4 sm:$0xff]  }
  0xd8   : > { %3235 = vmatmul.mubr.msk.bf16.vlgmr.msra.gmra.mxu1 %vm937_vm1, %v928_v19  ;;  %3259 = vmatpush3.bf16.msra.mxu0 %v3467_v12  ;;  %v3479_v19 = vld [vmem:[%s4829_s9 + $0x44] ss:$8 sps:$4 sm:$0xff]   ;;  %v3539_v12 = vld [vmem:[%s4831_s11] ss:$8 sps:$4 sm:$0xff]  }
  0xd9   : > { %3239 = vmatpush3.bf16.msra.mxu1 %v1051_v54 }
  0xda   : > { %1470 = vmatprep.subr.bf16.mxu1 %v3470_v14  ;;  %v3542_v14 = vld [vmem:[%s4831_s11 + $0xf0] ss:$8 sps:$4 sm:$0xff]  }
 0x198   : > { %v3236_v21 = vpop.f32.mrf.mxu1 }
 0x199   : > { %v991_v22 = vadd.f32 %v3236_v21, %v2964_v20  ;;  %v3482_v21 = vld [vmem:[%s4829_s9 + $0x34] ss:$8 sps:$4 sm:$0xff]  }
 0x19a   : > { %v982_v23 = vpop.f32.mrf.mxu1 }
 0x19b   : > { %v983_v24 = vadd.f32 %v2964_v20, %v982_v23  ;;  %v1003_v25 = vsel %vm937_vm1, %v991_v22, -inf  ;;  %v3485_v23 = vld [vmem:[%s4829_s9 + $0x24] ss:$8 sps:$4 sm:$0xff]  }
 0x19c   : > { %1004 = vmax.xlane.f32.xlu1 %v1003_v25  ;;  %v3237_v26 = vpop.f32.mrf.mxu1  ;;  %v3488_v25 = vld [vmem:[%s4829_s9 + $0x14] ss:$8 sps:$4 sm:$0xff]  }
 0x19d   : > { %v994_v27 = vadd.f32 %v3237_v26, %v2964_v20  ;;  %v997_v28 = vsel %vm937_vm1, %v983_v24, -inf  ;;  %v3486_v26 = vld [vmem:[%s4829_s9 + $0x10] ss:$8 sps:$4 sm:$0xff]  }
 0x19e   : > { %v985_v29 = vpop.f32.mrf.mxu1  ;;  %998 = vmax.xlane.f32.xlu0 %v997_v28  ;;  %v3489_v28 = vld [vmem:[%s4829_s9] ss:$8 sps:$4 sm:$0xff]  }
 0x19f   : > { %v986_v30 = vadd.f32 %v2964_v20, %v985_v29  ;;  %v1006_v31 = vsel %vm937_vm1, %v994_v27, -inf  ;;  %v3477_v20 = vld [vmem:[%s4829_s9 + $0x40] ss:$8 sps:$4 sm:$0xff]   ;;  %v3494_v29 = vld [vmem:[%s4829_s9 + $0xf4] ss:$8 sps:$4 sm:$0xff]  }
 0x1a0   : > { %1007 = vmax.xlane.f32.xlu1 %v1006_v31  ;;  %v3497_v31 = vld [vmem:[%s4829_s9 + $0xe4] ss:$8 sps:$4 sm:$0xff]  }
 0x1a1   : > { %v1000_v32 = vsel %vm937_vm1, %v986_v30, -inf }
 0x1a2   : > { %1001 = vmax.xlane.f32.xlu0 %v1000_v32  ;;  %v3495_v32 = vld [vmem:[%s4829_s9 + $0xe0] ss:$8 sps:$4 sm:$0xff]  }
 0x225   : > { %v1005_v33 = vpop.xlane.xlu1 %1004 }
 0x226   : > { %v1011_v34 = vsub.f32 %v991_v22, %v1005_v33  ;;  %v3480_v22 = vld [vmem:[%s4829_s9 + $0x30] ss:$8 sps:$4 sm:$0xff]   ;;  %v3500_v33 = vld [vmem:[%s4829_s9 + $0xd4] ss:$8 sps:$4 sm:$0xff]  }
 0x227   : > { %v999_v35 = vpop.xlane.xlu0 %998 }
 0x228   : > { %v1009_v36 = vsub.f32 %v983_v24, %v999_v35  ;;  %v1017_v38 = vmul.f32 1.442695, %v1011_v34  ;;  %v3483_v24 = vld [vmem:[%s4829_s9 + $0x20] ss:$8 sps:$4 sm:$0xff]   ;;  %v3498_v34 = vld [vmem:[%s4829_s9 + $0xd0] ss:$8 sps:$4 sm:$0xff]  }
 0x229   : > { %v1008_v37 = vpop.xlane.xlu1 %1007  ;;  %v3503_v35 = vld [vmem:[%s4829_s9 + $0xc4] ss:$8 sps:$4 sm:$0xff]  }
 0x22a   : > { %v1013_v39 = vmul.f32 1.442695, %v1009_v36  ;;  %v1012_v40 = vsub.f32 %v994_v27, %v1008_v37  ;;  %v3491_v27 = vld [vmem:[%s4829_s9 + $0x4] ss:$8 sps:$4 sm:$0xff]   ;;  %v3501_v36 = vld [vmem:[%s4829_s9 + $0xc0] ss:$8 sps:$4 sm:$0xff]  }
 0x22b   : > { %v1002_v41 = vpop.xlane.xlu0 %1001  ;;  %v3506_v37 = vld [vmem:[%s4829_s9 + $0xb4] ss:$8 sps:$4 sm:$0xff]  }
 0x22c   : > { %3662 = vpow2.f32 %v1013_v39  ;;  %v1010_v42 = vsub.f32 %v986_v30, %v1002_v41  ;;  %v1019_v43 = vmul.f32 1.442695, %v1012_v40  ;;  %v3492_v30 = vld [vmem:[%s4829_s9 + $0xf0] ss:$8 sps:$4 sm:$0xff]   ;;  %v3130_v40 = vld [vmem:[%s896_s0] sm:$0xff]   ;;  %v3155_v41 = vld [vmem:[%s896_s0 + $0x8] sm:$0xff]  }
 0x22d   : > { %3664 = vpow2.f32 %v1017_v38  ;;  %v3504_v38 = vld [vmem:[%s4829_s9 + $0xb0] ss:$8 sps:$4 sm:$0xff]  }
 0x22e   : > { %v1015_v44 = vmul.f32 1.442695, %v1010_v42 }
 0x230   : > { %3666 = vpow2.f32 %v1015_v44  ;;  %v3131_v44 = vunpack.c.l.bf16 %v3130_v40 }
 0x231   : > { %3668 = vpow2.f32 %v1019_v43  ;;  %v3136_v43 = vunpack.c.h.bf16 %v3155_v41 }
 0x239   : > { %v3663_v45 = vpop.eup %3662 }
 0x23a   : > { %v1021_v46 = vsel %vm937_vm1, %v3663_v45, 0.0  ;;  %v3665_v47 = vpop.eup %3664 }
 0x23b   : > { %1022 = vadd.xlane.f32.xlu0 %v1021_v46  ;;  %v1027_v49 = vsel %vm937_vm1, %v3665_v47, 0.0  ;;  %v3135_v46 = vunpack.c.l.bf16 %v3155_v41  ;;  %v3516_v41 = vld [vmem:[%s4520_s24] sm:$0xff]  }
 0x23d   : > { %v3667_v48 = vpop.eup %3666 }
 0x23e   : > { %v1024_v50 = vsel %vm937_vm1, %v3667_v48, 0.0  ;;  %v3669_v51 = vpop.eup %3668 }
 0x23f   : > { %1028 = vadd.xlane.f32.xlu0 %v1027_v49  ;;  %1025 = vadd.xlane.f32.xlu1 %v1024_v50  ;;  %v1030_v52 = vsel %vm937_vm1, %v3669_v51, 0.0 }
 0x243   : > { %1031 = vadd.xlane.f32.xlu1 %v1030_v52 }
 0x2c4   : > { %v1023_v60 = vpop.xlane.xlu0 %1022 }
 0x2c5   : > { %3670 = vrcp.f32 %v1023_v60  ;;  %v3515_v60 = vld [vmem:[%s4829_s9 + $0x84] ss:$8 sps:$4 sm:$0xff]  }
 0x2c8   : > { %v1026_v61 = vpop.xlane.xlu1 %1025  ;;  %v1029_v62 = vpop.xlane.xlu0 %1028 }
 0x2c9   : > { %3672 = vrcp.f32 %v1026_v61  ;;  %v3518_v61 = vld [vmem:[%s4831_s11 + $0x70] ss:$8 sps:$4 sm:$0xff]  }
 0x2ca   : > { %3674 = vrcp.f32 %v1029_v62  ;;  %v3520_v62 = vld [vmem:[%s4831_s11 + $0x74] ss:$8 sps:$4 sm:$0xff]  }
 0x2cb   : > { %1739 = vmatprep.subr.bf16.mxu0 %v3520_v62  ;;  %v3583_v62 = vld [vmem:[%s4833_s13 + $0x24] ss:$8 sps:$4 sm:$0xff]  }
 0x2cc   : > { %v1032_v63 = vpop.xlane.xlu1 %1031 }
 0x2cd   : > { %3676 = vrcp.f32 %v1032_v63  ;;  %v3523_v63 = vld [vmem:[%s4831_s11 + $0x64] ss:$8 sps:$4 sm:$0xff]  }
 0x2d2   : > { %v3671_v0 = vpop.eup %3670 }
 0x2d3   : > { %v1034_v2 = vmul.f32 %v3671_v0, %v3663_v45  ;;  %v3132_v45 = vunpack.c.h.bf16 %v3130_v40  ;;  %v3521_v0 = vld [vmem:[%s4831_s11 + $0x60] ss:$8 sps:$4 sm:$0xff]  }
 0x2d6   : > { %v3673_v1 = vpop.eup %3672 }
 0x2d7   : > { %v1036_v3 = vmul.f32 %v3673_v1, %v3667_v48  ;;  %v3675_v4 = vpop.eup %3674  ;;  %v3526_v1 = vld [vmem:[%s4831_s11 + $0x54] ss:$8 sps:$4 sm:$0xff]  }
 0x2d8   : > { %v1038_v7 = vmul.f32 %v3675_v4, %v3665_v47  ;;  %v3527_v4 = vld [vmem:[%s4831_s11 + $0x40] ss:$8 sps:$4 sm:$0xff]  }
 0x2d9   : > { %v1041_v5 = vpack.c.bf16 %v1036_v3, %v1034_v2  ;;  %v3524_v2 = vld [vmem:[%s4831_s11 + $0x50] ss:$8 sps:$4 sm:$0xff]   ;;  %v3529_v3 = vld [vmem:[%s4831_s11 + $0x44] ss:$8 sps:$4 sm:$0xff]  }
 0x2da   : > { %v3677_v6 = vpop.eup %3676 }
 0x2db   : > { %3240 = vmatprep.mubr.msk.bf16.mxu1 %vm937_vm1, %v1041_v5  ;;  %v1040_v8 = vmul.f32 %v3677_v6, %v3669_v51  ;;  %v3532_v5 = vld [vmem:[%s4831_s11 + $0x34] ss:$8 sps:$4 sm:$0xff]   ;;  %v3530_v6 = vld [vmem:[%s4831_s11 + $0x30] ss:$8 sps:$4 sm:$0xff]  }
 0x2dd   : > { %v1042_v9 = vpack.c.bf16 %v1040_v8, %v1038_v7  ;;  %v3535_v7 = vld [vmem:[%s4831_s11 + $0x24] ss:$8 sps:$4 sm:$0xff]   ;;  %v3533_v8 = vld [vmem:[%s4831_s11 + $0x20] ss:$8 sps:$4 sm:$0xff]  }
 0x2df   : > { %3241 = vmatmul.mubr.msk.bf16.vlgmr.msra.gmra.mxu1 %vm937_vm1, %v1042_v9  ;;  %v3538_v9 = vld [vmem:[%s4831_s11 + $0x14] ss:$8 sps:$4 sm:$0xff]  }
 0x2e0   : > { %1471 = vmatpush1.bf16.msra.mxu1 %v3468_v13  ;;  %v3544_v13 = vld [vmem:[%s4831_s11 + $0xf4] ss:$8 sps:$4 sm:$0xff]  }
 0x2e1   : > { %1472 = vmatprep.subr.bf16.mxu1 %v3473_v15  ;;  %v3547_v15 = vld [vmem:[%s4831_s11 + $0xe4] ss:$8 sps:$4 sm:$0xff]  }
 0x2e4   : > { %1473 = vmatpush1.bf16.msra.mxu1 %v3471_v16  ;;  %v3545_v16 = vld [vmem:[%s4831_s11 + $0xe0] ss:$8 sps:$4 sm:$0xff]  }
 0x2e5   : > { %1474 = vmatprep.subr.bf16.mxu1 %v3476_v17  ;;  %v3550_v17 = vld [vmem:[%s4831_s11 + $0xd4] ss:$8 sps:$4 sm:$0xff]  }
 0x2e8   : > { %1475 = vmatpush1.bf16.msra.mxu1 %v3474_v18  ;;  %v3548_v18 = vld [vmem:[%s4831_s11 + $0xd0] ss:$8 sps:$4 sm:$0xff]  }
 0x2e9   : > { %1476 = vmatprep.subr.bf16.mxu1 %v3479_v19  ;;  %v3553_v19 = vld [vmem:[%s4831_s11 + $0xc4] ss:$8 sps:$4 sm:$0xff]  }
 0x2ec   : > { %1477 = vmatpush1.bf16.msra.mxu1 %v3477_v20  ;;  %v3551_v20 = vld [vmem:[%s4831_s11 + $0xc0] ss:$8 sps:$4 sm:$0xff]  }
 0x2ed   : > { %1478 = vmatprep.subr.bf16.mxu1 %v3482_v21  ;;  %v3556_v21 = vld [vmem:[%s4831_s11 + $0xb4] ss:$8 sps:$4 sm:$0xff]  }
 0x2f0   : > { %1479 = vmatpush1.bf16.msra.mxu1 %v3480_v22  ;;  %v3554_v22 = vld [vmem:[%s4831_s11 + $0xb0] ss:$8 sps:$4 sm:$0xff]  }
 0x2f1   : > { %1480 = vmatprep.subr.bf16.mxu1 %v3485_v23 }
 0x2f4   : > { %1481 = vmatpush1.bf16.msra.mxu1 %v3483_v24  ;;  %v3138_v24 = vld [vmem:[%s902_s23] sm:$0xff]  }
 0x2f5   : > { %1482 = vmatprep.subr.bf16.mxu1 %v3488_v25 }
 0x2f8   : > { %1483 = vmatpush1.bf16.msra.mxu1 %v3486_v26  ;;  %v2969_v26 = vld [vmem:[#allocation7] ss:$0 sm:$0xff] }
 0x2f9   : > { %1484 = vmatprep.subr.bf16.mxu1 %v3491_v27  ;;  %v3156_v27 = vld [vmem:[%s902_s23 + $0x8] sm:$0xff]  }
 0x2fc   : > { %1485 = vmatpush1.bf16.msra.mxu1 %v3489_v28  ;;  %v3139_v28 = vunpack.c.l.bf16 %v3138_v24 }
 0x2fd   : > { %1486 = vmatprep.subr.bf16.mxu1 %v3494_v29 }
 0x300   : > { %1487 = vmatpush2.bf16.msra.mxu1 %v3492_v30 }
 0x301   : > { %1488 = vmatprep.subr.bf16.mxu1 %v3497_v31 }
 0x304   : > { %1489 = vmatpush2.bf16.msra.mxu1 %v3495_v32  ;;  %v3144_v32 = vunpack.c.h.bf16 %v3156_v27 }
 0x305   : > { %1490 = vmatprep.subr.bf16.mxu1 %v3500_v33  ;;  %v3140_v33 = vunpack.c.h.bf16 %v3138_v24 }
 0x308   : > { %1491 = vmatpush2.bf16.msra.mxu1 %v3498_v34 }
 0x309   : > { %1492 = vmatprep.subr.bf16.mxu1 %v3503_v35 }
 0x30c   : > { %1493 = vmatpush2.bf16.msra.mxu1 %v3501_v36  ;;  %v3143_v36 = vunpack.c.l.bf16 %v3156_v27 }
 0x30d   : > { %1494 = vmatprep.subr.bf16.mxu1 %v3506_v37 }
 0x310   : > { %1495 = vmatpush2.bf16.msra.mxu1 %v3504_v38 }
 0x311   : > { %1496 = vmatprep.subr.bf16.mxu1 %v3509_v55  ;;  %v3569_v55 = vld [vmem:[%s4833_s13 + $0x60] ss:$8 sps:$4 sm:$0xff]  }
 0x314   : > { %1497 = vmatpush2.bf16.msra.mxu1 %v3507_v56  ;;  %v3574_v56 = vld [vmem:[%s4833_s13 + $0x54] ss:$8 sps:$4 sm:$0xff]  }
 0x315   : > { %1498 = vmatprep.subr.bf16.mxu1 %v3512_v57  ;;  %v3572_v57 = vld [vmem:[%s4833_s13 + $0x50] ss:$8 sps:$4 sm:$0xff]  }
 0x318   : > { %1499 = vmatpush2.bf16.msra.mxu1 %v3510_v58  ;;  %v3577_v58 = vld [vmem:[%s4833_s13 + $0x44] ss:$8 sps:$4 sm:$0xff]  }
 0x319   : > { %1500 = vmatprep.subr.bf16.mxu1 %v3515_v60  ;;  %v3580_v60 = vld [vmem:[%s4833_s13 + $0x34] ss:$8 sps:$4 sm:$0xff]  }
 0x31c   : > { %1501 = vmatpush2.bf16.msra.mxu1 %v3513_v59  ;;  %v3575_v59 = vld [vmem:[%s4833_s13 + $0x40] ss:$8 sps:$4 sm:$0xff]  }
 0x39f   : > { %v3242_v39 = vpop.f32.mrf.mxu1 }
 0x3a0   : > { %v1112_v52 = vmul.f32 %v3242_v39, %v3135_v46  ;;  %v3559_v46 = vld [vmem:[%s4831_s11 + $0xa4] ss:$8 sps:$4 sm:$0xff]  }
 0x3a1   : > { %v1087_v42 = vpop.f32.mrf.mxu1 }
 0x3a2   : > { %v1110_v50 = vmul.f32 %v3131_v44, %v1087_v42 }
 0x3a3   : > { %v3243_v47 = vpop.f32.mrf.mxu1 }
 0x3a4   : > { %v1113_v48 = vmul.f32 %v3243_v47, %v3136_v43  ;;  %v3557_v47 = vld [vmem:[%s4831_s11 + $0xa0] ss:$8 sps:$4 sm:$0xff]  }
 0x3a5   : > { %v1090_v49 = vpop.f32.mrf.mxu1 }
 0x3a6   : > { %v1111_v51 = vmul.f32 %v3132_v45, %v1090_v49  ;;  %v1115_v54 = vpack.c.bf16 %v1113_v48, %v1112_v52  ;;  %v3517_v45 = vld [vmem:[%s4520_s24 + $0x8] sm:$0xff]   ;;  %v3562_v48 = vld [vmem:[%s4831_s11 + $0x94] ss:$8 sps:$4 sm:$0xff]   ;;  %v3560_v49 = vld [vmem:[%s4831_s11 + $0x90] ss:$8 sps:$4 sm:$0xff]   ;;  %s908_s24 = scalar_lea.vmem %s4842_s22, %s4492_s26 }
 0x3a7   : > { %v3566_v52 = vld [vmem:[%s4833_s13 + $0x70] ss:$8 sps:$4 sm:$0xff]  }
 0x3a8   : > { %v1114_v53 = vpack.c.bf16 %v1111_v51, %v1110_v50  ;;  %v3565_v50 = vld [vmem:[%s4831_s11 + $0x84] ss:$8 sps:$4 sm:$0xff]   ;;  %v3563_v51 = vld [vmem:[%s4831_s11 + $0x80] ss:$8 sps:$4 sm:$0xff]  }
 0x3aa   : > { %3260 = vmatprep.mubr.bf16.mxu0 %v1114_v53  ;;  %v3568_v53 = vld [vmem:[%s4833_s13 + $0x74] ss:$8 sps:$4 sm:$0xff]  }
 0x3ab   : > { %3261 = vmatmul.mubr.bf16.vlgmr.msra.gmra.mxu0 %v1115_v54  ;;  %v3571_v54 = vld [vmem:[%s4833_s13 + $0x64] ss:$8 sps:$4 sm:$0xff]   ;;  %2000 = vmatprep.subr.bf16.mxu1 %v3568_v53 }
 0x3ac   : > { %1740 = vmatpush1.bf16.msra.mxu0 %v3518_v61  ;;  %v3578_v61 = vld [vmem:[%s4833_s13 + $0x30] ss:$8 sps:$4 sm:$0xff]   ;;  %v3613_v53 = vld [vmem:[%s4833_s13 + $0x84] ss:$8 sps:$4 sm:$0xff]  }
 0x3ad   : > { %1741 = vmatprep.subr.bf16.mxu0 %v3523_v63  ;;  %v3581_v63 = vld [vmem:[%s4833_s13 + $0x20] ss:$8 sps:$4 sm:$0xff]  }
 0x3b0   : > { %1742 = vmatpush1.bf16.msra.mxu0 %v3521_v0  ;;  %v3586_v0 = vld [vmem:[%s4833_s13 + $0x14] ss:$8 sps:$4 sm:$0xff]  }
 0x3b1   : > { %1743 = vmatprep.subr.bf16.mxu0 %v3526_v1  ;;  %v3584_v1 = vld [vmem:[%s4833_s13 + $0x10] ss:$8 sps:$4 sm:$0xff]  }
 0x3b4   : > { %1744 = vmatpush1.bf16.msra.mxu0 %v3524_v2  ;;  %v3589_v2 = vld [vmem:[%s4833_s13 + $0x4] ss:$8 sps:$4 sm:$0xff]  }
 0x3b5   : > { %1745 = vmatprep.subr.bf16.mxu0 %v3529_v3  ;;  %v3587_v3 = vld [vmem:[%s4833_s13] ss:$8 sps:$4 sm:$0xff]  }
 0x3b8   : > { %1746 = vmatpush1.bf16.msra.mxu0 %v3527_v4  ;;  %v3592_v4 = vld [vmem:[%s4833_s13 + $0xf4] ss:$8 sps:$4 sm:$0xff]  }
 0x3b9   : > { %1747 = vmatprep.subr.bf16.mxu0 %v3532_v5  ;;  %v3590_v5 = vld [vmem:[%s4833_s13 + $0xf0] ss:$8 sps:$4 sm:$0xff]  }
 0x3bc   : > { %1748 = vmatpush1.bf16.msra.mxu0 %v3530_v6  ;;  %v3595_v6 = vld [vmem:[%s4833_s13 + $0xe4] ss:$8 sps:$4 sm:$0xff]  }
 0x3bd   : > { %1749 = vmatprep.subr.bf16.mxu0 %v3535_v7  ;;  %v3593_v7 = vld [vmem:[%s4833_s13 + $0xe0] ss:$8 sps:$4 sm:$0xff]  }
 0x3c0   : > { %1750 = vmatpush1.bf16.msra.mxu0 %v3533_v8  ;;  %v3598_v8 = vld [vmem:[%s4833_s13 + $0xd4] ss:$8 sps:$4 sm:$0xff]  }
 0x3c1   : > { %1751 = vmatprep.subr.bf16.mxu0 %v3538_v9  ;;  %v3596_v9 = vld [vmem:[%s4833_s13 + $0xd0] ss:$8 sps:$4 sm:$0xff]  }
 0x3c4   : > { %1752 = vmatpush1.bf16.msra.mxu0 %v3536_v10  ;;  %v3601_v10 = vld [vmem:[%s4833_s13 + $0xc4] ss:$8 sps:$4 sm:$0xff]  }
 0x3c5   : > { %1753 = vmatprep.subr.bf16.mxu0 %v3541_v11  ;;  %v3599_v11 = vld [vmem:[%s4833_s13 + $0xc0] ss:$8 sps:$4 sm:$0xff]  }
 0x3c8   : > { %1754 = vmatpush1.bf16.msra.mxu0 %v3539_v12  ;;  %v3604_v12 = vld [vmem:[%s4833_s13 + $0xb4] ss:$8 sps:$4 sm:$0xff]  }
 0x3c9   : > { %1755 = vmatprep.subr.bf16.mxu0 %v3544_v13  ;;  %v3602_v13 = vld [vmem:[%s4833_s13 + $0xb0] ss:$8 sps:$4 sm:$0xff]  }
 0x3cc   : > { %1756 = vmatpush2.bf16.msra.mxu0 %v3542_v14  ;;  %v1300_v14 = vlaneseq }
 0x3cd   : > { %1757 = vmatprep.subr.bf16.mxu0 %v3547_v15 }
 0x3ce   : > { %v1301_v15 = vshrl.u32 %v1300_v14, 7 }
 0x3d0   : > { %1758 = vmatpush2.bf16.msra.mxu0 %v3545_v16  ;;  %v4702_v16 = vsub.s32 1, %v1301_v15 }
 0x3d1   : > { %1759 = vmatprep.subr.bf16.mxu0 %v3550_v17  ;;  %v4704_v17 = vsub.s32 0, %v1301_v15 }
 0x3d4   : > { %1760 = vmatpush2.bf16.msra.mxu0 %v3548_v18  ;;  %v1298_v18 = vld [vmem:[#allocation9] sm:$0x3] }
 0x3d5   : > { %1761 = vmatprep.subr.bf16.mxu0 %v3553_v19 }
 0x3d8   : > { %1762 = vmatpush2.bf16.msra.mxu0 %v3551_v20  ;;  %v1307_v20 = vrot.slane %v1298_v18, %v4702_v16 }
 0x3d9   : > { %1763 = vmatprep.subr.bf16.mxu0 %v3556_v21  ;;  %v1303_v21 = vrot.slane %v1298_v18, %v4704_v17 }
 0x3dc   : > { %1764 = vmatpush2.bf16.msra.mxu0 %v3554_v22 }
 0x3dd   : > { %1765 = vmatprep.subr.bf16.mxu0 %v3559_v46 }
 0x3e0   : > { %1766 = vmatpush2.bf16.msra.mxu0 %v3557_v47 }
 0x3e1   : > { %1767 = vmatprep.subr.bf16.mxu0 %v3562_v48 }
 0x3e4   : > { %1768 = vmatpush2.bf16.msra.mxu0 %v3560_v49  ;;  %v3607_v49 = vld [vmem:[%s4833_s13 + $0xa4] ss:$8 sps:$4 sm:$0xff]  }
 0x3e5   : > { %1769 = vmatprep.subr.bf16.mxu0 %v3565_v50  ;;  %v3605_v50 = vld [vmem:[%s4833_s13 + $0xa0] ss:$8 sps:$4 sm:$0xff]  }
 0x3e8   : > { %1770 = vmatpush2.bf16.msra.mxu0 %v3563_v51  ;;  %v3610_v51 = vld [vmem:[%s4833_s13 + $0x94] ss:$8 sps:$4 sm:$0xff]  }
 0x46b   : > { %v3262_v23 = vpop.f32.mrf.mxu0 }
 0x46c   : > { %v1230_v35 = vadd.f32 %v3262_v23, %v2969_v26 }
 0x46d   : > { %v1221_v25 = vpop.f32.mrf.mxu0 }
 0x46e   : > { %v1222_v30 = vadd.f32 %v2969_v26, %v1221_v25  ;;  %v1246_v42 = vadd.f32 %v3143_v36, %v1230_v35 }
 0x46f   : > { %v3263_v29 = vpop.f32.mrf.mxu0 }
 0x470   : > { %v1233_v31 = vadd.f32 %v3263_v29, %v2969_v26  ;;  %v1244_v38 = vadd.f32 %v3139_v28, %v1222_v30 }
 0x471   : > { %v1224_v34 = vpop.f32.mrf.mxu0 }
 0x472   : > { %v1225_v37 = vadd.f32 %v2969_v26, %v1224_v34  ;;  %v1247_v39 = vadd.f32 %v3144_v32, %v1233_v31 }
 0x474   : > { %v1245_v40 = vadd.f32 %v3140_v33, %v1225_v37  ;;  %v1253_v44 = vpack.c.bf16 %v1247_v39, %v1246_v42 }
 0x476   : > { %v1252_v43 = vpack.c.bf16 %v1245_v40, %v1244_v38 }
 0x478   : > { %1502 = vmatprep.mubr.bf16.mxu1 %v1252_v43 }
 0x479   : > { %1503 = vmatmul.mubr.bf16.vlgmr.msra.gmra.mxu1 %v3516_v41 }
 0x47a   : > { %1512 = vmatprep.mubr.bf16.mxu1 %v1253_v44  ;;  %2001 = vmatpush1.bf16.msra.mxu1 %v3566_v52  ;;  %v3608_v52 = vld [vmem:[%s4833_s13 + $0x90] ss:$8 sps:$4 sm:$0xff]  }
 0x47b   : > { %2002 = vmatprep.subr.bf16.mxu1 %v3571_v54  ;;  %v3611_v54 = vld [vmem:[%s4833_s13 + $0x80] ss:$8 sps:$4 sm:$0xff]  }
 0x47e   : > { %2003 = vmatpush1.bf16.msra.mxu1 %v3569_v55  ;;  %v3614_v55 = vld [vmem:[%s4835_s15 + $0x78] sm:$0xff]  }
 0x47f   : > { %2004 = vmatprep.subr.bf16.mxu1 %v3574_v56  ;;  %v3615_v56 = vld [vmem:[%s4835_s15 + $0x38] sm:$0xff]   ;;  %3174 = vmatprep.subr.bf16.mxu0 %v3614_v55 }
 0x481   : > { %1513 = vmatmul.mubr.bf16.gmra.mxu1 %v3517_v45 }
 0x482   : > { %2005 = vmatpush1.bf16.msra.mxu1 %v3572_v57  ;;  %v3616_v57 = vld [vmem:[%s4835_s15 + $0x70] sm:$0xff]  }
 0x483   : > { %2006 = vmatprep.subr.bf16.mxu1 %v3577_v58  ;;  %v3617_v58 = vld [vmem:[%s4835_s15 + $0x30] sm:$0xff]  }
 0x486   : > { %2007 = vmatpush1.bf16.msra.mxu1 %v3575_v59 }
 0x487   : > { %2008 = vmatprep.subr.bf16.mxu1 %v3580_v60  ;;  %v1567_v60 = vld [vmem:[#allocation10] sm:$0x3] }
 0x48a   : > { %2009 = vmatpush1.bf16.msra.mxu1 %v3578_v61 }
 0x48b   : > { %2010 = vmatprep.subr.bf16.mxu1 %v3583_v62  ;;  %v1576_v62 = vrot.slane %v1567_v60, %v4702_v16 }
 0x48e   : > { %2011 = vmatpush1.bf16.msra.mxu1 %v3581_v63  ;;  %v1572_v63 = vrot.slane %v1567_v60, %v4704_v17 }
 0x48f   : > { %2012 = vmatprep.subr.bf16.mxu1 %v3586_v0 }
 0x492   : > { %2013 = vmatpush1.bf16.msra.mxu1 %v3584_v1 }
 0x493   : > { %2014 = vmatprep.subr.bf16.mxu1 %v3589_v2 }
 0x496   : > { %2015 = vmatpush1.bf16.msra.mxu1 %v3587_v3 }
 0x497   : > { %2016 = vmatprep.subr.bf16.mxu1 %v3592_v4 }
 0x49a   : > { %2017 = vmatpush2.bf16.msra.mxu1 %v3590_v5 }
 0x49b   : > { %2018 = vmatprep.subr.bf16.mxu1 %v3595_v6 }
 0x49e   : > { %2019 = vmatpush2.bf16.msra.mxu1 %v3593_v7 }
 0x49f   : > { %2020 = vmatprep.subr.bf16.mxu1 %v3598_v8 }
 0x4a2   : > { %2021 = vmatpush2.bf16.msra.mxu1 %v3596_v9 }
 0x4a3   : > { %2022 = vmatprep.subr.bf16.mxu1 %v3601_v10 }
 0x4a6   : > { %2023 = vmatpush2.bf16.msra.mxu1 %v3599_v11 }
 0x4a7   : > { %2024 = vmatprep.subr.bf16.mxu1 %v3604_v12 }
 0x4aa   : > { %2025 = vmatpush2.bf16.msra.mxu1 %v3602_v13 }
 0x4ab   : > { %2026 = vmatprep.subr.bf16.mxu1 %v3607_v49 }
 0x4ae   : > { %2027 = vmatpush2.bf16.msra.mxu1 %v3605_v50 }
 0x4af   : > { %2028 = vmatprep.subr.bf16.mxu1 %v3610_v51 }
 0x4b2   : > { %2029 = vmatpush2.bf16.msra.mxu1 %v3608_v52 }
 0x4b3   : > { %2030 = vmatprep.subr.bf16.mxu1 %v3613_v53 }
 0x4b6   : > { %2031 = vmatpush2.bf16.msra.mxu1 %v3611_v54 }
 0x539   : > { %v1504_v19 = vpop.f32.mrf.mxu1 }
 0x53a   : > { %v1505_v26 = vadd.f32 %v1504_v19, %v1303_v21 }
 0x53b   : > { %v1506_v22 = vpop.f32.mrf.mxu1 }
 0x53c   : > { %v1507_v24 = vadd.f32 %v1506_v22, %v1307_v20  ;;  %v1523_v33 = vmax.f32 %v1505_v26, 0.0  ;;  %v3620_v22 = vld [vmem:[%s4835_s15 + $0x60] sm:$0xff]   ;;  %v3624_v26 = vld [vmem:[%s4835_s15 + $0x50] sm:$0xff]  }
 0x53d   : > { %v1508_v23 = vpop.f32.mrf.mxu1 }
 0x53e   : > { %v1509_v25 = vadd.f32 %v1508_v23, %v1303_v21  ;;  %v1524_v31 = vmax.f32 %v1507_v24, 0.0  ;;  %v3621_v23 = vld [vmem:[%s4835_s15 + $0x20] sm:$0xff]   ;;  %v3622_v24 = vld [vmem:[%s4835_s15 + $0x58] sm:$0xff]  }
 0x53f   : > { %v1510_v27 = vpop.f32.mrf.mxu1 }
 0x540   : > { %v1511_v28 = vadd.f32 %v1510_v27, %v1307_v20  ;;  %v1525_v29 = vmax.f32 %v1509_v25, 0.0  ;;  %v3623_v25 = vld [vmem:[%s4835_s15 + $0x18] sm:$0xff]   ;;  %v3625_v27 = vld [vmem:[%s4835_s15 + $0x10] sm:$0xff]  }
 0x541   : > { %v1514_v30 = vpop.f32.mrf.mxu1 }
 0x542   : > { %v1526_v32 = vmax.f32 %v1511_v28, 0.0  ;;  %v1515_v34 = vadd.f32 %v1514_v30, %v1303_v21  ;;  %v1531_v38 = vpack.c.bf16 %v1525_v29, %v1523_v33  ;;  %v3626_v28 = vld [vmem:[%s4835_s15 + $0x48] sm:$0xff]   ;;  %v3628_v30 = vld [vmem:[%s4835_s15 + $0x40] sm:$0xff]  }
 0x543   : > { %v1516_v35 = vpop.f32.mrf.mxu1  ;;  %v3627_v29 = vld [vmem:[%s4835_s15 + $0x8] sm:$0xff]  }
 0x544   : > { %v1532_v36 = vpack.c.bf16 %v1526_v32, %v1524_v31  ;;  %v1517_v37 = vadd.f32 %v1516_v35, %v1307_v20  ;;  %v1527_v41 = vmax.f32 %v1515_v34, 0.0  ;;  %v3629_v31 = vld [vmem:[%s4835_s15] sm:$0xff]   ;;  %v1828_v32 = vld [vmem:[#allocation12] sm:$0x3] }
 0x545   : > { %v1518_v39 = vpop.f32.mrf.mxu1  ;;  %v1837_v33 = vrot.slane %v1828_v32, %v4702_v16  ;;  %v1833_v35 = vrot.slane %v1828_v32, %v4704_v17 }
 0x546   : > { %v1519_v40 = vadd.f32 %v1518_v39, %v1303_v21  ;;  %1771 = vmatprep.mubr.bf16.mxu0 %v1532_v36  ;;  %v1528_v43 = vmax.f32 %v1517_v37, 0.0  ;;  %v3619_v21 = vld [vmem:[%s4835_s15 + $0x28] sm:$0xff]  }
 0x547   : > { %v1520_v42 = vpop.f32.mrf.mxu1  ;;  %1772 = vmatmul.mubr.bf16.vlgmr.msra.gmra.mxu0 %v1531_v38 }
 0x548   : > { %v1529_v44 = vmax.f32 %v1519_v40, 0.0  ;;  %v1521_v45 = vadd.f32 %v1520_v42, %v1307_v20  ;;  %3175 = vmatpush3.bf16.msra.mxu0 %v3615_v56  ;;  %v3618_v20 = vld [vmem:[%s4835_s15 + $0x68] sm:$0xff]  }
 0x549   : > { %3176 = vmatprep.subr.bf16.mxu0 %v3616_v57 }
 0x54a   : > { %v1530_v46 = vmax.f32 %v1521_v45, 0.0  ;;  %v1533_v47 = vpack.c.bf16 %v1529_v44, %v1527_v41 }
 0x54c   : > { %v1534_v48 = vpack.c.bf16 %v1530_v46, %v1528_v43  ;;  %3177 = vmatpush3.bf16.msra.mxu0 %v3617_v58 }
 0x54d   : > { %3178 = vmatprep.subr.bf16.mxu0 %v3618_v20 }
 0x54e   : > { %1781 = vmatprep.mubr.bf16.mxu0 %v1534_v48 }
 0x54f   : > { %1782 = vmatmul.mubr.bf16.gmra.mxu0 %v1533_v47 }
 0x550   : > { %3179 = vmatpush3.bf16.msra.mxu0 %v3619_v21 }
 0x551   : > { %3180 = vmatprep.subr.bf16.mxu0 %v3620_v22 }
 0x554   : > { %3181 = vmatpush3.bf16.msra.mxu0 %v3621_v23 }
 0x555   : > { %3182 = vmatprep.subr.bf16.mxu0 %v3622_v24 }
 0x558   : > { %3183 = vmatpush3.bf16.msra.mxu0 %v3623_v25 }
 0x559   : > { %3184 = vmatprep.subr.bf16.mxu0 %v3624_v26 }
 0x55c   : > { %3185 = vmatpush3.bf16.msra.mxu0 %v3625_v27 }
 0x55d   : > { %3186 = vmatprep.subr.bf16.mxu0 %v3626_v28 }
 0x560   : > { %3187 = vmatpush3.bf16.msra.mxu0 %v3627_v29 }
 0x561   : > { %3188 = vmatprep.subr.bf16.mxu0 %v3628_v30 }
 0x564   : > { %3189 = vmatpush3.bf16.msra.mxu0 %v3629_v31 }
 0x607   : > { %v1773_v59 = vpop.f32.mrf.mxu0 }
 0x608   : > { %v4746_v5 = vadd.f32 %v1773_v59, %v1572_v63 }
 0x609   : > { %v1775_v61 = vpop.f32.mrf.mxu0 }
 0x60a   : > { %v4742_v3 = vadd.f32 %v1775_v61, %v1576_v62  ;;  %v4072_v61 = vmov 0  }
 0x60b   : > { %v1777_v0 = vpop.f32.mrf.mxu0  ;;  %3458 = vset.pattern.permute.xlu0 %v4072_v61  ;;  %3459 = vset.pattern.permute.xlu1 %v4072_v61 }
 0x60c   : > { %v4740_v1 = vadd.f32 %v1777_v0, %v1572_v63 }
 0x60d   : > { %v1779_v2 = vpop.f32.mrf.mxu0 }
 0x60e   : > { %v4744_v4 = vadd.f32 %v1779_v2, %v1576_v62  ;;  %v1792_v8 = vpack.c.bf16 %v4740_v1, %v4746_v5 }
 0x60f   : > { %v1783_v6 = vpop.f32.mrf.mxu0 }
 0x610   : > { %v1793_v7 = vpack.c.bf16 %v4744_v4, %v4742_v3  ;;  %v4758_v15 = vadd.f32 %v1783_v6, %v1572_v63 }
 0x611   : > { %v1785_v9 = vpop.f32.mrf.mxu0 }
 0x612   : > { %2032 = vmatprep.mubr.bf16.mxu1 %v1793_v7  ;;  %v4754_v13 = vadd.f32 %v1785_v9, %v1576_v62 }
 0x613   : > { %v1787_v10 = vpop.f32.mrf.mxu0  ;;  %2033 = vmatmul.mubr.bf16.vlgmr.msra.gmra.mxu1 %v1792_v8 }
 0x614   : > { %v4752_v11 = vadd.f32 %v1787_v10, %v1572_v63 }
 0x615   : > { %v1789_v12 = vpop.f32.mrf.mxu0 }
 0x616   : > { %v4756_v14 = vadd.f32 %v1789_v12, %v1576_v62  ;;  %v1794_v19 = vpack.c.bf16 %v4752_v11, %v4758_v15 }
 0x618   : > { %v1795_v18 = vpack.c.bf16 %v4756_v14, %v4754_v13 }
 0x61a   : > { %2042 = vmatprep.mubr.bf16.mxu1 %v1795_v18 }
 0x61b   : > { %2043 = vmatmul.mubr.bf16.gmra.mxu1 %v1794_v19 }
 0x6d3   : > { %v2034_v34 = vpop.f32.mrf.mxu1 }
 0x6d4   : > { %v2035_v40 = vadd.f32 %v2034_v34, %v1833_v35 }
 0x6d5   : > { %v2036_v36 = vpop.f32.mrf.mxu1 }
 0x6d6   : > { %v2037_v37 = vadd.f32 %v2036_v36, %v1837_v33  ;;  %v3631_v36 = vld [vmem:[#allocation13 + $0x30] sm:$0xff]  }
 0x6d7   : > { %v2038_v38 = vpop.f32.mrf.mxu1 }
 0x6d8   : > { %v2039_v39 = vadd.f32 %v2038_v38, %v1833_v35  ;;  %3678 = vtanh.f32 %v2037_v37 }
 0x6d9   : > { %v2040_v41 = vpop.f32.mrf.mxu1 }
 0x6da   : > { %v2041_v42 = vadd.f32 %v2040_v41, %v1837_v33  ;;  %3680 = vtanh.f32 %v2039_v39  ;;  %v3632_v39 = vld [vmem:[#allocation13 + $0x28] sm:$0xff]  }
 0x6db   : > { %v2044_v43 = vpop.f32.mrf.mxu1 }
 0x6dc   : > { %3682 = vtanh.f32 %v2041_v42  ;;  %v2045_v16 = vadd.f32 %v2044_v43, %v1833_v35  ;;  %v3633_v42 = vld [vmem:[#allocation13 + $0x20] sm:$0xff]  }
 0x6dd   : > { %3684 = vtanh.f32 %v2035_v40  ;;  %v2046_v44 = vpop.f32.mrf.mxu1 }
 0x6de   : > { %v2047_v45 = vadd.f32 %v2046_v44, %v1837_v33  ;;  %v3634_v44 = vld [vmem:[#allocation13 + $0x18] sm:$0xff]  }
 0x6df   : > { %v2048_v46 = vpop.f32.mrf.mxu1 }
 0x6e0   : > { %v2049_v47 = vadd.f32 %v2048_v46, %v1833_v35  ;;  %3686 = vtanh.f32 %v2047_v45  ;;  %v3635_v46 = vld [vmem:[#allocation13 + $0x10] sm:$0xff]  }
 0x6e1   : > { %v2050_v48 = vpop.f32.mrf.mxu1 }
 0x6e2   : > { %v2051_v17 = vadd.f32 %v2050_v48, %v1837_v33  ;;  %3688 = vtanh.f32 %v2049_v47  ;;  %v3630_v33 = vld [vmem:[#allocation13 + $0x38] sm:$0xff]  }
 0x6e3   : > { %3264 = vmatprep.subr.bf16.mxu0 %v3630_v33 }
 0x6e4   : > { %3690 = vtanh.f32 %v2051_v17  ;;  %v3637_v17 = vld [vmem:[#allocation13] sm:$0xff]  }
 0x6e5   : > { %3692 = vtanh.f32 %v2045_v16  ;;  %v3679_v49 = vpop.eup %3678  ;;  %v3636_v16 = vld [vmem:[#allocation13 + $0x8] sm:$0xff]  }
 0x6e7   : > { %v3681_v50 = vpop.eup %3680 }
 0x6e9   : > { %v3683_v51 = vpop.eup %3682 }
 0x6ea   : > { %v3685_v52 = vpop.eup %3684  ;;  %v2062_v53 = vpack.c.bf16 %v3683_v51, %v3679_v49  ;;  %v3639_v51 = vld [vmem:[#allocation16 + $0x30] sm:$0xff]  }
 0x6eb   : > { %v2061_v54 = vpack.c.bf16 %v3681_v50, %v3685_v52  ;;  %v3638_v50 = vld [vmem:[#allocation16 + $0x38] sm:$0xff]   ;;  %v3640_v52 = vld [vmem:[#allocation16 + $0x28] sm:$0xff]  }
 0x6ec   : > { %2225 = vmatprep.mubr.bf16.mxu0 %v2062_v53  ;;  %3284 = vmatprep.subr.bf16.mxu1 %v3638_v50  ;;  %v3641_v53 = vld [vmem:[#allocation16 + $0x20] sm:$0xff]  }
 0x6ed   : > { %2226 = vmatmul.mubr.bf16.vlgmr.msra.gmra.mxu0 %v2061_v54  ;;  %v3687_v55 = vpop.eup %3686  ;;  %3285 = vmatpush3.bf16.msra.mxu1 %v3638_v50  ;;  %v3642_v54 = vld [vmem:[#allocation16 + $0x18] sm:$0xff]  }
 0x6ee   : > { %3265 = vmatpush3.bf16.msra.mxu0 %v3630_v33  ;;  %3286 = vmatprep.subr.bf16.mxu1 %v3639_v51 }
 0x6ef   : > { %v3689_v56 = vpop.eup %3688  ;;  %3266 = vmatprep.subr.bf16.mxu0 %v3631_v36 }
 0x6f1   : > { %v3691_v57 = vpop.eup %3690  ;;  %3287 = vmatpush3.bf16.msra.mxu1 %v3639_v51 }
 0x6f2   : > { %v3693_v58 = vpop.eup %3692  ;;  %v2064_v59 = vpack.c.bf16 %v3691_v57, %v3687_v55  ;;  %3267 = vmatpush3.bf16.msra.mxu0 %v3631_v36  ;;  %3288 = vmatprep.subr.bf16.mxu1 %v3640_v52 }
 0x6f3   : > { %v2063_v60 = vpack.c.bf16 %v3689_v56, %v3693_v58  ;;  %3268 = vmatprep.subr.bf16.mxu0 %v3632_v39 }
 0x6f4   : > { %2233 = vmatprep.mubr.bf16.mxu0 %v2064_v59 }
 0x6f5   : > { %2234 = vmatmul.mubr.bf16.gmra.mxu0 %v2063_v60  ;;  %3289 = vmatpush3.bf16.msra.mxu1 %v3640_v52 }
 0x6f6   : > { %3269 = vmatpush3.bf16.msra.mxu0 %v3632_v39  ;;  %3290 = vmatprep.subr.bf16.mxu1 %v3641_v53  ;;  %v3652_v39 = vld [vmem:[#allocation19 + $0x8] sm:$0xff]  }
 0x6f7   : > { %3270 = vmatprep.subr.bf16.mxu0 %v3633_v42 }
 0x6f9   : > { %3291 = vmatpush3.bf16.msra.mxu1 %v3641_v53 }
 0x6fa   : > { %3271 = vmatpush3.bf16.msra.mxu0 %v3633_v42  ;;  %3292 = vmatprep.subr.bf16.mxu1 %v3642_v54 }
 0x6fb   : > { %3272 = vmatprep.subr.bf16.mxu0 %v3634_v44 }
 0x6fd   : > { %3293 = vmatpush3.bf16.msra.mxu1 %v3642_v54 }
 0x6fe   : > { %3273 = vmatpush3.bf16.msra.mxu0 %v3634_v44 }
 0x6ff   : > { %3274 = vmatprep.subr.bf16.mxu0 %v3635_v46 }
 0x702   : > { %3275 = vmatpush3.bf16.msra.mxu0 %v3635_v46 }
 0x703   : > { %3276 = vmatprep.subr.bf16.mxu0 %v3636_v16 }
 0x706   : > { %3277 = vmatpush3.bf16.msra.mxu0 %v3636_v16 }
 0x707   : > { %3278 = vmatprep.subr.bf16.mxu0 %v3637_v17 }
 0x70a   : > { %3279 = vmatpush3.bf16.msra.mxu0 %v3637_v17 }
 0x7ad   : > { %v3190_v62 = vpop.f32.mrf.mxu0 }
 0x7af   : > { %v3191_v63 = vpop.f32.mrf.mxu0 }
 0x7b0   : > { %v3192_v0 = vadd.f32 %v3191_v63, %v3190_v62 }
 0x7b1   : > { %v3193_v2 = vpop.f32.mrf.mxu0 }
 0x7b2   : > { %v2242_v6 = vsub.f32 0.0, %v3192_v0 }
 0x7b3   : > { %v3194_v7 = vpop.f32.mrf.mxu0 }
 0x7b4   : > { %v2246_v8 = vmul.f32 1.442695, %v2242_v6  ;;  %v3195_v9 = vadd.f32 %v3194_v7, %v3193_v2 }
 0x7b5   : > { %v3196_v10 = vpop.f32.mrf.mxu0 }
 0x7b6   : > { %3694 = vpow2.f32 %v2246_v8  ;;  %v2243_v12 = vsub.f32 0.0, %v3195_v9 }
 0x7b7   : > { %v3197_v18 = vpop.f32.mrf.mxu0 }
 0x7b8   : > { %v2248_v19 = vmul.f32 1.442695, %v2243_v12  ;;  %v3198_v20 = vadd.f32 %v3197_v18, %v3196_v10 }
 0x7b9   : > { %v3199_v21 = vpop.f32.mrf.mxu0 }
 0x7ba   : > { %3696 = vpow2.f32 %v2248_v19  ;;  %v2244_v22 = vsub.f32 0.0, %v3198_v20  ;;  %v3644_v20 = vld [vmem:[#allocation16 + $0x8] sm:$0xff]  }
 0x7bb   : > { %v3200_v23 = vpop.f32.mrf.mxu0 }
 0x7bc   : > { %v2250_v24 = vmul.f32 1.442695, %v2244_v22  ;;  %v3201_v25 = vadd.f32 %v3200_v23, %v3199_v21  ;;  %v3645_v21 = vld [vmem:[#allocation16] sm:$0xff]   ;;  %v3647_v22 = vld [vmem:[#allocation19 + $0x30] sm:$0xff]  }
 0x7be   : > { %3698 = vpow2.f32 %v2250_v24  ;;  %v2245_v26 = vsub.f32 0.0, %v3201_v25  ;;  %v3092_v25 = vld [vmem:[#allocation15] ss:$0 sm:$0xff] }
 0x7c0   : > { %v2252_v29 = vmul.f32 1.442695, %v2245_v26 }
 0x7c3   : > { %v3695_v27 = vpop.eup %3694 }
 0x7c4   : > { %v2254_v28 = vadd.f32 1.0, %v3695_v27 }
 0x7c6   : > { %3700 = vrcp.f32 %v2254_v28 }
 0x7c7   : > { %v3697_v30 = vpop.eup %3696  ;;  %3702 = vpow2.f32 %v2252_v29 }
 0x7c8   : > { %v2255_v31 = vadd.f32 1.0, %v3697_v30 }
 0x7ca   : > { %3704 = vrcp.f32 %v2255_v31 }
 0x7cb   : > { %v3699_v32 = vpop.eup %3698 }
 0x7cc   : > { %v2256_v34 = vadd.f32 1.0, %v3699_v32 }
 0x7ce   : > { %3706 = vrcp.f32 %v2256_v34 }
 0x7d3   : > { %v3701_v35 = vpop.eup %3700 }
 0x7d4   : > { %2268 = vperm.xlu0 %3458, %v3701_v35   ;;  %v2290_v37 = vsub.f32 1.0, %v3701_v35  ;;  %v3703_v38 = vpop.eup %3702 }
 0x7d5   : > { %v2257_v40 = vadd.f32 1.0, %v3703_v38  ;;  %v3651_v38 = vld [vmem:[#allocation19 + $0x10] sm:$0xff]  }
 0x7d6   : > { %2296 = vperm.xlu1 %3459, %v2290_v37  }
 0x7d7   : > { %v3705_v41 = vpop.eup %3704  ;;  %3708 = vrcp.f32 %v2257_v40  ;;  %v3653_v40 = vld [vmem:[#allocation19] sm:$0xff]  }
 0x7d8   : > { %v2291_v43 = vsub.f32 1.0, %v3705_v41 }
 0x7da   : > { %2273 = vperm.xlu1 %3459, %v3705_v41  }
 0x7db   : > { %v3707_v45 = vpop.eup %3706 }
 0x7dc   : > { %v2292_v47 = vsub.f32 1.0, %v3707_v45 }
 0x7de   : > { %2301 = vperm.xlu1 %3459, %v2291_v43   ;;  %v3101_v43 = vld [vmem:[#allocation18] ss:$0 sm:$0xff] }
 0x7e2   : > { %2278 = vperm.xlu1 %3459, %v3707_v45  }
 0x7e4   : > { %v3709_v48 = vpop.eup %3708 }
 0x7e5   : > { %v2293_v49 = vsub.f32 1.0, %v3709_v48 }
 0x7e6   : > { %2306 = vperm.xlu1 %3459, %v2292_v47  }
 0x7ea   : > { %2283 = vperm.xlu1 %3459, %v3709_v48  }
 0x7ee   : > { %2311 = vperm.xlu1 %3459, %v2293_v49  }
 0x84f   : > { %v2269_v57 = vpop.permute.xlu0 %2268 }
 0x850   : > { %v2286_v60 = vmul.f32 %v2269_v57, %v4746_v5  ;;  %v3110_v57 = vld [vmem:[%s4841_s21] ss:$0 sm:$0xff] }
 0x851   : > { %v2297_v55 = vpop.permute.xlu1 %2296 }
 0x852   : > { %v2314_v58 = vmul.f32 %v2297_v55, %v4742_v3 }
 0x854   : > { %v2318_v63 = vadd.f32 %v2314_v58, %v2286_v60 }
 0x855   : > { %v2274_v56 = vpop.permute.xlu1 %2273 }
 0x856   : > { %v2287_v61 = vmul.f32 %v2274_v56, %v4740_v1 }
 0x859   : > { %v2302_v59 = vpop.permute.xlu1 %2301 }
 0x85a   : > { %v2315_v62 = vmul.f32 %v2302_v59, %v4744_v4  ;;  %v3643_v4 = vld [vmem:[#allocation16 + $0x10] sm:$0xff]  }
 0x85b   : > { %3294 = vmatprep.subr.bf16.mxu1 %v3643_v4 }
 0x85c   : > { %v2319_v0 = vadd.f32 %v2315_v62, %v2287_v61  ;;  %3295 = vmatpush3.bf16.msra.mxu1 %v3643_v4 }
 0x85d   : > { %v2279_v2 = vpop.permute.xlu1 %2278  ;;  %3296 = vmatprep.subr.bf16.mxu1 %v3644_v20 }
 0x85e   : > { %v2322_v6 = vpack.c.bf16 %v2319_v0, %v2318_v63  ;;  %v2288_v12 = vmul.f32 %v2279_v2, %v4758_v15  ;;  %v3650_v15 = vld [vmem:[#allocation19 + $0x18] sm:$0xff]  }
 0x860   : > { %3280 = vmatprep.mubr.bf16.mxu0 %v2322_v6  ;;  %3297 = vmatpush3.bf16.msra.mxu1 %v3644_v20 }
 0x861   : > { %v2307_v7 = vpop.permute.xlu1 %2306  ;;  %3298 = vmatprep.subr.bf16.mxu1 %v3645_v21 }
 0x862   : > { %v2316_v9 = vmul.f32 %v2307_v7, %v4754_v13  ;;  %v3646_v13 = vld [vmem:[#allocation19 + $0x38] sm:$0xff]  }
 0x863   : > { %3304 = vmatprep.subr.bf16.mxu0 %v3646_v13 }
 0x864   : > { %v2320_v18 = vadd.f32 %v2316_v9, %v2288_v12  ;;  %3299 = vmatpush3.bf16.msra.mxu1 %v3645_v21 }
 0x865   : > { %v2284_v8 = vpop.permute.xlu1 %2283 }
 0x866   : > { %v2289_v3 = vmul.f32 %v2284_v8, %v4752_v11  ;;  %v3648_v11 = vld [vmem:[#allocation19 + $0x28] sm:$0xff]  }
 0x869   : > { %v2312_v10 = vpop.permute.xlu1 %2311 }
 0x86a   : > { %v2317_v5 = vmul.f32 %v2312_v10, %v4756_v14  ;;  %v3649_v14 = vld [vmem:[#allocation19 + $0x20] sm:$0xff]  }
 0x86c   : > { %v2321_v1 = vadd.f32 %v2317_v5, %v2289_v3 }
 0x86e   : > { %v2323_v19 = vpack.c.bf16 %v2321_v1, %v2320_v18 }
 0x870   : > { %3281 = vmatmul.mubr.bf16.vlgmr.msra.gmra.mxu0 %v2323_v19 }
 0x871   : > { %3305 = vmatpush3.bf16.msra.mxu0 %v3646_v13 }
 0x872   : > { %3306 = vmatprep.subr.bf16.mxu0 %v3647_v22 }
 0x875   : > { %3307 = vmatpush3.bf16.msra.mxu0 %v3647_v22 }
 0x876   : > { %3308 = vmatprep.subr.bf16.mxu0 %v3648_v11 }
 0x879   : > { %3309 = vmatpush3.bf16.msra.mxu0 %v3648_v11 }
 0x87a   : > { %3310 = vmatprep.subr.bf16.mxu0 %v3649_v14 }
 0x87d   : > { %3311 = vmatpush3.bf16.msra.mxu0 %v3649_v14 }
 0x87e   : > { %3312 = vmatprep.subr.bf16.mxu0 %v3650_v15 }
 0x881   : > { %3313 = vmatpush3.bf16.msra.mxu0 %v3650_v15 }
 0x882   : > { %3314 = vmatprep.subr.bf16.mxu0 %v3651_v38 }
 0x885   : > { %3315 = vmatpush3.bf16.msra.mxu0 %v3651_v38 }
 0x886   : > { %3316 = vmatprep.subr.bf16.mxu0 %v3652_v39 }
 0x889   : > { %3317 = vmatpush3.bf16.msra.mxu0 %v3652_v39 }
 0x88a   : > { %3318 = vmatprep.subr.bf16.mxu0 %v3653_v40 }
 0x88d   : > { %3319 = vmatpush3.bf16.msra.mxu0 %v3653_v40 }
 0x930   : > { %v3282_v23 = vpop.f32.mrf.mxu0 }
 0x931   : > { %v2438_v29 = vadd.f32 %v3282_v23, %v3092_v25 }
 0x932   : > { %v2429_v24 = vpop.f32.mrf.mxu0 }
 0x933   : > { %v2430_v27 = vadd.f32 %v3092_v25, %v2429_v24  ;;  %v2446_v35 = vmax.f32 %v2438_v29, 0.0 }
 0x934   : > { %v3283_v26 = vpop.f32.mrf.mxu0 }
 0x935   : > { %v2441_v28 = vadd.f32 %v3283_v26, %v3092_v25  ;;  %v2444_v33 = vmax.f32 %v2430_v27, 0.0 }
 0x936   : > { %v2432_v30 = vpop.f32.mrf.mxu0 }
 0x937   : > { %v2433_v31 = vadd.f32 %v3092_v25, %v2432_v30  ;;  %v2447_v32 = vmax.f32 %v2441_v28, 0.0 }
 0x939   : > { %v2445_v34 = vmax.f32 %v2433_v31, 0.0  ;;  %v2449_v37 = vpack.c.bf16 %v2447_v32, %v2446_v35 }
 0x93b   : > { %v2448_v36 = vpack.c.bf16 %v2445_v34, %v2444_v33 }
 0x93d   : > { %3300 = vmatprep.mubr.bf16.mxu1 %v2448_v36 }
 0x93e   : > { %3301 = vmatmul.mubr.bf16.vlgmr.msra.gmra.mxu1 %v2449_v37 }
 0x9fe   : > { %v3302_v41 = vpop.f32.mrf.mxu1 }
 0x9ff   : > { %v2564_v47 = vadd.f32 %v3302_v41, %v3101_v43 }
 0xa00   : > { %v2555_v42 = vpop.f32.mrf.mxu1 }
 0xa01   : > { %v2556_v45 = vadd.f32 %v3101_v43, %v2555_v42  ;;  %v2572_v51 = vmax.f32 %v2564_v47, 0.0 }
 0xa02   : > { %v3303_v44 = vpop.f32.mrf.mxu1 }
 0xa03   : > { %v2567_v46 = vadd.f32 %v3303_v44, %v3101_v43  ;;  %v2570_v49 = vmax.f32 %v2556_v45, 0.0 }
 0xa04   : > { %v2558_v16 = vpop.f32.mrf.mxu1 }
 0xa05   : > { %v2559_v48 = vadd.f32 %v3101_v43, %v2558_v16  ;;  %v2573_v17 = vmax.f32 %v2567_v46, 0.0 }
 0xa07   : > { %v2571_v50 = vmax.f32 %v2559_v48, 0.0  ;;  %v2575_v53 = vpack.c.bf16 %v2573_v17, %v2572_v51 }
 0xa09   : > { %v2574_v52 = vpack.c.bf16 %v2571_v50, %v2570_v49 }
 0xa0b   : > { %3320 = vmatprep.mubr.bf16.mxu0 %v2574_v52 }
 0xa0c   : > { %3321 = vmatmul.mubr.bf16.vlgmr.msra.gmra.mxu0 %v2575_v53 }
 0xacc   : > { %v3322_v54 = vpop.f32.mrf.mxu0 }
 0xacd   : > { %v2690_v62 = vadd.f32 %v3322_v54, %v3110_v57 }
 0xace   : > { %v2681_v55 = vpop.f32.mrf.mxu0 }
 0xacf   : > { %v2682_v60 = vadd.f32 %v3110_v57, %v2681_v55 }
 0xad0   : > { %v3323_v56 = vpop.f32.mrf.mxu0 }
 0xad1   : > { %v2693_v58 = vadd.f32 %v3323_v56, %v3110_v57 }
 0xad2   : > { %v2684_v59 = vpop.f32.mrf.mxu0 }
 0xad3   : > { %v2685_v61 = vadd.f32 %v3110_v57, %v2684_v59  ;;  %v3153_v0 = vpack.c.bf16 %v2693_v58, %v2690_v62 }
 0xad5   : > { %v3148_v63 = vpack.c.bf16 %v2685_v61, %v2682_v60  ;;  %3157 = vst [vmem:[%s908_s24 + $0x8] sm:$0xff] %v3153_v0  }
 0xad7   : > { %3149 = vst [vmem:[%s908_s24] sm:$0xff] %v3148_v63  }
 0xad8 PF: > { %s39_s3 = sadd.s32 1, %s4056_s3  }
 0xad9   : > { %p36_p3 = scmp.ge.s32.totalorder %s39_s3, 4  }
 0xadb   :  { %38 = sbr.rel (!%p36_p3) target bundleno = 15 (0xf), region = 196 }
 0xae0   :  { %2738 = vsyncpa [#allocation3], 1 }
 0xae1   :  { %2740 = vsyncpa [#allocation3 + $0x1], 1 }
 0xae2   :  { %2741 = vsyncpa [#allocation5], 1 }
 0xae3   :  { %2742 = vsyncpa [#allocation8], 1 }
 0xae4   :  { %2743 = vsyncpa [#allocation11], 1 }
 0xae5   :  { %2744 = vsyncpa [#allocation14], 1 }
 0xae6   :  { %2745 = vsyncpa [#allocation17], 1 }
 0xae7   :  { %2746 = vsyncpa [#allocation20], 1 }

</bundles_post_ra>
